<compile_context>
chip_gen: v7x
topology: tpu7x:2x2x1
jax: 0.10.0
libtpu: 0.0.40
codegen_flags: <defaults>
</compile_context>

<pallas_src>
import math
import functools

import jax
import jax.numpy as jnp
from jax import lax
from jax.experimental import pallas as pl
from jax.experimental.pallas import tpu as pltpu


def _rup(x, m):
    return -(-x // m) * m


# ---------------------------------------------------------------------------
# Pallas kernels: 4 shifted (Cout_eff, Cin_eff) x (Cin_eff, L) matmuls + bias,
# optionally fused with (inverse) GDN over the channel (sublane) axis.
# ---------------------------------------------------------------------------
def _acc_taps(x_ref, w_ref, b_ref, l_out, shifts):
    # x_ref: (Cin_eff, L_in) flattened activation slab (row stride baked into shifts)
    # w_ref: (4, Cout_eff, Cin_eff)   b_ref: (Cout_eff, 1)
    xv = x_ref[...]
    y = None
    for t, s in enumerate(shifts):          # static lane-offset slices = in-kernel taps
        d = jnp.dot(w_ref[t], xv[:, s:s + l_out],
                    preferred_element_type=jnp.float32)
        y = d if y is None else y + d
    return y + b_ref[...]


def _tapconv_kernel(x_ref, w_ref, b_ref, o_ref, *, shifts):
    y = _acc_taps(x_ref, w_ref, b_ref, o_ref.shape[-1], shifts)
    o_ref[...] = y.astype(o_ref.dtype)


def _tapconv_gdn_kernel(x_ref, w_ref, b_ref, g_ref, bt_ref, o_ref, *,
                        shifts, inverse, cg):
    # GDN / IGDN applied per channel-block of size cg (the deconv output is four
    # stacked phases, each normalized independently with the same gamma/beta).
    y = _acc_taps(x_ref, w_ref, b_ref, o_ref.shape[-1], shifts)
    nblk = o_ref.shape[0] // cg
    for a in range(nblk):
        yb = y[a * cg:(a + 1) * cg, :]
        v = jnp.dot(g_ref[...], yb * yb,
                    preferred_element_type=jnp.float32) + bt_ref[...]
        scale = jnp.sqrt(v) if inverse else lax.rsqrt(v)
        o_ref[a * cg:(a + 1) * cg, :] = (yb * scale).astype(o_ref.dtype)


# ---------------------------------------------------------------------------
# Generic pallas_call wrapper for the tap-conv kernel
# ---------------------------------------------------------------------------
def _tapconv_call(xs, w4, bias, l_out, shifts, gdn=None):
    n, cin_eff, l_in = xs.shape
    cout_eff = w4.shape[1]

    in_specs = [
        pl.BlockSpec((None, cin_eff, l_in), lambda i: (i, 0, 0)),   # per-image slab
        pl.BlockSpec((4, cout_eff, cin_eff), lambda i: (0, 0, 0)),  # shared weights
        pl.BlockSpec((cout_eff, 1), lambda i: (0, 0)),              # bias
    ]
    args = [xs, w4, bias.reshape(cout_eff, 1)]

    flops = 2 * 4 * cout_eff * cin_eff * l_out * n
    transcendentals = 0
    bytes_acc = 4 * (xs.size + w4.size + cout_eff + n * cout_eff * l_out)

    if gdn is None:
        kernel = functools.partial(_tapconv_kernel, shifts=shifts)
    else:
        gamma, beta, inverse = gdn
        cg = gamma.shape[0]
        kernel = functools.partial(_tapconv_gdn_kernel, shifts=shifts,
                                   inverse=inverse, cg=cg)
        in_specs += [pl.BlockSpec((cg, cg), lambda i: (0, 0)),
                     pl.BlockSpec((cg, 1), lambda i: (0, 0))]
        args += [gamma, beta.reshape(cg, 1)]
        flops += n * l_out * (2 * cg * cg * (cout_eff // cg) + 4 * cout_eff)
        transcendentals = n * cout_eff * l_out
        bytes_acc += 4 * (gamma.size + beta.size)

    return pl.pallas_call(
        kernel,
        out_shape=jax.ShapeDtypeStruct((n, cout_eff, l_out), xs.dtype),
        grid_spec=pltpu.PrefetchScalarGridSpec(
            num_scalar_prefetch=0,
            grid=(n,),                      # N >= 2 parallel steps -> both v7x TCs busy
            in_specs=in_specs,
            out_specs=pl.BlockSpec((None, cout_eff, l_out), lambda i: (i, 0, 0)),
        ),
        # Per-step blocks are a few hundred KiB here — well under the default
        # scoped-VMEM limit on v5e/v6e/v7x; raise vmem_limit_bytes if slabs grow.
        compiler_params=pltpu.CompilerParams(
            dimension_semantics=("parallel",)),
        cost_estimate=pl.CostEstimate(flops=flops,
                                      transcendentals=transcendentals,
                                      bytes_accessed=bytes_acc),
    )(*args)


# ---------------------------------------------------------------------------
# Layer wrappers (layout plumbing only — all arithmetic runs in the kernels)
# ---------------------------------------------------------------------------
def conv3x3_s2_pallas(x, w, b, gdn=None):
    """PyTorch Conv2d(k=3, stride=2, padding=1) on NCHW weights (O,I,3,3), +GDN fuse."""
    n, cin, h, wd = x.shape
    assert h % 2 == 0 and wd % 2 == 0, "stride-2 phase decomposition assumes even H/W"
    cout = w.shape[0]
    oh, ow = h // 2, wd // 2
    pw, ph = ow + 1, oh + 1                    # phase-slab width / height (row stride pw)

    # space-to-depth: 4 phases of the padded input stacked on the channel axis
    xp = jnp.pad(x, ((0, 0), (0, 0), (1, 1), (1, 1)))
    phases = jnp.stack([xp[:, :, a::2, bb::2] for a in (0, 1) for bb in (0, 1)],
                       axis=1)                                  # (N, 4, Cin, ph, pw)
    l_out = _rup(oh * pw, 128)                 # lane-dense output length
    l_in = _rup(l_out + pw + 2, 128)           # covers max shift (pw+1)
    xs = phases.reshape(n, 4 * cin, ph * pw)
    xs = jnp.pad(xs, ((0, 0), (0, 0), (0, l_in - ph * pw)))

    # per-shift weights over the stacked-phase input channels
    wm = []
    for dh in (0, 1):
        for dw in (0, 1):
            m = jnp.zeros((cout, 4 * cin), w.dtype)
            for a in (0, 1):
                kh = 2 * dh + a
                if kh > 2:
                    continue
                for bb in (0, 1):
                    kw = 2 * dw + bb
                    if kw > 2:
                        continue
                    blk = 2 * a + bb
                    m = m.at[:, blk * cin:(blk + 1) * cin].set(w[:, :, kh, kw])
            wm.append(m)
    w4 = jnp.stack(wm)                                          # (4, Cout, 4*Cin)

    out = _tapconv_call(xs, w4, b, l_out, shifts=(0, 1, pw, pw + 1), gdn=gdn)
    # drop the padded row-stride column and the lane-padding tail
    return out[:, :, :oh * pw].reshape(n, cout, oh, pw)[:, :, :, :ow]


def deconv3x3_s2_pallas(x, w, b, gdn=None):
    """PyTorch ConvTranspose2d(k=3, stride=2, padding=1, output_padding=1),
    weights (I,O,3,3), sub-pixel decomposition, optional IGDN fuse."""
    n, cin, h, wd = x.shape
    cout = w.shape[1]
    pw, phh = wd + 1, h + 1                    # zero pad one row/col at bottom/right

    xp = jnp.pad(x, ((0, 0), (0, 0), (0, 1), (0, 1)))           # (N, Cin, h+1, pw)
    l_out = _rup(h * pw, 128)
    l_in = _rup(l_out + pw + 2, 128)
    xs = jnp.pad(xp.reshape(n, cin, phh * pw),
                 ((0, 0), (0, 0), (0, l_in - phh * pw)))

    # per-shift weights producing the 4 stacked output phases
    wt = jnp.transpose(w, (1, 0, 2, 3))                         # (Cout, Cin, 3, 3)
    wm = []
    for di in (0, 1):
        for dj in (0, 1):
            m = jnp.zeros((4 * cout, cin), w.dtype)
            for a in (0, 1):
                kh = a + 1 - 2 * di
                if not 0 <= kh <= 2:
                    continue
                for bb in (0, 1):
                    kw = bb + 1 - 2 * dj
                    if not 0 <= kw <= 2:
                        continue
                    blk = 2 * a + bb
                    m = m.at[blk * cout:(blk + 1) * cout, :].set(wt[:, :, kh, kw])
            wm.append(m)
    w4 = jnp.stack(wm)                                          # (4, 4*Cout, Cin)
    b4 = jnp.tile(b, 4)

    out = _tapconv_call(xs, w4, b4, l_out, shifts=(0, 1, pw, pw + 1), gdn=gdn)
    # depth-to-space: un-stack the 4 output phases and interleave into (2H, 2W)
    out = out[:, :, :h * pw].reshape(n, 2, 2, cout, h, pw)[:, :, :, :, :, :wd]
    return out.transpose(0, 3, 4, 1, 5, 2).reshape(n, cout, 2 * h, 2 * wd)


def mv_refinement_forward(mv, p):
    """conv1 -> GDN -> conv2 -> deconv1 -> IGDN -> deconv2 (all Pallas)."""
    f = conv3x3_s2_pallas(mv, p["w1"], p["b1"],
                          gdn=(p["gdn1_gamma"], p["gdn1_beta"], False))
    f = conv3x3_s2_pallas(f, p["w2"], p["b2"])
    f = deconv3x3_s2_pallas(f, p["wt1"], p["bt1"],
                            gdn=(p["igdn1_gamma"], p["igdn1_beta"], True))
    return deconv3x3_s2_pallas(f, p["wt2"], p["bt2"])


# ---------------------------------------------------------------------------
# Pure-JAX reference (XLA convs) for the correctness check
# ---------------------------------------------------------------------------
def _ref_forward(mv, p):
    dn = lambda rhs: ("NCHW", rhs, "NCHW")

    def conv(x, w, b, s, pad):
        y = lax.conv_general_dilated(x, w, (s, s), ((pad, pad), (pad, pad)),
                                     dimension_numbers=dn("OIHW"),
                                     precision=lax.Precision.HIGHEST)
        return y + b[None, :, None, None]

    def deconv(x, w, b, s, pad, opad):
        k = w.shape[2]
        y = lax.conv_general_dilated(x, w[:, :, ::-1, ::-1], (1, 1),
                                     ((k - 1 - pad, k - 1 - pad + opad),) * 2,
                                     lhs_dilation=(s, s),
                                     dimension_numbers=dn("IOHW"),
                                     precision=lax.Precision.HIGHEST)
        return y + b[None, :, None, None]

    def gdn(x, gamma, beta, inverse):
        v = lax.conv_general_dilated(x * x, gamma[:, :, None, None], (1, 1),
                                     ((0, 0), (0, 0)), dimension_numbers=dn("OIHW"),
                                     precision=lax.Precision.HIGHEST)
        nrm = jnp.sqrt(v + beta[None, :, None, None])
        return x * nrm if inverse else x / nrm

    f = gdn(conv(mv, p["w1"], p["b1"], 2, 1), p["gdn1_gamma"], p["gdn1_beta"], False)
    f = conv(f, p["w2"], p["b2"], 2, 1)
    f = gdn(deconv(f, p["wt1"], p["bt1"], 2, 1, 1), p["igdn1_gamma"], p["igdn1_beta"], True)
    return deconv(f, p["wt2"], p["bt2"], 2, 1, 1)


# ---------------------------------------------------------------------------
# Parameter init (matches the module: xavier_normal(sqrt(2)), bias=0.01, GDN init)
# ---------------------------------------------------------------------------
def _xavier_normal(key, shape, gain):
    rf = shape[2] * shape[3]
    fan_in, fan_out = shape[1] * rf, shape[0] * rf
    std = gain * math.sqrt(2.0 / (fan_in + fan_out))
    return std * jax.random.normal(key, shape, dtype=jnp.float32)


def _gdn_params(key, c):
    # Effective (reparametrized) GDN params: beta ~= 1, gamma ~= 0.1*I at init, plus a
    # small positive off-diagonal so the cross-channel term is actually exercised.
    off = 0.02 * jax.random.uniform(key, (c, c), dtype=jnp.float32)
    gamma = 0.1 * jnp.eye(c, dtype=jnp.float32) + off
    beta = jnp.ones((c,), dtype=jnp.float32)
    return gamma, beta


if __name__ == "__main__":
    N, C_IN, C_OUT, C_MID, H, W = 2, 2, 2, 64, 16, 16
    gain = math.sqrt(2.0)
    keys = jax.random.split(jax.random.PRNGKey(0), 7)

    params = dict(
        w1=_xavier_normal(keys[0], (C_MID, C_IN, 3, 3), gain),
        b1=jnp.full((C_MID,), 0.01, jnp.float32),
        w2=_xavier_normal(keys[1], (C_MID, C_MID, 3, 3), gain),
        b2=jnp.full((C_MID,), 0.01, jnp.float32),
        wt1=_xavier_normal(keys[2], (C_MID, C_MID, 3, 3), gain),   # ConvTranspose2d (in,out,k,k)
        bt1=jnp.full((C_MID,), 0.01, jnp.float32),
        wt2=_xavier_normal(keys[3], (C_MID, C_OUT, 3, 3), gain),
        bt2=jnp.full((C_OUT,), 0.01, jnp.float32),
    )
    g1, be1 = _gdn_params(keys[4], C_MID)
    g2, be2 = _gdn_params(keys[5], C_MID)
    params.update(gdn1_gamma=g1, gdn1_beta=be1, igdn1_gamma=g2, igdn1_beta=be2)

    mv = jax.random.normal(keys[6], (N, C_IN, H, W), dtype=jnp.float32)

    fwd = jax.jit(mv_refinement_forward)
    out = jax.block_until_ready(fwd(mv, params))
    assert out.shape == (N, C_OUT, H, W), out.shape

    ref = _ref_forward(mv, params)
    max_err = float(jnp.max(jnp.abs(out - ref)))
    assert jnp.allclose(out, ref, atol=1e-3, rtol=1e-3), f"mismatch vs reference: {max_err}"

    print("KERNEL_OK")
</pallas_src>

<mosaic_0001>
module attributes {stable_mosaic.version = 11 : i64} {
  func.func @_tapconv_gdn_kernel(%arg0: i32, %arg1: memref<1x8x256xf32, #tpu.memory_space<vmem>>, %arg2: memref<4x64x8xf32, #tpu.memory_space<vmem>>, %arg3: memref<64x1xf32, #tpu.memory_space<vmem>>, %arg4: memref<64x64xf32, #tpu.memory_space<vmem>>, %arg5: memref<64x1xf32, #tpu.memory_space<vmem>>, %arg6: memref<1x64x128xf32, #tpu.memory_space<vmem>>) attributes {dimension_semantics = [#tpu.dimension_semantics<parallel>], iteration_bounds = array<i64: 2>, scalar_prefetch = 0 : i64, scratch_operands = 0 : i64, tpu.core_type = #tpu.core_type<tc>, window_params = [{transform_indices = @transform_0, window_bounds = array<i64: 1, 8, 256>}, {pipeline_mode = #tpu.pipeline_mode<synchronous>, transform_indices = @transform_1, window_bounds = array<i64: 4, 64, 8>}, {pipeline_mode = #tpu.pipeline_mode<synchronous>, transform_indices = @transform_2, window_bounds = array<i64: 64, 1>}, {pipeline_mode = #tpu.pipeline_mode<synchronous>, transform_indices = @transform_3, window_bounds = array<i64: 64, 64>}, {pipeline_mode = #tpu.pipeline_mode<synchronous>, transform_indices = @transform_4, window_bounds = array<i64: 64, 1>}, {transform_indices = @transform_5, window_bounds = array<i64: 1, 64, 128>}]} {
    %c0 = arith.constant 0 : index
    %c0_0 = arith.constant 0 : index
    %c0_1 = arith.constant 0 : index
    %0 = vector.load %arg1[%c0, %c0_0, %c0_1] : memref<1x8x256xf32, #tpu.memory_space<vmem>>, vector<1x8x256xf32>
    %1 = vector.shape_cast %0 : vector<1x8x256xf32> to vector<8x256xf32>
    %c0_2 = arith.constant 0 : index
    %c0_3 = arith.constant 0 : index
    %c0_4 = arith.constant 0 : index
    %2 = vector.load %arg2[%c0_2, %c0_3, %c0_4] : memref<4x64x8xf32, #tpu.memory_space<vmem>>, vector<1x64x8xf32>
    %3 = vector.shape_cast %2 : vector<1x64x8xf32> to vector<64x8xf32>
    %4 = vector.extract_strided_slice %1 {offsets = [0, 0], sizes = [8, 128], strides = [1, 1]} : vector<8x256xf32> to vector<8x128xf32>
    %cst = arith.constant dense<0.000000e+00> : vector<64x128xf32>
    %5 = tpu.matmul %3, %4, %cst {dimension_numbers = #tpu.dot_dimension_numbers<[1], [0], [0], [1], [0, 0, 1, 1], [], []>} : vector<64x8xf32>, vector<8x128xf32>, vector<64x128xf32> -> vector<64x128xf32>
    %c1 = arith.constant 1 : index
    %c0_5 = arith.constant 0 : index
    %c0_6 = arith.constant 0 : index
    %6 = vector.load %arg2[%c1, %c0_5, %c0_6] : memref<4x64x8xf32, #tpu.memory_space<vmem>>, vector<1x64x8xf32>
    %7 = vector.shape_cast %6 : vector<1x64x8xf32> to vector<64x8xf32>
    %8 = vector.extract_strided_slice %1 {offsets = [0, 1], sizes = [8, 128], strides = [1, 1]} : vector<8x256xf32> to vector<8x128xf32>
    %cst_7 = arith.constant dense<0.000000e+00> : vector<64x128xf32>
    %9 = tpu.matmul %7, %8, %cst_7 {dimension_numbers = #tpu.dot_dimension_numbers<[1], [0], [0], [1], [0, 0, 1, 1], [], []>} : vector<64x8xf32>, vector<8x128xf32>, vector<64x128xf32> -> vector<64x128xf32>
    %10 = arith.addf %5, %9 : vector<64x128xf32>
    %c2 = arith.constant 2 : index
    %c0_8 = arith.constant 0 : index
    %c0_9 = arith.constant 0 : index
    %11 = vector.load %arg2[%c2, %c0_8, %c0_9] : memref<4x64x8xf32, #tpu.memory_space<vmem>>, vector<1x64x8xf32>
    %12 = vector.shape_cast %11 : vector<1x64x8xf32> to vector<64x8xf32>
    %13 = vector.extract_strided_slice %1 {offsets = [0, 9], sizes = [8, 128], strides = [1, 1]} : vector<8x256xf32> to vector<8x128xf32>
    %cst_10 = arith.constant dense<0.000000e+00> : vector<64x128xf32>
    %14 = tpu.matmul %12, %13, %cst_10 {dimension_numbers = #tpu.dot_dimension_numbers<[1], [0], [0], [1], [0, 0, 1, 1], [], []>} : vector<64x8xf32>, vector<8x128xf32>, vector<64x128xf32> -> vector<64x128xf32>
    %15 = arith.addf %10, %14 : vector<64x128xf32>
    %c3 = arith.constant 3 : index
    %c0_11 = arith.constant 0 : index
    %c0_12 = arith.constant 0 : index
    %16 = vector.load %arg2[%c3, %c0_11, %c0_12] : memref<4x64x8xf32, #tpu.memory_space<vmem>>, vector<1x64x8xf32>
    %17 = vector.shape_cast %16 : vector<1x64x8xf32> to vector<64x8xf32>
    %18 = vector.extract_strided_slice %1 {offsets = [0, 10], sizes = [8, 128], strides = [1, 1]} : vector<8x256xf32> to vector<8x128xf32>
    %cst_13 = arith.constant dense<0.000000e+00> : vector<64x128xf32>
    %19 = tpu.matmul %17, %18, %cst_13 {dimension_numbers = #tpu.dot_dimension_numbers<[1], [0], [0], [1], [0, 0, 1, 1], [], []>} : vector<64x8xf32>, vector<8x128xf32>, vector<64x128xf32> -> vector<64x128xf32>
    %20 = arith.addf %15, %19 : vector<64x128xf32>
    %c0_14 = arith.constant 0 : index
    %c0_15 = arith.constant 0 : index
    %21 = vector.load %arg3[%c0_14, %c0_15] : memref<64x1xf32, #tpu.memory_space<vmem>>, vector<64x1xf32>
    %22 = vector.broadcast %21 : vector<64x1xf32> to vector<64x128xf32>
    %23 = arith.addf %20, %22 : vector<64x128xf32>
    %c0_16 = arith.constant 0 : index
    %c0_17 = arith.constant 0 : index
    %24 = vector.load %arg4[%c0_16, %c0_17] : memref<64x64xf32, #tpu.memory_space<vmem>>, vector<64x64xf32>
    %25 = arith.mulf %23, %23 : vector<64x128xf32>
    %cst_18 = arith.constant dense<0.000000e+00> : vector<64x128xf32>
    %26 = tpu.matmul %24, %25, %cst_18 {dimension_numbers = #tpu.dot_dimension_numbers<[1], [0], [0], [1], [0, 0, 1, 1], [], []>} : vector<64x64xf32>, vector<64x128xf32>, vector<64x128xf32> -> vector<64x128xf32>
    %c0_19 = arith.constant 0 : index
    %c0_20 = arith.constant 0 : index
    %27 = vector.load %arg5[%c0_19, %c0_20] : memref<64x1xf32, #tpu.memory_space<vmem>>, vector<64x1xf32>
    %28 = vector.broadcast %27 : vector<64x1xf32> to vector<64x128xf32>
    %29 = arith.addf %26, %28 : vector<64x128xf32>
    %30 = math.rsqrt %29 : vector<64x128xf32>
    %31 = arith.mulf %23, %30 : vector<64x128xf32>
    %c0_21 = arith.constant 0 : index
    %c0_22 = arith.constant 0 : index
    %c0_23 = arith.constant 0 : index
    %32 = vector.load %arg6[%c0_21, %c0_22, %c0_23] : memref<1x64x128xf32, #tpu.memory_space<vmem>>, vector<1x64x128xf32>
    %33 = vector.shape_cast %32 : vector<1x64x128xf32> to vector<64x128xf32>
    %34 = vector.shape_cast %31 : vector<64x128xf32> to vector<1x64x128xf32>
    tpu.vector_store %arg6[%c0_21, %c0_22, %c0_23], %34 {strides = array<i32>} : memref<1x64x128xf32, #tpu.memory_space<vmem>>, vector<1x64x128xf32>,
    return
  }
  func.func @transform_0(%arg0: i32) -> (i32, i32, i32) {
    %c0_i32 = arith.constant 0 : i32
    %c0_i32_0 = arith.constant 0 : i32
    %c0_i32_1 = arith.constant 0 : i32
    return %arg0, %c0_i32, %c0_i32_0 : i32, i32, i32
  }
  func.func @transform_1(%arg0: i32) -> (i32, i32, i32) {
    %c0_i32 = arith.constant 0 : i32
    %c0_i32_0 = arith.constant 0 : i32
    %c0_i32_1 = arith.constant 0 : i32
    %c0_i32_2 = arith.constant 0 : i32
    return %c0_i32, %c0_i32_0, %c0_i32_1 : i32, i32, i32
  }
  func.func @transform_2(%arg0: i32) -> (i32, i32) {
    %c0_i32 = arith.constant 0 : i32
    %c0_i32_0 = arith.constant 0 : i32
    %c0_i32_1 = arith.constant 0 : i32
    return %c0_i32, %c0_i32_0 : i32, i32
  }
  func.func @transform_3(%arg0: i32) -> (i32, i32) {
    %c0_i32 = arith.constant 0 : i32
    %c0_i32_0 = arith.constant 0 : i32
    %c0_i32_1 = arith.constant 0 : i32
    return %c0_i32, %c0_i32_0 : i32, i32
  }
  func.func @transform_4(%arg0: i32) -> (i32, i32) {
    %c0_i32 = arith.constant 0 : i32
    %c0_i32_0 = arith.constant 0 : i32
    %c0_i32_1 = arith.constant 0 : i32
    return %c0_i32, %c0_i32_0 : i32, i32
  }
  func.func @transform_5(%arg0: i32) -> (i32, i32, i32) {
    %c0_i32 = arith.constant 0 : i32
    %c0_i32_0 = arith.constant 0 : i32
    %c0_i32_1 = arith.constant 0 : i32
    return %arg0, %c0_i32, %c0_i32_0 : i32, i32, i32
  }
}

module attributes {stable_mosaic.version = 11 : i64} {
  func.func @_tapconv_kernel(%arg0: i32, %arg1: memref<1x256x256xf32, #tpu.memory_space<vmem>>, %arg2: memref<4x64x256xf32, #tpu.memory_space<vmem>>, %arg3: memref<64x1xf32, #tpu.memory_space<vmem>>, %arg4: memref<1x64x128xf32, #tpu.memory_space<vmem>>) attributes {dimension_semantics = [#tpu.dimension_semantics<parallel>], iteration_bounds = array<i64: 2>, scalar_prefetch = 0 : i64, scratch_operands = 0 : i64, tpu.core_type = #tpu.core_type<tc>, window_params = [{transform_indices = @transform_0, window_bounds = array<i64: 1, 256, 256>}, {pipeline_mode = #tpu.pipeline_mode<synchronous>, transform_indices = @transform_1, window_bounds = array<i64: 4, 64, 256>}, {pipeline_mode = #tpu.pipeline_mode<synchronous>, transform_indices = @transform_2, window_bounds = array<i64: 64, 1>}, {transform_indices = @transform_3, window_bounds = array<i64: 1, 64, 128>}]} {
    %c0 = arith.constant 0 : index
    %c0_0 = arith.constant 0 : index
    %c0_1 = arith.constant 0 : index
    %0 = vector.load %arg1[%c0, %c0_0, %c0_1] : memref<1x256x256xf32, #tpu.memory_space<vmem>>, vector<1x256x256xf32>
    %1 = vector.shape_cast %0 : vector<1x256x256xf32> to vector<256x256xf32>
    %c0_2 = arith.constant 0 : index
    %c0_3 = arith.constant 0 : index
    %c0_4 = arith.constant 0 : index
    %2 = vector.load %arg2[%c0_2, %c0_3, %c0_4] : memref<4x64x256xf32, #tpu.memory_space<vmem>>, vector<1x64x256xf32>
    %3 = vector.shape_cast %2 : vector<1x64x256xf32> to vector<64x256xf32>
    %4 = vector.extract_strided_slice %1 {offsets = [0, 0], sizes = [256, 128], strides = [1, 1]} : vector<256x256xf32> to vector<256x128xf32>
    %cst = arith.constant dense<0.000000e+00> : vector<64x128xf32>
    %5 = tpu.matmul %3, %4, %cst {dimension_numbers = #tpu.dot_dimension_numbers<[1], [0], [0], [1], [0, 0, 1, 1], [], []>} : vector<64x256xf32>, vector<256x128xf32>, vector<64x128xf32> -> vector<64x128xf32>
    %c1 = arith.constant 1 : index
    %c0_5 = arith.constant 0 : index
    %c0_6 = arith.constant 0 : index
    %6 = vector.load %arg2[%c1, %c0_5, %c0_6] : memref<4x64x256xf32, #tpu.memory_space<vmem>>, vector<1x64x256xf32>
    %7 = vector.shape_cast %6 : vector<1x64x256xf32> to vector<64x256xf32>
    %8 = vector.extract_strided_slice %1 {offsets = [0, 1], sizes = [256, 128], strides = [1, 1]} : vector<256x256xf32> to vector<256x128xf32>
    %cst_7 = arith.constant dense<0.000000e+00> : vector<64x128xf32>
    %9 = tpu.matmul %7, %8, %cst_7 {dimension_numbers = #tpu.dot_dimension_numbers<[1], [0], [0], [1], [0, 0, 1, 1], [], []>} : vector<64x256xf32>, vector<256x128xf32>, vector<64x128xf32> -> vector<64x128xf32>
    %10 = arith.addf %5, %9 : vector<64x128xf32>
    %c2 = arith.constant 2 : index
    %c0_8 = arith.constant 0 : index
    %c0_9 = arith.constant 0 : index
    %11 = vector.load %arg2[%c2, %c0_8, %c0_9] : memref<4x64x256xf32, #tpu.memory_space<vmem>>, vector<1x64x256xf32>
    %12 = vector.shape_cast %11 : vector<1x64x256xf32> to vector<64x256xf32>
    %13 = vector.extract_strided_slice %1 {offsets = [0, 5], sizes = [256, 128], strides = [1, 1]} : vector<256x256xf32> to vector<256x128xf32>
    %cst_10 = arith.constant dense<0.000000e+00> : vector<64x128xf32>
    %14 = tpu.matmul %12, %13, %cst_10 {dimension_numbers = #tpu.dot_dimension_numbers<[1], [0], [0], [1], [0, 0, 1, 1], [], []>} : vector<64x256xf32>, vector<256x128xf32>, vector<64x128xf32> -> vector<64x128xf32>
    %15 = arith.addf %10, %14 : vector<64x128xf32>
    %c3 = arith.constant 3 : index
    %c0_11 = arith.constant 0 : index
    %c0_12 = arith.constant 0 : index
    %16 = vector.load %arg2[%c3, %c0_11, %c0_12] : memref<4x64x256xf32, #tpu.memory_space<vmem>>, vector<1x64x256xf32>
    %17 = vector.shape_cast %16 : vector<1x64x256xf32> to vector<64x256xf32>
    %18 = vector.extract_strided_slice %1 {offsets = [0, 6], sizes = [256, 128], strides = [1, 1]} : vector<256x256xf32> to vector<256x128xf32>
    %cst_13 = arith.constant dense<0.000000e+00> : vector<64x128xf32>
    %19 = tpu.matmul %17, %18, %cst_13 {dimension_numbers = #tpu.dot_dimension_numbers<[1], [0], [0], [1], [0, 0, 1, 1], [], []>} : vector<64x256xf32>, vector<256x128xf32>, vector<64x128xf32> -> vector<64x128xf32>
    %20 = arith.addf %15, %19 : vector<64x128xf32>
    %c0_14 = arith.constant 0 : index
    %c0_15 = arith.constant 0 : index
    %21 = vector.load %arg3[%c0_14, %c0_15] : memref<64x1xf32, #tpu.memory_space<vmem>>, vector<64x1xf32>
    %22 = vector.broadcast %21 : vector<64x1xf32> to vector<64x128xf32>
    %23 = arith.addf %20, %22 : vector<64x128xf32>
    %c0_16 = arith.constant 0 : index
    %c0_17 = arith.constant 0 : index
    %c0_18 = arith.constant 0 : index
    %24 = vector.load %arg4[%c0_16, %c0_17, %c0_18] : memref<1x64x128xf32, #tpu.memory_space<vmem>>, vector<1x64x128xf32>
    %25 = vector.shape_cast %24 : vector<1x64x128xf32> to vector<64x128xf32>
    %26 = vector.shape_cast %23 : vector<64x128xf32> to vector<1x64x128xf32>
    tpu.vector_store %arg4[%c0_16, %c0_17, %c0_18], %26 {strides = array<i32>} : memref<1x64x128xf32, #tpu.memory_space<vmem>>, vector<1x64x128xf32>,
    return
  }
  func.func @transform_0(%arg0: i32) -> (i32, i32, i32) {
    %c0_i32 = arith.constant 0 : i32
    %c0_i32_0 = arith.constant 0 : i32
    %c0_i32_1 = arith.constant 0 : i32
    return %arg0, %c0_i32, %c0_i32_0 : i32, i32, i32
  }
  func.func @transform_1(%arg0: i32) -> (i32, i32, i32) {
    %c0_i32 = arith.constant 0 : i32
    %c0_i32_0 = arith.constant 0 : i32
    %c0_i32_1 = arith.constant 0 : i32
    %c0_i32_2 = arith.constant 0 : i32
    return %c0_i32, %c0_i32_0, %c0_i32_1 : i32, i32, i32
  }
  func.func @transform_2(%arg0: i32) -> (i32, i32) {
    %c0_i32 = arith.constant 0 : i32
    %c0_i32_0 = arith.constant 0 : i32
    %c0_i32_1 = arith.constant 0 : i32
    return %c0_i32, %c0_i32_0 : i32, i32
  }
  func.func @transform_3(%arg0: i32) -> (i32, i32, i32) {
    %c0_i32 = arith.constant 0 : i32
    %c0_i32_0 = arith.constant 0 : i32
    %c0_i32_1 = arith.constant 0 : i32
    return %arg0, %c0_i32, %c0_i32_0 : i32, i32, i32
  }
}

module attributes {stable_mosaic.version = 11 : i64} {
  func.func @_tapconv_gdn_kernel(%arg0: i32, %arg1: memref<1x64x256xf32, #tpu.memory_space<vmem>>, %arg2: memref<4x256x64xf32, #tpu.memory_space<vmem>>, %arg3: memref<256x1xf32, #tpu.memory_space<vmem>>, %arg4: memref<64x64xf32, #tpu.memory_space<vmem>>, %arg5: memref<64x1xf32, #tpu.memory_space<vmem>>, %arg6: memref<1x256x128xf32, #tpu.memory_space<vmem>>) attributes {dimension_semantics = [#tpu.dimension_semantics<parallel>], iteration_bounds = array<i64: 2>, scalar_prefetch = 0 : i64, scratch_operands = 0 : i64, tpu.core_type = #tpu.core_type<tc>, window_params = [{transform_indices = @transform_0, window_bounds = array<i64: 1, 64, 256>}, {pipeline_mode = #tpu.pipeline_mode<synchronous>, transform_indices = @transform_1, window_bounds = array<i64: 4, 256, 64>}, {pipeline_mode = #tpu.pipeline_mode<synchronous>, transform_indices = @transform_2, window_bounds = array<i64: 256, 1>}, {pipeline_mode = #tpu.pipeline_mode<synchronous>, transform_indices = @transform_3, window_bounds = array<i64: 64, 64>}, {pipeline_mode = #tpu.pipeline_mode<synchronous>, transform_indices = @transform_4, window_bounds = array<i64: 64, 1>}, {transform_indices = @transform_5, window_bounds = array<i64: 1, 256, 128>}]} {
    %c0 = arith.constant 0 : index
    %c0_0 = arith.constant 0 : index
    %c0_1 = arith.constant 0 : index
    %0 = vector.load %arg1[%c0, %c0_0, %c0_1] : memref<1x64x256xf32, #tpu.memory_space<vmem>>, vector<1x64x256xf32>
    %1 = vector.shape_cast %0 : vector<1x64x256xf32> to vector<64x256xf32>
    %c0_2 = arith.constant 0 : index
    %c0_3 = arith.constant 0 : index
    %c0_4 = arith.constant 0 : index
    %2 = vector.load %arg2[%c0_2, %c0_3, %c0_4] : memref<4x256x64xf32, #tpu.memory_space<vmem>>, vector<1x256x64xf32>
    %3 = vector.shape_cast %2 : vector<1x256x64xf32> to vector<256x64xf32>
    %4 = vector.extract_strided_slice %1 {offsets = [0, 0], sizes = [64, 128], strides = [1, 1]} : vector<64x256xf32> to vector<64x128xf32>
    %cst = arith.constant dense<0.000000e+00> : vector<256x128xf32>
    %5 = tpu.matmul %3, %4, %cst {dimension_numbers = #tpu.dot_dimension_numbers<[1], [0], [0], [1], [0, 0, 1, 1], [], []>} : vector<256x64xf32>, vector<64x128xf32>, vector<256x128xf32> -> vector<256x128xf32>
    %c1 = arith.constant 1 : index
    %c0_5 = arith.constant 0 : index
    %c0_6 = arith.constant 0 : index
    %6 = vector.load %arg2[%c1, %c0_5, %c0_6] : memref<4x256x64xf32, #tpu.memory_space<vmem>>, vector<1x256x64xf32>
    %7 = vector.shape_cast %6 : vector<1x256x64xf32> to vector<256x64xf32>
    %8 = vector.extract_strided_slice %1 {offsets = [0, 1], sizes = [64, 128], strides = [1, 1]} : vector<64x256xf32> to vector<64x128xf32>
    %cst_7 = arith.constant dense<0.000000e+00> : vector<256x128xf32>
    %9 = tpu.matmul %7, %8, %cst_7 {dimension_numbers = #tpu.dot_dimension_numbers<[1], [0], [0], [1], [0, 0, 1, 1], [], []>} : vector<256x64xf32>, vector<64x128xf32>, vector<256x128xf32> -> vector<256x128xf32>
    %10 = arith.addf %5, %9 : vector<256x128xf32>
    %c2 = arith.constant 2 : index
    %c0_8 = arith.constant 0 : index
    %c0_9 = arith.constant 0 : index
    %11 = vector.load %arg2[%c2, %c0_8, %c0_9] : memref<4x256x64xf32, #tpu.memory_space<vmem>>, vector<1x256x64xf32>
    %12 = vector.shape_cast %11 : vector<1x256x64xf32> to vector<256x64xf32>
    %13 = vector.extract_strided_slice %1 {offsets = [0, 5], sizes = [64, 128], strides = [1, 1]} : vector<64x256xf32> to vector<64x128xf32>
    %cst_10 = arith.constant dense<0.000000e+00> : vector<256x128xf32>
    %14 = tpu.matmul %12, %13, %cst_10 {dimension_numbers = #tpu.dot_dimension_numbers<[1], [0], [0], [1], [0, 0, 1, 1], [], []>} : vector<256x64xf32>, vector<64x128xf32>, vector<256x128xf32> -> vector<256x128xf32>
    %15 = arith.addf %10, %14 : vector<256x128xf32>
    %c3 = arith.constant 3 : index
    %c0_11 = arith.constant 0 : index
    %c0_12 = arith.constant 0 : index
    %16 = vector.load %arg2[%c3, %c0_11, %c0_12] : memref<4x256x64xf32, #tpu.memory_space<vmem>>, vector<1x256x64xf32>
    %17 = vector.shape_cast %16 : vector<1x256x64xf32> to vector<256x64xf32>
    %18 = vector.extract_strided_slice %1 {offsets = [0, 6], sizes = [64, 128], strides = [1, 1]} : vector<64x256xf32> to vector<64x128xf32>
    %cst_13 = arith.constant dense<0.000000e+00> : vector<256x128xf32>
    %19 = tpu.matmul %17, %18, %cst_13 {dimension_numbers = #tpu.dot_dimension_numbers<[1], [0], [0], [1], [0, 0, 1, 1], [], []>} : vector<256x64xf32>, vector<64x128xf32>, vector<256x128xf32> -> vector<256x128xf32>
    %20 = arith.addf %15, %19 : vector<256x128xf32>
    %c0_14 = arith.constant 0 : index
    %c0_15 = arith.constant 0 : index
    %21 = vector.load %arg3[%c0_14, %c0_15] : memref<256x1xf32, #tpu.memory_space<vmem>>, vector<256x1xf32>
    %22 = vector.broadcast %21 : vector<256x1xf32> to vector<256x128xf32>
    %23 = arith.addf %20, %22 : vector<256x128xf32>
    %24 = vector.extract_strided_slice %23 {offsets = [0, 0], sizes = [64, 128], strides = [1, 1]} : vector<256x128xf32> to vector<64x128xf32>
    %c0_16 = arith.constant 0 : index
    %c0_17 = arith.constant 0 : index
    %25 = vector.load %arg4[%c0_16, %c0_17] : memref<64x64xf32, #tpu.memory_space<vmem>>, vector<64x64xf32>
    %26 = arith.mulf %24, %24 : vector<64x128xf32>
    %cst_18 = arith.constant dense<0.000000e+00> : vector<64x128xf32>
    %27 = tpu.matmul %25, %26, %cst_18 {dimension_numbers = #tpu.dot_dimension_numbers<[1], [0], [0], [1], [0, 0, 1, 1], [], []>} : vector<64x64xf32>, vector<64x128xf32>, vector<64x128xf32> -> vector<64x128xf32>
    %c0_19 = arith.constant 0 : index
    %c0_20 = arith.constant 0 : index
    %28 = vector.load %arg5[%c0_19, %c0_20] : memref<64x1xf32, #tpu.memory_space<vmem>>, vector<64x1xf32>
    %29 = vector.broadcast %28 : vector<64x1xf32> to vector<64x128xf32>
    %30 = arith.addf %27, %29 : vector<64x128xf32>
    %31 = math.sqrt %30 : vector<64x128xf32>
    %32 = arith.mulf %24, %31 : vector<64x128xf32>
    %c0_21 = arith.constant 0 : index
    %c0_22 = arith.constant 0 : index
    %c0_23 = arith.constant 0 : index
    %33 = vector.load %arg6[%c0_21, %c0_22, %c0_23] : memref<1x256x128xf32, #tpu.memory_space<vmem>>, vector<1x64x128xf32>
    %34 = vector.shape_cast %33 : vector<1x64x128xf32> to vector<64x128xf32>
    %35 = vector.shape_cast %32 : vector<64x128xf32> to vector<1x64x128xf32>
    tpu.vector_store %arg6[%c0_21, %c0_22, %c0_23], %35 {strides = array<i32>} : memref<1x256x128xf32, #tpu.memory_space<vmem>>, vector<1x64x128xf32>,
    %36 = vector.extract_strided_slice %23 {offsets = [64, 0], sizes = [64, 128], strides = [1, 1]} : vector<256x128xf32> to vector<64x128xf32>
    %c0_24 = arith.constant 0 : index
    %c0_25 = arith.constant 0 : index
    %37 = vector.load %arg4[%c0_24, %c0_25] : memref<64x64xf32, #tpu.memory_space<vmem>>, vector<64x64xf32>
    %38 = arith.mulf %36, %36 : vector<64x128xf32>
    %cst_26 = arith.constant dense<0.000000e+00> : vector<64x128xf32>
    %39 = tpu.matmul %37, %38, %cst_26 {dimension_numbers = #tpu.dot_dimension_numbers<[1], [0], [0], [1], [0, 0, 1, 1], [], []>} : vector<64x64xf32>, vector<64x128xf32>, vector<64x128xf32> -> vector<64x128xf32>
    %c0_27 = arith.constant 0 : index
    %c0_28 = arith.constant 0 : index
    %40 = vector.load %arg5[%c0_27, %c0_28] : memref<64x1xf32, #tpu.memory_space<vmem>>, vector<64x1xf32>
    %41 = vector.broadcast %40 : vector<64x1xf32> to vector<64x128xf32>
    %42 = arith.addf %39, %41 : vector<64x128xf32>
    %43 = math.sqrt %42 : vector<64x128xf32>
    %44 = arith.mulf %36, %43 : vector<64x128xf32>
    %c0_29 = arith.constant 0 : index
    %c64 = arith.constant 64 : index
    %c0_30 = arith.constant 0 : index
    %45 = vector.load %arg6[%c0_29, %c64, %c0_30] : memref<1x256x128xf32, #tpu.memory_space<vmem>>, vector<1x64x128xf32>
    %46 = vector.shape_cast %45 : vector<1x64x128xf32> to vector<64x128xf32>
    %47 = vector.shape_cast %44 : vector<64x128xf32> to vector<1x64x128xf32>
    tpu.vector_store %arg6[%c0_29, %c64, %c0_30], %47 {strides = array<i32>} : memref<1x256x128xf32, #tpu.memory_space<vmem>>, vector<1x64x128xf32>,
    %48 = vector.extract_strided_slice %23 {offsets = [128, 0], sizes = [64, 128], strides = [1, 1]} : vector<256x128xf32> to vector<64x128xf32>
    %c0_31 = arith.constant 0 : index
    %c0_32 = arith.constant 0 : index
    %49 = vector.load %arg4[%c0_31, %c0_32] : memref<64x64xf32, #tpu.memory_space<vmem>>, vector<64x64xf32>
    %50 = arith.mulf %48, %48 : vector<64x128xf32>
    %cst_33 = arith.constant dense<0.000000e+00> : vector<64x128xf32>
    %51 = tpu.matmul %49, %50, %cst_33 {dimension_numbers = #tpu.dot_dimension_numbers<[1], [0], [0], [1], [0, 0, 1, 1], [], []>} : vector<64x64xf32>, vector<64x128xf32>, vector<64x128xf32> -> vector<64x128xf32>
    %c0_34 = arith.constant 0 : index
    %c0_35 = arith.constant 0 : index
    %52 = vector.load %arg5[%c0_34, %c0_35] : memref<64x1xf32, #tpu.memory_space<vmem>>, vector<64x1xf32>
    %53 = vector.broadcast %52 : vector<64x1xf32> to vector<64x128xf32>
    %54 = arith.addf %51, %53 : vector<64x128xf32>
    %55 = math.sqrt %54 : vector<64x128xf32>
    %56 = arith.mulf %48, %55 : vector<64x128xf32>
    %c0_36 = arith.constant 0 : index
    %c128 = arith.constant 128 : index
    %c0_37 = arith.constant 0 : index
    %57 = vector.load %arg6[%c0_36, %c128, %c0_37] : memref<1x256x128xf32, #tpu.memory_space<vmem>>, vector<1x64x128xf32>
    %58 = vector.shape_cast %57 : vector<1x64x128xf32> to vector<64x128xf32>
    %59 = vector.shape_cast %56 : vector<64x128xf32> to vector<1x64x128xf32>
    tpu.vector_store %arg6[%c0_36, %c128, %c0_37], %59 {strides = array<i32>} : memref<1x256x128xf32, #tpu.memory_space<vmem>>, vector<1x64x128xf32>,
    %60 = vector.extract_strided_slice %23 {offsets = [192, 0], sizes = [64, 128], strides = [1, 1]} : vector<256x128xf32> to vector<64x128xf32>
    %c0_38 = arith.constant 0 : index
    %c0_39 = arith.constant 0 : index
    %61 = vector.load %arg4[%c0_38, %c0_39] : memref<64x64xf32, #tpu.memory_space<vmem>>, vector<64x64xf32>
    %62 = arith.mulf %60, %60 : vector<64x128xf32>
    %cst_40 = arith.constant dense<0.000000e+00> : vector<64x128xf32>
    %63 = tpu.matmul %61, %62, %cst_40 {dimension_numbers = #tpu.dot_dimension_numbers<[1], [0], [0], [1], [0, 0, 1, 1], [], []>} : vector<64x64xf32>, vector<64x128xf32>, vector<64x128xf32> -> vector<64x128xf32>
    %c0_41 = arith.constant 0 : index
    %c0_42 = arith.constant 0 : index
    %64 = vector.load %arg5[%c0_41, %c0_42] : memref<64x1xf32, #tpu.memory_space<vmem>>, vector<64x1xf32>
    %65 = vector.broadcast %64 : vector<64x1xf32> to vector<64x128xf32>
    %66 = arith.addf %63, %65 : vector<64x128xf32>
    %67 = math.sqrt %66 : vector<64x128xf32>
    %68 = arith.mulf %60, %67 : vector<64x128xf32>
    %c0_43 = arith.constant 0 : index
    %c192 = arith.constant 192 : index
    %c0_44 = arith.constant 0 : index
    %69 = vector.load %arg6[%c0_43, %c192, %c0_44] : memref<1x256x128xf32, #tpu.memory_space<vmem>>, vector<1x64x128xf32>
    %70 = vector.shape_cast %69 : vector<1x64x128xf32> to vector<64x128xf32>
    %71 = vector.shape_cast %68 : vector<64x128xf32> to vector<1x64x128xf32>
    tpu.vector_store %arg6[%c0_43, %c192, %c0_44], %71 {strides = array<i32>} : memref<1x256x128xf32, #tpu.memory_space<vmem>>, vector<1x64x128xf32>,
    return
  }
  func.func @transform_0(%arg0: i32) -> (i32, i32, i32) {
    %c0_i32 = arith.constant 0 : i32
    %c0_i32_0 = arith.constant 0 : i32
    %c0_i32_1 = arith.constant 0 : i32
    return %arg0, %c0_i32, %c0_i32_0 : i32, i32, i32
  }
  func.func @transform_1(%arg0: i32) -> (i32, i32, i32) {
    %c0_i32 = arith.constant 0 : i32
    %c0_i32_0 = arith.constant 0 : i32
    %c0_i32_1 = arith.constant 0 : i32
    %c0_i32_2 = arith.constant 0 : i32
    return %c0_i32, %c0_i32_0, %c0_i32_1 : i32, i32, i32
  }
  func.func @transform_2(%arg0: i32) -> (i32, i32) {
    %c0_i32 = arith.constant 0 : i32
    %c0_i32_0 = arith.constant 0 : i32
    %c0_i32_1 = arith.constant 0 : i32
    return %c0_i32, %c0_i32_0 : i32, i32
  }
  func.func @transform_3(%arg0: i32) -> (i32, i32) {
    %c0_i32 = arith.constant 0 : i32
    %c0_i32_0 = arith.constant 0 : i32
    %c0_i32_1 = arith.constant 0 : i32
    return %c0_i32, %c0_i32_0 : i32, i32
  }
  func.func @transform_4(%arg0: i32) -> (i32, i32) {
    %c0_i32 = arith.constant 0 : i32
    %c0_i32_0 = arith.constant 0 : i32
    %c0_i32_1 = arith.constant 0 : i32
    return %c0_i32, %c0_i32_0 : i32, i32
  }
  func.func @transform_5(%arg0: i32) -> (i32, i32, i32) {
    %c0_i32 = arith.constant 0 : i32
    %c0_i32_0 = arith.constant 0 : i32
    %c0_i32_1 = arith.constant 0 : i32
    return %arg0, %c0_i32, %c0_i32_0 : i32, i32, i32
  }
}

module attributes {stable_mosaic.version = 11 : i64} {
  func.func @_tapconv_kernel(%arg0: i32, %arg1: memref<1x64x256xf32, #tpu.memory_space<vmem>>, %arg2: memref<4x8x64xf32, #tpu.memory_space<vmem>>, %arg3: memref<8x1xf32, #tpu.memory_space<vmem>>, %arg4: memref<1x8x128xf32, #tpu.memory_space<vmem>>) attributes {dimension_semantics = [#tpu.dimension_semantics<parallel>], iteration_bounds = array<i64: 2>, scalar_prefetch = 0 : i64, scratch_operands = 0 : i64, tpu.core_type = #tpu.core_type<tc>, window_params = [{transform_indices = @transform_0, window_bounds = array<i64: 1, 64, 256>}, {pipeline_mode = #tpu.pipeline_mode<synchronous>, transform_indices = @transform_1, window_bounds = array<i64: 4, 8, 64>}, {pipeline_mode = #tpu.pipeline_mode<synchronous>, transform_indices = @transform_2, window_bounds = array<i64: 8, 1>}, {transform_indices = @transform_3, window_bounds = array<i64: 1, 8, 128>}]} {
    %c0 = arith.constant 0 : index
    %c0_0 = arith.constant 0 : index
    %c0_1 = arith.constant 0 : index
    %0 = vector.load %arg1[%c0, %c0_0, %c0_1] : memref<1x64x256xf32, #tpu.memory_space<vmem>>, vector<1x64x256xf32>
    %1 = vector.shape_cast %0 : vector<1x64x256xf32> to vector<64x256xf32>
    %c0_2 = arith.constant 0 : index
    %c0_3 = arith.constant 0 : index
    %c0_4 = arith.constant 0 : index
    %2 = vector.load %arg2[%c0_2, %c0_3, %c0_4] : memref<4x8x64xf32, #tpu.memory_space<vmem>>, vector<1x8x64xf32>
    %3 = vector.shape_cast %2 : vector<1x8x64xf32> to vector<8x64xf32>
    %4 = vector.extract_strided_slice %1 {offsets = [0, 0], sizes = [64, 128], strides = [1, 1]} : vector<64x256xf32> to vector<64x128xf32>
    %cst = arith.constant dense<0.000000e+00> : vector<8x128xf32>
    %5 = tpu.matmul %3, %4, %cst {dimension_numbers = #tpu.dot_dimension_numbers<[1], [0], [0], [1], [0, 0, 1, 1], [], []>} : vector<8x64xf32>, vector<64x128xf32>, vector<8x128xf32> -> vector<8x128xf32>
    %c1 = arith.constant 1 : index
    %c0_5 = arith.constant 0 : index
    %c0_6 = arith.constant 0 : index
    %6 = vector.load %arg2[%c1, %c0_5, %c0_6] : memref<4x8x64xf32, #tpu.memory_space<vmem>>, vector<1x8x64xf32>
    %7 = vector.shape_cast %6 : vector<1x8x64xf32> to vector<8x64xf32>
    %8 = vector.extract_strided_slice %1 {offsets = [0, 1], sizes = [64, 128], strides = [1, 1]} : vector<64x256xf32> to vector<64x128xf32>
    %cst_7 = arith.constant dense<0.000000e+00> : vector<8x128xf32>
    %9 = tpu.matmul %7, %8, %cst_7 {dimension_numbers = #tpu.dot_dimension_numbers<[1], [0], [0], [1], [0, 0, 1, 1], [], []>} : vector<8x64xf32>, vector<64x128xf32>, vector<8x128xf32> -> vector<8x128xf32>
    %10 = arith.addf %5, %9 : vector<8x128xf32>
    %c2 = arith.constant 2 : index
    %c0_8 = arith.constant 0 : index
    %c0_9 = arith.constant 0 : index
    %11 = vector.load %arg2[%c2, %c0_8, %c0_9] : memref<4x8x64xf32, #tpu.memory_space<vmem>>, vector<1x8x64xf32>
    %12 = vector.shape_cast %11 : vector<1x8x64xf32> to vector<8x64xf32>
    %13 = vector.extract_strided_slice %1 {offsets = [0, 9], sizes = [64, 128], strides = [1, 1]} : vector<64x256xf32> to vector<64x128xf32>
    %cst_10 = arith.constant dense<0.000000e+00> : vector<8x128xf32>
    %14 = tpu.matmul %12, %13, %cst_10 {dimension_numbers = #tpu.dot_dimension_numbers<[1], [0], [0], [1], [0, 0, 1, 1], [], []>} : vector<8x64xf32>, vector<64x128xf32>, vector<8x128xf32> -> vector<8x128xf32>
    %15 = arith.addf %10, %14 : vector<8x128xf32>
    %c3 = arith.constant 3 : index
    %c0_11 = arith.constant 0 : index
    %c0_12 = arith.constant 0 : index
    %16 = vector.load %arg2[%c3, %c0_11, %c0_12] : memref<4x8x64xf32, #tpu.memory_space<vmem>>, vector<1x8x64xf32>
    %17 = vector.shape_cast %16 : vector<1x8x64xf32> to vector<8x64xf32>
    %18 = vector.extract_strided_slice %1 {offsets = [0, 10], sizes = [64, 128], strides = [1, 1]} : vector<64x256xf32> to vector<64x128xf32>
    %cst_13 = arith.constant dense<0.000000e+00> : vector<8x128xf32>
    %19 = tpu.matmul %17, %18, %cst_13 {dimension_numbers = #tpu.dot_dimension_numbers<[1], [0], [0], [1], [0, 0, 1, 1], [], []>} : vector<8x64xf32>, vector<64x128xf32>, vector<8x128xf32> -> vector<8x128xf32>
    %20 = arith.addf %15, %19 : vector<8x128xf32>
    %c0_14 = arith.constant 0 : index
    %c0_15 = arith.constant 0 : index
    %21 = vector.load %arg3[%c0_14, %c0_15] : memref<8x1xf32, #tpu.memory_space<vmem>>, vector<8x1xf32>
    %22 = vector.broadcast %21 : vector<8x1xf32> to vector<8x128xf32>
    %23 = arith.addf %20, %22 : vector<8x128xf32>
    %c0_16 = arith.constant 0 : index
    %c0_17 = arith.constant 0 : index
    %c0_18 = arith.constant 0 : index
    %24 = vector.load %arg4[%c0_16, %c0_17, %c0_18] : memref<1x8x128xf32, #tpu.memory_space<vmem>>, vector<1x8x128xf32>
    %25 = vector.shape_cast %24 : vector<1x8x128xf32> to vector<8x128xf32>
    %26 = vector.shape_cast %23 : vector<8x128xf32> to vector<1x8x128xf32>
    tpu.vector_store %arg4[%c0_16, %c0_17, %c0_18], %26 {strides = array<i32>} : memref<1x8x128xf32, #tpu.memory_space<vmem>>, vector<1x8x128xf32>,
    return
  }
  func.func @transform_0(%arg0: i32) -> (i32, i32, i32) {
    %c0_i32 = arith.constant 0 : i32
    %c0_i32_0 = arith.constant 0 : i32
    %c0_i32_1 = arith.constant 0 : i32
    return %arg0, %c0_i32, %c0_i32_0 : i32, i32, i32
  }
  func.func @transform_1(%arg0: i32) -> (i32, i32, i32) {
    %c0_i32 = arith.constant 0 : i32
    %c0_i32_0 = arith.constant 0 : i32
    %c0_i32_1 = arith.constant 0 : i32
    %c0_i32_2 = arith.constant 0 : i32
    return %c0_i32, %c0_i32_0, %c0_i32_1 : i32, i32, i32
  }
  func.func @transform_2(%arg0: i32) -> (i32, i32) {
    %c0_i32 = arith.constant 0 : i32
    %c0_i32_0 = arith.constant 0 : i32
    %c0_i32_1 = arith.constant 0 : i32
    return %c0_i32, %c0_i32_0 : i32, i32
  }
  func.func @transform_3(%arg0: i32) -> (i32, i32, i32) {
    %c0_i32 = arith.constant 0 : i32
    %c0_i32_0 = arith.constant 0 : i32
    %c0_i32_1 = arith.constant 0 : i32
    return %arg0, %c0_i32, %c0_i32_0 : i32, i32, i32
  }
}

</mosaic_0001>

<bundles_post_ra>
// kernel: mv_refinement_forward.4
= control target key start
LH: loop header
LB: loop body
LE: loop exit
PB: predicated region body
PF: predicated region fallthrough
CT: control target
= control target key end

     0   :  { %s1472_s18 = smov 0   ;;  %s1741_s0 = inlined_call_operand.vmem [shape: f32[2,8,256], index: 0, kind: input, shape index: {}]   ;;  %s1742_s1 = inlined_call_operand.vmem [shape: f32[4,64,8], index: 1, kind: input, shape index: {}]   ;;  %s1743_s2 = inlined_call_operand.vmem [shape: f32[64,1], index: 2, kind: input, shape index: {}]   ;;  %s1744_s3 = inlined_call_operand.vmem [shape: f32[64,64], index: 3, kind: input, shape index: {}]   ;;  %s1745_s4 = inlined_call_operand.vmem [shape: f32[64,1], index: 4, kind: input, shape index: {}]   ;;  %s1746_s5 = inlined_call_operand.vmem [shape: f32[2,64,128], index: 5, kind: output, shape index: {}]  }
   0x1 LB: > { %s1147_s19 = sadd.s32 4294967295, %s1436_s18   ;;  %p1151_p0 = scmp.ge.s32.totalorder %s1436_s18, 1  ;;  %s1436_s18 = sphi %s1472_s18, %s15_s18  }
   0x2   : > { %p187_p1 = scmp.lt.s32.totalorder %s1436_s18, 3 }
   0x4   : > { %p188_p2 = pnand %p1151_p0, %p187_p1 }
   0x5   : > { %p215_p3 = scmp.lt.s32.totalorder (!%p188_p2), %s1147_s19, 1  ;;  %v227_v0 = vld [vmem:[%s1742_s1] sm:$0xff] (!%p188_p2)  ;;  %vm253_vm0 = vcmask (!%p188_p2), 64512   ;;  %s1438_s26 = smov (!%p188_p2), 119   ;;  %v228_v2 = vld [vmem:[%s1742_s1 + $0x8] sm:$0xff] (!%p188_p2)  ;;  %v229_v4 = vld [vmem:[%s1742_s1 + $0x10] sm:$0xff] (!%p188_p2) }
   0x6   : > { %191 = sbr.rel (%p188_p2) target bundleno = 633 (0x279), region = 40  ;;  %1292 = vmatprep.mubr.msk.f32.mxu0 (!%p188_p2), %vm253_vm0, %v227_v0  ;;  %s1439_s27 = smov (!%p188_p2), 127   ;;  %v230_v5 = vld [vmem:[%s1742_s1 + $0x18] sm:$0xff] (!%p188_p2)  ;;  %v231_v6 = vld [vmem:[%s1742_s1 + $0x20] sm:$0xff] (!%p188_p2)  ;;  %v232_v8 = vld [vmem:[%s1742_s1 + $0x28] sm:$0xff] (!%p188_p2)  ;;  %v1441_v14 = vmov (!%p188_p2), 0  }
   0x7   : > { %v1156_v7 = vld [vmem:[%s1742_s1 + $0x40] sm:$0xff] (!%p188_p2)  ;;  %s1440_s13 = smov (!%p188_p2), 118   ;;  %v233_v9 = vld [vmem:[%s1742_s1 + $0x30] sm:$0xff] (!%p188_p2)  ;;  %v234_v10 = vld [vmem:[%s1742_s1 + $0x38] sm:$0xff] (!%p188_p2)  ;;  %1413 = vset.pattern.permute.xlu1 (!%p188_p2), %v1441_v14  ;;  %1412 = vset.pattern.permute.xlu0 (!%p188_p2), %v1441_v14  ;;  %vm525_vm1 = vcmask (!%p188_p2), 973824   ;;  %vm250_vm2 = vcmask (!%p188_p2), 1039360  }
   0x8   : > { %1278 = vmatprep.mubr.msk.f32.mxu1 (!%p188_p2), %vm253_vm0, %v1156_v7  ;;  %v1180_v11 = vld [vmem:[%s1742_s1 + $0x80] sm:$0xff] (!%p188_p2)  ;;  %v819_v12 = vld [vmem:[%s1743_s2 + $0x8] sm:$0xff] (!%p188_p2)  ;;  %v820_v15 = vld [vmem:[%s1743_s2 + $0x10] sm:$0xff] (!%p188_p2)  ;;  %vm678_vm3 = vcmask (!%p188_p2), 965632   ;;  %vm938_vm4 = vcmask (!%p188_p2), 523264  }
   0x9   : > { %v818_v13 = vld [vmem:[%s1743_s2] sm:$0xff] (!%p188_p2)  ;;  %v821_v16 = vld [vmem:[%s1743_s2 + $0x18] sm:$0xff] (!%p188_p2)  ;;  %v823_v18 = vld [vmem:[%s1743_s2 + $0x28] sm:$0xff] (!%p188_p2) }
   0xa   : > { %v822_v17 = vld [vmem:[%s1743_s2 + $0x20] sm:$0xff] (!%p188_p2)  ;;  %v824_v19 = vld [vmem:[%s1743_s2 + $0x30] sm:$0xff] (!%p188_p2)  ;;  %v825_v20 = vld [vmem:[%s1743_s2 + $0x38] sm:$0xff] (!%p188_p2) }
   0xb   : > { %v890_v21 = vld [vmem:[%s1745_s4] sm:$0xff] (!%p188_p2)  ;;  %v891_v22 = vld [vmem:[%s1745_s4 + $0x8] sm:$0xff] (!%p188_p2)  ;;  %v892_v23 = vld [vmem:[%s1745_s4 + $0x10] sm:$0xff] (!%p188_p2) }
   0xc   : > { %v893_v24 = vld [vmem:[%s1745_s4 + $0x18] sm:$0xff] (!%p188_p2)  ;;  %v894_v25 = vld [vmem:[%s1745_s4 + $0x20] sm:$0xff] (!%p188_p2)  ;;  %v895_v26 = vld [vmem:[%s1745_s4 + $0x28] sm:$0xff] (!%p188_p2) }
   0xd   : > { %s1748_s19 = smov (!%p215_p3, %s1147_s19), 1  ;;  %v896_v27 = vld [vmem:[%s1745_s4 + $0x30] sm:$0xff]  ;;  %v897_v28 = vld [vmem:[%s1745_s4 + $0x38] sm:$0xff]  ;;  %v1181_v34 = vld [vmem:[%s1742_s1 + $0x88] sm:$0xff] }
   0xe   : > { %s1222_s22 = sshll.u32 %s1748_s19, 4  ;;  %v1157_v36 = vld [vmem:[%s1742_s1 + $0x48] sm:$0xff]  ;;  %v1182_v37 = vld [vmem:[%s1742_s1 + $0x90] sm:$0xff]  ;;  %v1183_v41 = vld [vmem:[%s1742_s1 + $0x98] sm:$0xff]  ;;  %s1223_s24 = sshll.u32 %s1748_s19, 6 }
   0xf   : > { %s219_s25 = scalar_lea.vmem %s1741_s0, %s1222_s22  ;;  %v1158_v38 = vld [vmem:[%s1742_s1 + $0x50] sm:$0xff]  ;;  %v1159_v43 = vld [vmem:[%s1742_s1 + $0x58] sm:$0xff]  ;;  %v1184_v44 = vld [vmem:[%s1742_s1 + $0xa0] sm:$0xff] }
  0x10   : > { %v225_v1 = vld [vmem:[%s219_s25] sm:$0xff]  ;;  %v226_v3 = vld [vmem:[%s219_s25 + $0x8] sm:$0xff]  ;;  %v1186_v48 = vld [vmem:[%s1742_s1 + $0xb0] sm:$0xff] }
  0x11   : > { %521 = vrot.lane.b32.xlu0 %v225_v1, %s1438_s26  ;;  %246 = vrot.lane.b32.xlu1 %v225_v1, %s1439_s27  ;;  %v1160_v45 = vld [vmem:[%s1742_s1 + $0x60] sm:$0xff]  ;;  %v1185_v46 = vld [vmem:[%s1742_s1 + $0xa8] sm:$0xff] }
  0x12   : > { %1290 = vmatprep.subr.mxu0 %v225_v1  ;;  %v1161_v47 = vld [vmem:[%s1742_s1 + $0x68] sm:$0xff]  ;;  %v1162_v49 = vld [vmem:[%s1742_s1 + $0x70] sm:$0xff]  ;;  %v1187_v50 = vld [vmem:[%s1742_s1 + $0xb8] sm:$0xff] }
  0x13   : > { %1291 = vmatpush3.msra.mxu0 %v225_v1  ;;  %v1163_v51 = vld [vmem:[%s1742_s1 + $0x78] sm:$0xff]  ;;  %v1196_v52 = vld [vmem:[%s1742_s1 + $0xc0] sm:$0xff]  ;;  %v1197_v53 = vld [vmem:[%s1742_s1 + $0xc8] sm:$0xff] }
  0x14   : > { %1293 = vmatmul.mubr.msk.f32.vlgmr.msra.gmra.mrb[0].mxu0 %vm253_vm0, %v228_v2  ;;  %v1198_v54 = vld [vmem:[%s1742_s1 + $0xd0] sm:$0xff]  ;;  %v1199_v55 = vld [vmem:[%s1742_s1 + $0xd8] sm:$0xff]  ;;  %v1200_v56 = vld [vmem:[%s1742_s1 + $0xe0] sm:$0xff] }
  0x15   : > { %523 = vrot.lane.b32.xlu0 %v226_v3, %s1438_s26  ;;  %248 = vrot.lane.b32.xlu1 %v226_v3, %s1439_s27  ;;  %v1201_v57 = vld [vmem:[%s1742_s1 + $0xe8] sm:$0xff]  ;;  %v1202_v58 = vld [vmem:[%s1742_s1 + $0xf0] sm:$0xff]  ;;  %s224_s27 = scalar_lea.vmem %s1746_s5, %s1223_s24 }
  0x16   : > { %1295 = vmatprep.mubr.msk.f32.mxu0 %vm253_vm0, %v229_v4  ;;  %v1203_v59 = vld [vmem:[%s1742_s1 + $0xf8] sm:$0xff]  ;;  %v874_v60 = vld [vmem:[%s1744_s3] sm:$0xff] }
  0x18   : > { %1296 = vmatmul.mubr.msk.f32.gmra.mrb[2].mxu0 %vm253_vm0, %v230_v5 }
  0x19   : > { %676 = vrot.lane.b32.xlu1 %v226_v3, %s1440_s13  ;;  %674 = vrot.lane.b32.xlu0 %v225_v1, %s1440_s13 }
  0x1a   : > { %1298 = vmatprep.mubr.msk.f32.mxu0 %vm253_vm0, %v231_v6 }
  0x1c   : > { %1299 = vmatmul.mubr.msk.f32.gmra.mrb[4].mxu0 %vm253_vm0, %v232_v8 }
  0x1d   : > { %1301 = vmatprep.mubr.msk.f32.mxu0 %vm253_vm0, %v233_v9  ;;  %833 = vperm.xlu1 %1413, %v819_v12  }
  0x1e   : > { %828 = vperm.xlu0 %1412, %v818_v13  }
  0x20   : > { %1302 = vmatmul.mubr.msk.f32.gmra.mrb[6].mxu0 %vm253_vm0, %v234_v10 }
  0x21   : > { %1306 = vmatprep.mubr.msk.f32.mxu0 %vm253_vm0, %v1180_v11  ;;  %838 = vperm.xlu1 %1413, %v820_v15  }
  0x22   : > { %843 = vperm.xlu0 %1412, %v821_v16  }
  0x25   : > { %848 = vperm.xlu1 %1413, %v822_v17  }
  0x26   : > { %853 = vperm.xlu0 %1412, %v823_v18  }
  0x29   : > { %858 = vperm.xlu1 %1413, %v824_v19  }
  0x2a   : > { %863 = vperm.xlu0 %1412, %v825_v20  }
  0x2d   : > { %900 = vperm.xlu1 %1413, %v890_v21  }
  0x2e   : > { %905 = vperm.xlu0 %1412, %v891_v22  }
  0x31   : > { %910 = vperm.xlu1 %1413, %v892_v23  }
  0x32   : > { %915 = vperm.xlu0 %1412, %v893_v24  }
  0x35   : > { %920 = vperm.xlu1 %1413, %v894_v25  }
  0x36   : > { %925 = vperm.xlu0 %1412, %v895_v26  }
  0x39   : > { %930 = vperm.xlu1 %1413, %v896_v27  }
  0x3a   : > { %935 = vperm.xlu0 %1412, %v897_v28  }
  0x83   : > { %v522_v29 = vpop.permute.xlu0 %521  ;;  %v247_v30 = vpop.permute.xlu1 %246 }
  0x87   : > { %v524_v31 = vpop.permute.xlu0 %523  ;;  %v249_v32 = vpop.permute.xlu1 %248 }
  0x88   : > { %v526_v33 = vsel %vm525_vm1, %v522_v29, %v524_v31  ;;  %v251_v35 = vsel %vm250_vm2, %v247_v30, %v249_v32 }
  0x89   : > { %1304 = vmatprep.subr.mxu0 %v526_v33  ;;  %1276 = vmatprep.subr.mxu1 %v251_v35 }
  0x8a   : > { %1305 = vmatpush3.msra.mxu0 %v526_v33  ;;  %1277 = vmatpush3.msra.mxu1 %v251_v35 }
  0x8b   : > { %1307 = vmatmul.mubr.msk.f32.vlgmr.msra.gmra.mrb[0].mxu0 %vm253_vm0, %v1181_v34  ;;  %v677_v39 = vpop.permute.xlu1 %676  ;;  %v675_v40 = vpop.permute.xlu0 %674  ;;  %1279 = vmatmul.mubr.msk.f32.vlgmr.msra.gmra.mrb[0].mxu1 %vm253_vm0, %v1157_v36 }
  0x8c   : > { %1309 = vmatprep.mubr.msk.f32.mxu0 %vm253_vm0, %v1182_v37  ;;  %v679_v42 = vsel %vm678_vm3, %v675_v40, %v677_v39  ;;  %1281 = vmatprep.mubr.msk.f32.mxu1 %vm253_vm0, %v1158_v38 }
  0x8d   : > { %1318 = vmatprep.subr.mxu0 %v679_v42 }
  0x8e   : > { %1319 = vmatpush3.msra.mxu0 %v679_v42 }
  0x8f   : > { %1310 = vmatmul.mubr.msk.f32.gmra.mrb[2].mxu0 %vm253_vm0, %v1183_v41  ;;  %1282 = vmatmul.mubr.msk.f32.gmra.mrb[2].mxu1 %vm253_vm0, %v1159_v43 }
  0x90   : > { %1312 = vmatprep.mubr.msk.f32.mxu0 %vm253_vm0, %v1184_v44  ;;  %1284 = vmatprep.mubr.msk.f32.mxu1 %vm253_vm0, %v1160_v45 }
  0x93   : > { %1313 = vmatmul.mubr.msk.f32.gmra.mrb[4].mxu0 %vm253_vm0, %v1185_v46  ;;  %1285 = vmatmul.mubr.msk.f32.gmra.mrb[4].mxu1 %vm253_vm0, %v1161_v47 }
  0x94   : > { %1315 = vmatprep.mubr.msk.f32.mxu0 %vm253_vm0, %v1186_v48  ;;  %1287 = vmatprep.mubr.msk.f32.mxu1 %vm253_vm0, %v1162_v49  ;;  %v875_v49 = vld [vmem:[%s1744_s3 + $0x8] sm:$0xff] }
  0x97   : > { %1316 = vmatmul.mubr.msk.f32.gmra.mrb[6].mxu0 %vm253_vm0, %v1187_v50  ;;  %1288 = vmatmul.mubr.msk.f32.gmra.mrb[6].mxu1 %vm253_vm0, %v1163_v51  ;;  %v876_v50 = vld [vmem:[%s1744_s3 + $0x10] sm:$0xff]  ;;  %v877_v51 = vld [vmem:[%s1744_s3 + $0x18] sm:$0xff] }
  0x98   : > { %1320 = vmatprep.mubr.msk.f32.mxu0 %vm253_vm0, %v1196_v52  ;;  %1348 = vmatprep.mubr.msk.f32.mxu1 %vm938_vm4, %v874_v60  ;;  %v878_v52 = vld [vmem:[%s1744_s3 + $0x20] sm:$0xff] }
  0x9b   : > { %1321 = vmatmul.mubr.msk.f32.vlgmr.msra.gmra.mrb[0].mxu0 %vm253_vm0, %v1197_v53  ;;  %v879_v53 = vld [vmem:[%s1744_s3 + $0x28] sm:$0xff] }
  0x9c   : > { %1323 = vmatprep.mubr.msk.f32.mxu0 %vm253_vm0, %v1198_v54  ;;  %v834_v5 = vpop.permute.xlu1 %833  ;;  %v880_v54 = vld [vmem:[%s1744_s3 + $0x30] sm:$0xff] }
  0x9d   : > { %v829_v3 = vpop.permute.xlu0 %828 }
  0x9f   : > { %1324 = vmatmul.mubr.msk.f32.gmra.mrb[2].mxu0 %vm253_vm0, %v1199_v55  ;;  %v881_v55 = vld [vmem:[%s1744_s3 + $0x38] sm:$0xff] }
  0xa0   : > { %1326 = vmatprep.mubr.msk.f32.mxu0 %vm253_vm0, %v1200_v56  ;;  %v839_v12 = vpop.permute.xlu1 %838 }
  0xa1   : > { %v844_v10 = vpop.permute.xlu0 %843 }
  0xa3   : > { %1327 = vmatmul.mubr.msk.f32.gmra.mrb[4].mxu0 %vm253_vm0, %v1201_v57 }
  0xa4   : > { %1329 = vmatprep.mubr.msk.f32.mxu0 %vm253_vm0, %v1202_v58  ;;  %v849_v26 = vpop.permute.xlu1 %848 }
  0xa5   : > { %v854_v22 = vpop.permute.xlu0 %853 }
  0xa7   : > { %1330 = vmatmul.mubr.msk.f32.gmra.mrb[6].mxu0 %vm253_vm0, %v1203_v59 }
  0xa8   : > { %v859_v42 = vpop.permute.xlu1 %858 }
  0xa9   : > { %v864_v39 = vpop.permute.xlu0 %863 }
  0xac   : > { %v901_v57 = vpop.permute.xlu1 %900 }
  0xad   : > { %v906_v56 = vpop.permute.xlu0 %905 }
  0xb0   : > { %v911_v60 = vpop.permute.xlu1 %910 }
  0xb1   : > { %v916_v58 = vpop.permute.xlu0 %915 }
 0x15e   : > { %v1280_v61 = vpop.f32.mrb[0].mxu1 }
 0x15f   : > { %v344_v62 = vpop.f32.mrb[1].mxu1 }
 0x162   : > { %v1283_v63 = vpop.f32.mrb[2].mxu1 }
 0x163   : > { %v354_v0 = vpop.f32.mrb[3].mxu1 }
 0x166   : > { %v1286_v1 = vpop.f32.mrb[4].mxu1 }
 0x167   : > { %v364_v2 = vpop.f32.mrb[5].mxu1 }
 0x16a   : > { %v1289_v4 = vpop.f32.mrb[6].mxu1 }
 0x16b   : > { %v374_v6 = vpop.f32.mrb[7].mxu1 }
 0x16e   : > { %v1322_v7 = vpop.f32.mrb[0].mxu0 }
 0x16f   : > { %v1376_v8 = vadd.f32 %v1322_v7, %v1280_v61  ;;  %v771_v9 = vpop.f32.mrb[1].mxu0 }
 0x170   : > { %v1377_v11 = vadd.f32 %v771_v9, %v344_v62 }
 0x171   : > { %v1666_v13 = vadd.f32 %v1376_v8, %v834_v5  ;;  %v921_v5 = vpop.permute.xlu1 %920 }
 0x172   : > { %v1668_v14 = vadd.f32 %v1377_v11, %v829_v3  ;;  %v1325_v15 = vpop.f32.mrb[2].mxu0  ;;  %v926_v3 = vpop.permute.xlu0 %925 }
 0x173   : > { %v883_v16 = vmul.f32 %v1666_v13, %v1666_v13  ;;  %v1378_v17 = vadd.f32 %v1325_v15, %v1283_v63  ;;  %v781_v18 = vpop.f32.mrb[3].mxu0 }
 0x174   : > { %v882_v19 = vmul.f32 %v1668_v14, %v1668_v14  ;;  %v1379_v20 = vadd.f32 %v781_v18, %v354_v0 }
 0x175   : > { %v1674_v21 = vadd.f32 %v1378_v17, %v844_v10  ;;  %v931_v15 = vpop.permute.xlu1 %930 }
 0x176   : > { %v1676_v23 = vadd.f32 %v1379_v20, %v839_v12  ;;  %v1328_v24 = vpop.f32.mrb[4].mxu0  ;;  %v1360_v25 = vpack.c.bf16 %v883_v16, %v882_v19  ;;  %v936_v10 = vpop.permute.xlu0 %935 }
 0x177   : > { %v885_v27 = vmul.f32 %v1674_v21, %v1674_v21  ;;  %v1380_v28 = vadd.f32 %v1328_v24, %v1286_v1  ;;  %v791_v29 = vpop.f32.mrb[5].mxu0 }
 0x178   : > { %v884_v30 = vmul.f32 %v1676_v23, %v1676_v23  ;;  %v1381_v31 = vadd.f32 %v791_v29, %v364_v2  ;;  %1361 = vmatprep.subr.bf16.mxu1 %v1360_v25 }
 0x179   : > { %v1682_v32 = vadd.f32 %v1380_v28, %v854_v22  ;;  %1363 = vmatpush3.bf16.msra.mxu1 %v1360_v25 }
 0x17a   : > { %v1684_v33 = vadd.f32 %v1381_v31, %v849_v26  ;;  %v1331_v34 = vpop.f32.mrb[6].mxu0  ;;  %v1364_v35 = vpack.c.bf16 %v885_v27, %v884_v30 }
 0x17b   : > { %v887_v36 = vmul.f32 %v1682_v32, %v1682_v32  ;;  %v1382_v37 = vadd.f32 %v1331_v34, %v1289_v4  ;;  %v801_v38 = vpop.f32.mrb[7].mxu0 }
 0x17c   : > { %v886_v40 = vmul.f32 %v1684_v33, %v1684_v33  ;;  %v1383_v41 = vadd.f32 %v801_v38, %v374_v6  ;;  %1365 = vmatprep.subr.bf16.mxu1 %v1364_v35 }
 0x17d   : > { %v1690_v43 = vadd.f32 %v1382_v37, %v864_v39  ;;  %1367 = vmatpush3.bf16.msra.mxu1 %v1364_v35 }
 0x17e   : > { %v1692_v44 = vadd.f32 %v1383_v41, %v859_v42  ;;  %v1368_v45 = vpack.c.bf16 %v887_v36, %v886_v40 }
 0x17f   : > { %v889_v46 = vmul.f32 %v1690_v43, %v1690_v43 }
 0x180   : > { %v888_v47 = vmul.f32 %v1692_v44, %v1692_v44  ;;  %1369 = vmatprep.subr.bf16.mxu1 %v1368_v45 }
 0x181   : > { %1371 = vmatpush3.bf16.msra.mxu1 %v1368_v45 }
 0x182   : > { %v1372_v48 = vpack.c.bf16 %v889_v46, %v888_v47 }
 0x184   : > { %1373 = vmatprep.subr.bf16.mxu1 %v1372_v48 }
 0x185   : > { %1375 = vmatpush3.bf16.msra.mxu1 %v1372_v48 }
 0x188   : > { %1349 = vmatmul.mubr.msk.f32.vlgmr.msra.gmra.mrb[8].mxu1 %vm938_vm4, %v875_v49 }
 0x189   : > { %1351 = vmatprep.mubr.msk.f32.mxu1 %vm938_vm4, %v876_v50 }
 0x18c   : > { %1352 = vmatmul.mubr.msk.f32.gmra.mrb[10].mxu1 %vm938_vm4, %v877_v51 }
 0x18d   : > { %1354 = vmatprep.mubr.msk.f32.mxu1 %vm938_vm4, %v878_v52 }
 0x190   : > { %1355 = vmatmul.mubr.msk.f32.gmra.mrb[12].mxu1 %vm938_vm4, %v879_v53 }
 0x191   : > { %1357 = vmatprep.mubr.msk.f32.mxu1 %vm938_vm4, %v880_v54 }
 0x194   : > { %1358 = vmatmul.mubr.msk.f32.gmra.mrb[14].mxu1 %vm938_vm4, %v881_v55 }
 0x25b   : > { %v1350_v59 = vpop.f32.mrb[8].mxu1 }
 0x25c   : > { %v1035_v61 = vadd.f32 %v1350_v59, %v906_v56  ;;  %v1029_v62 = vpop.f32.mrb[9].mxu1 }
 0x25d   : > { %v1030_v63 = vadd.f32 %v1029_v62, %v901_v57 }
 0x25e   : > { %1414 = vrsqrt.f32 %v1035_v61 }
 0x25f   : > { %1416 = vrsqrt.f32 %v1030_v63  ;;  %v1353_v0 = vpop.f32.mrb[10].mxu1 }
 0x260   : > { %v1045_v1 = vadd.f32 %v1353_v0, %v916_v58  ;;  %v1039_v2 = vpop.f32.mrb[11].mxu1 }
 0x261   : > { %v1040_v4 = vadd.f32 %v1039_v2, %v911_v60 }
 0x262   : > { %1418 = vrsqrt.f32 %v1045_v1 }
 0x263   : > { %1420 = vrsqrt.f32 %v1040_v4  ;;  %v1356_v6 = vpop.f32.mrb[12].mxu1 }
 0x264   : > { %v1055_v7 = vadd.f32 %v1356_v6, %v926_v3  ;;  %v1049_v8 = vpop.f32.mrb[13].mxu1 }
 0x265   : > { %v1050_v9 = vadd.f32 %v1049_v8, %v921_v5 }
 0x266   : > { %1422 = vrsqrt.f32 %v1055_v7 }
 0x267   : > { %1424 = vrsqrt.f32 %v1050_v9  ;;  %v1359_v11 = vpop.f32.mrb[14].mxu1 }
 0x268   : > { %v1415_v12 = vpop.eup %1414  ;;  %v1065_v16 = vadd.f32 %v1359_v11, %v936_v10  ;;  %v1059_v17 = vpop.f32.mrb[15].mxu1 }
 0x269   : > { %v1417_v18 = vpop.eup %1416  ;;  %v1077_v19 = vmul.f32 %v1415_v12, %v1666_v13  ;;  %v1060_v20 = vadd.f32 %v1059_v17, %v931_v15 }
 0x26a   : > { %v1076_v22 = vmul.f32 %v1417_v18, %v1668_v14  ;;  %1426 = vrsqrt.f32 %v1065_v16 }
 0x26b   : > { %1085 = vst [vmem:[%s224_s27 + $0x8] sm:$0xff] %v1077_v19  ;;  %1428 = vrsqrt.f32 %v1060_v20 }
 0x26c   : > { %v1419_v24 = vpop.eup %1418  ;;  %1084 = vst [vmem:[%s224_s27] sm:$0xff] %v1076_v22 }
 0x26d   : > { %v1421_v25 = vpop.eup %1420  ;;  %v1079_v26 = vmul.f32 %v1419_v24, %v1674_v21 }
 0x26e   : > { %v1078_v27 = vmul.f32 %v1421_v25, %v1676_v23 }
 0x26f   : > { %1087 = vst [vmem:[%s224_s27 + $0x18] sm:$0xff] %v1079_v26 }
 0x270   : > { %v1423_v28 = vpop.eup %1422  ;;  %1086 = vst [vmem:[%s224_s27 + $0x10] sm:$0xff] %v1078_v27 }
 0x271   : > { %v1425_v29 = vpop.eup %1424  ;;  %v1081_v30 = vmul.f32 %v1423_v28, %v1682_v32 }
 0x272   : > { %v1080_v13 = vmul.f32 %v1425_v29, %v1684_v33 }
 0x273   : > { %1089 = vst [vmem:[%s224_s27 + $0x28] sm:$0xff] %v1081_v30 }
 0x274   : > { %v1427_v14 = vpop.eup %1426  ;;  %1088 = vst [vmem:[%s224_s27 + $0x20] sm:$0xff] %v1080_v13 }
 0x275   : > { %v1429_v31 = vpop.eup %1428  ;;  %v1083_v34 = vmul.f32 %v1427_v14, %v1690_v43 }
 0x276   : > { %v1082_v35 = vmul.f32 %v1429_v31, %v1692_v44 }
 0x277   : > { %1091 = vst [vmem:[%s224_s27 + $0x38] sm:$0xff] %v1083_v34 }
 0x278   : > { %1090 = vst [vmem:[%s224_s27 + $0x30] sm:$0xff] %v1082_v35 }
 0x279 PF: > { %s15_s18 = sadd.s32 1, %s1436_s18  }
 0x27a   : > { %p12_p4 = scmp.ge.s32.totalorder %s15_s18, 4  }
 0x27c   :  { %14 = sbr.rel (!%p12_p4) target bundleno = 1 (0x1), region = 73 }

// kernel: tile.13
= control target key start
LH: loop header
LB: loop body
LE: loop exit
PB: predicated region body
PF: predicated region fallthrough
CT: control target
= control target key end

     0   :  { %s22_s0 = inlined_call_operand.vmem [shape: f32[64], index: 0, kind: input, shape index: {}]   ;;  %s23_s1 = inlined_call_operand.vmem [shape: f32[4,64], index: 1, kind: output, shape index: {}]  }
   0x1   :  { %v4_v0 = vld [vmem:[%s22_s0] ss:$0 sm:$0xff] }
   0x2   :  { %5 = vst [vmem:[%s23_s1] sm:$0xf] %v4_v0 }

// kernel: tile.0
= control target key start
LH: loop header
LB: loop body
LE: loop exit
PB: predicated region body
PF: predicated region fallthrough
CT: control target
= control target key end

     0   :  { %s1090_s8 = smov 125   ;;  %s1091_s9 = smov 126   ;;  %vm7_vm0 = vcmask 7168   ;;  %s2189_s0 = inlined_call_operand.vmem [shape: f32[4,64], index: 0, kind: input, shape index: {}]   ;;  %s2190_s1 = inlined_call_operand.vmem [shape: f32[256,1], index: 1, kind: output, shape index: {}]  }
   0x1   :  { %v4_v0 = vld [vmem:[%s2189_s0] sm:$0xf]  ;;  %s1089_s0 = smov 127   ;;  %s1092_s10 = smov 124  }
   0x2   :  { %5 = vst [vmem:[#allocation0] sm:$0xf] %v4_v0  ;;  %s1093_s11 = smov 123   ;;  %s1094_s12 = smov 122  }
   0x3   :  { %s1095_s13 = smov 121   ;;  %s1096_s14 = smov 120  }
   0x4   :  { %s1097_s15 = smov 119   ;;  %s1098_s16 = smov 118  }
   0x5   :  { %s1099_s17 = smov 117   ;;  %s1100_s18 = smov 116  }
   0x6   :  { %s1101_s19 = smov 115   ;;  %s1102_s20 = smov 114  }
   0x7   :  { %s1103_s21 = smov 113   ;;  %s1104_s22 = smov 112  }
   0x8   :  { %s1105_s23 = smov 111   ;;  %s1106_s24 = smov 110  }
   0x9   :  { %v15_v1 = vld [vmem:[#allocation0] sm:$0xf]   ;;  %s1107_s25 = smov 109   ;;  %s1108_s26 = smov 108  }
   0xa   :  { %v39_v2 = vld [vmem:[#allocation0] sm:$0xf]   ;;  %16 = vrot.lane.b32.xlu0 %v15_v1, %s1089_s0  ;;  %s1109_s27 = smov 107   ;;  %s1110_s28 = smov 106  }
   0xb   :  { %40 = vrot.lane.b32.xlu1 %v39_v2, %s1090_s8  ;;  %v27_v3 = vld [vmem:[#allocation0] sm:$0xf]   ;;  %s1111_s29 = smov 105   ;;  %s1112_s30 = smov 104  }
   0xc   :  { %v51_v4 = vld [vmem:[#allocation0] sm:$0xf]   ;;  %s1113_s2 = smov 103   ;;  %s1114_s3 = smov 102  }
   0xd   :  { %v63_v5 = vld [vmem:[#allocation0] sm:$0xf]   ;;  %s1115_s4 = smov 101   ;;  %s1116_s5 = smov 100  }
   0xe   :  { %28 = vrot.lane.b32.xlu0 %v27_v3, %s1091_s9  ;;  %v75_v6 = vld [vmem:[#allocation0] sm:$0xf]   ;;  %s1117_s6 = smov 99   ;;  %s1118_s7 = smov 98  }
   0xf   :  { %52 = vrot.lane.b32.xlu1 %v51_v4, %s1092_s10  ;;  %v87_v7 = vld [vmem:[#allocation0] sm:$0xf]   ;;  %s1119_s0 = smov 97   ;;  %s1120_s8 = smov 96  }
  0x10   :  { %v99_v8 = vld [vmem:[#allocation0] sm:$0xf]   ;;  %s1121_s9 = smov 95   ;;  %s1122_s10 = smov 94  }
  0x11   :  { %v111_v9 = vld [vmem:[#allocation0] sm:$0xf]  }
  0x12   :  { %64 = vrot.lane.b32.xlu0 %v63_v5, %s1093_s11  ;;  %v123_v10 = vld [vmem:[#allocation0] sm:$0xf]   ;;  %s1123_s11 = smov 93  }
  0x13   :  { %76 = vrot.lane.b32.xlu1 %v75_v6, %s1094_s12  ;;  %v135_v11 = vld [vmem:[#allocation0] sm:$0xf]   ;;  %s1124_s12 = smov 92  }
  0x14   :  { %v147_v12 = vld [vmem:[#allocation0] sm:$0xf]  }
  0x15   :  { %v159_v13 = vld [vmem:[#allocation0] sm:$0xf]  }
  0x16   :  { %88 = vrot.lane.b32.xlu0 %v87_v7, %s1095_s13  ;;  %v171_v14 = vld [vmem:[#allocation0] sm:$0xf]   ;;  %s1125_s13 = smov 91  }
  0x17   :  { %100 = vrot.lane.b32.xlu1 %v99_v8, %s1096_s14  ;;  %v183_v15 = vld [vmem:[#allocation0] sm:$0xf]   ;;  %s1126_s14 = smov 90  }
  0x18   :  { %v195_v16 = vld [vmem:[#allocation0] sm:$0xf]  }
  0x19   :  { %v207_v17 = vld [vmem:[#allocation0] sm:$0xf]  }
  0x1a   :  { %112 = vrot.lane.b32.xlu0 %v111_v9, %s1097_s15  ;;  %v219_v18 = vld [vmem:[#allocation0] sm:$0xf]   ;;  %s1127_s15 = smov 89  }
  0x1b   :  { %124 = vrot.lane.b32.xlu1 %v123_v10, %s1098_s16  ;;  %v231_v19 = vld [vmem:[#allocation0] sm:$0xf]   ;;  %s1128_s16 = smov 88  }
  0x1c   :  { %v243_v20 = vld [vmem:[#allocation0] sm:$0xf]  }
  0x1d   :  { %v255_v21 = vld [vmem:[#allocation0] sm:$0xf]  }
  0x1e   :  { %136 = vrot.lane.b32.xlu0 %v135_v11, %s1099_s17  ;;  %v267_v22 = vld [vmem:[#allocation0] sm:$0xf]   ;;  %s1129_s17 = smov 87  }
  0x1f   :  { %148 = vrot.lane.b32.xlu1 %v147_v12, %s1100_s18  ;;  %v279_v23 = vld [vmem:[#allocation0] sm:$0xf]   ;;  %s1130_s18 = smov 86  }
  0x20   :  { %v291_v24 = vld [vmem:[#allocation0] sm:$0xf]  }
  0x21   :  { %v303_v25 = vld [vmem:[#allocation0] sm:$0xf]  }
  0x22   :  { %160 = vrot.lane.b32.xlu0 %v159_v13, %s1101_s19  ;;  %v315_v26 = vld [vmem:[#allocation0] sm:$0xf]   ;;  %s1131_s19 = smov 85  }
  0x23   :  { %172 = vrot.lane.b32.xlu1 %v171_v14, %s1102_s20  ;;  %v327_v27 = vld [vmem:[#allocation0] sm:$0xf]   ;;  %s1132_s20 = smov 84  }
  0x24   :  { %v339_v28 = vld [vmem:[#allocation0] sm:$0xf]  }
  0x25   :  { %v351_v29 = vld [vmem:[#allocation0] sm:$0xf]  }
  0x26   :  { %184 = vrot.lane.b32.xlu0 %v183_v15, %s1103_s21  ;;  %v363_v30 = vld [vmem:[#allocation0] sm:$0xf]   ;;  %s1133_s21 = smov 83  }
  0x27   :  { %196 = vrot.lane.b32.xlu1 %v195_v16, %s1104_s22  ;;  %v375_v31 = vld [vmem:[#allocation0] sm:$0xf]   ;;  %s1134_s22 = smov 82  }
  0x28   :  { %v387_v32 = vld [vmem:[#allocation0] sm:$0xf]  }
  0x29   :  { %v399_v33 = vld [vmem:[#allocation0] sm:$0xf]  }
  0x2a   :  { %208 = vrot.lane.b32.xlu0 %v207_v17, %s1105_s23  ;;  %v411_v34 = vld [vmem:[#allocation0] sm:$0xf]   ;;  %s1135_s23 = smov 81  }
  0x2b   :  { %220 = vrot.lane.b32.xlu1 %v219_v18, %s1106_s24  ;;  %v423_v35 = vld [vmem:[#allocation0] sm:$0xf]   ;;  %s1136_s24 = smov 80  }
  0x2c   :  { %v435_v36 = vld [vmem:[#allocation0] sm:$0xf]  }
  0x2d   :  { %v447_v37 = vld [vmem:[#allocation0] sm:$0xf]  }
  0x2e   :  { %232 = vrot.lane.b32.xlu0 %v231_v19, %s1107_s25  ;;  %v459_v38 = vld [vmem:[#allocation0] sm:$0xf]   ;;  %s1137_s25 = smov 79  }
  0x2f   :  { %244 = vrot.lane.b32.xlu1 %v243_v20, %s1108_s26  ;;  %v471_v39 = vld [vmem:[#allocation0] sm:$0xf]   ;;  %s1138_s26 = smov 78  }
  0x30   :  { %v483_v40 = vld [vmem:[#allocation0] sm:$0xf]  }
  0x31   :  { %v495_v41 = vld [vmem:[#allocation0] sm:$0xf]  }
  0x32   :  { %256 = vrot.lane.b32.xlu0 %v255_v21, %s1109_s27  ;;  %v507_v42 = vld [vmem:[#allocation0] sm:$0xf]   ;;  %s1139_s27 = smov 77  }
  0x33   :  { %268 = vrot.lane.b32.xlu1 %v267_v22, %s1110_s28  ;;  %v519_v43 = vld [vmem:[#allocation0] sm:$0xf]   ;;  %s1140_s28 = smov 76  }
  0x34   :  { %v531_v44 = vld [vmem:[#allocation0] sm:$0xf]  }
  0x35   :  { %v543_v45 = vld [vmem:[#allocation0] sm:$0xf]  }
  0x36   :  { %280 = vrot.lane.b32.xlu0 %v279_v23, %s1111_s29  ;;  %v555_v46 = vld [vmem:[#allocation0] sm:$0xf]   ;;  %s1141_s29 = smov 75  }
  0x37   :  { %292 = vrot.lane.b32.xlu1 %v291_v24, %s1112_s30  ;;  %v567_v47 = vld [vmem:[#allocation0] sm:$0xf]   ;;  %s1142_s30 = smov 74  }
  0x38   :  { %v579_v48 = vld [vmem:[#allocation0] sm:$0xf]  }
  0x39   :  { %v591_v49 = vld [vmem:[#allocation0] sm:$0xf]  }
  0x3a   :  { %304 = vrot.lane.b32.xlu0 %v303_v25, %s1113_s2  ;;  %v603_v50 = vld [vmem:[#allocation0] sm:$0xf]   ;;  %s1143_s2 = smov 73  }
  0x3b   :  { %316 = vrot.lane.b32.xlu1 %v315_v26, %s1114_s3  ;;  %v615_v51 = vld [vmem:[#allocation0] sm:$0xf]   ;;  %s1144_s3 = smov 72  }
  0x3c   :  { %v627_v52 = vld [vmem:[#allocation0] sm:$0xf]  }
  0x3d   :  { %v639_v53 = vld [vmem:[#allocation0] sm:$0xf]  }
  0x3e   :  { %328 = vrot.lane.b32.xlu0 %v327_v27, %s1115_s4  ;;  %v651_v54 = vld [vmem:[#allocation0] sm:$0xf]  }
  0x3f   :  { %340 = vrot.lane.b32.xlu1 %v339_v28, %s1116_s5  ;;  %v663_v55 = vld [vmem:[#allocation0] sm:$0xf]  }
  0x40   :  { %v675_v56 = vld [vmem:[#allocation0] sm:$0xf]  }
  0x41   :  { %v687_v57 = vld [vmem:[#allocation0] sm:$0xf]  }
  0x42   :  { %352 = vrot.lane.b32.xlu0 %v351_v29, %s1117_s6  ;;  %v699_v58 = vld [vmem:[#allocation0] sm:$0xf]   ;;  %s1151_s6 = smov 65  }
  0x43   :  { %364 = vrot.lane.b32.xlu1 %v363_v30, %s1118_s7  ;;  %v6_v59 = vld [vmem:[#allocation0] sm:$0xf]  }
  0x44   :  { %8 = vst.msk [vmem:[%s2190_s1] sm:$0x1] %vm7_vm0, %v6_v59   ;;  %771 = vst.msk [vmem:[%s2190_s1 + $0x3f] sm:$0x2] %vm7_vm0, %v6_v59   ;;  %v711_v60 = vld [vmem:[#allocation0] sm:$0xf]  }
  0x45   :  { %772 = vst.msk [vmem:[%s2190_s1 + $0x7e] sm:$0x4] %vm7_vm0, %v6_v59   ;;  %773 = vst.msk [vmem:[%s2190_s1 + $0xbd] sm:$0x8] %vm7_vm0, %v6_v59   ;;  %v723_v61 = vld [vmem:[#allocation0] sm:$0xf]  }
  0x46   :  { %376 = vrot.lane.b32.xlu0 %v375_v31, %s1119_s0  ;;  %v735_v0 = vld [vmem:[#allocation0] sm:$0xf]  }
  0x47   :  { %388 = vrot.lane.b32.xlu1 %v387_v32, %s1120_s8  ;;  %v747_v1 = vld [vmem:[#allocation0] sm:$0xf]  }
  0x48   :  { %v759_v4 = vld [vmem:[#allocation0] sm:$0xf]  }
  0x4a   :  { %400 = vrot.lane.b32.xlu0 %v399_v33, %s1121_s9 }
  0x4b   :  { %412 = vrot.lane.b32.xlu1 %v411_v34, %s1122_s10 }
  0x4e   :  { %424 = vrot.lane.b32.xlu0 %v423_v35, %s1123_s11  ;;  %s1145_s11 = smov 71  }
  0x4f   :  { %436 = vrot.lane.b32.xlu1 %v435_v36, %s1124_s12  ;;  %s1146_s12 = smov 70  }
  0x52   :  { %448 = vrot.lane.b32.xlu0 %v447_v37, %s1125_s13 }
  0x53   :  { %460 = vrot.lane.b32.xlu1 %v459_v38, %s1126_s14 }
  0x56   :  { %472 = vrot.lane.b32.xlu0 %v471_v39, %s1127_s15 }
  0x57   :  { %484 = vrot.lane.b32.xlu1 %v483_v40, %s1128_s16 }
  0x5a   :  { %496 = vrot.lane.b32.xlu0 %v495_v41, %s1129_s17  ;;  %s1149_s17 = smov 67  }
  0x5b   :  { %508 = vrot.lane.b32.xlu1 %v507_v42, %s1130_s18  ;;  %s1150_s18 = smov 66  }
  0x5e   :  { %520 = vrot.lane.b32.xlu0 %v519_v43, %s1131_s19 }
  0x5f   :  { %532 = vrot.lane.b32.xlu1 %v531_v44, %s1132_s20 }
  0x62   :  { %544 = vrot.lane.b32.xlu0 %v543_v45, %s1133_s21 }
  0x63   :  { %556 = vrot.lane.b32.xlu1 %v555_v46, %s1134_s22 }
  0x66   :  { %568 = vrot.lane.b32.xlu0 %v567_v47, %s1135_s23 }
  0x67   :  { %580 = vrot.lane.b32.xlu1 %v579_v48, %s1136_s24 }
  0x6a   :  { %592 = vrot.lane.b32.xlu0 %v591_v49, %s1137_s25 }
  0x6b   :  { %604 = vrot.lane.b32.xlu1 %v603_v50, %s1138_s26 }
  0x6e   :  { %616 = vrot.lane.b32.xlu0 %v615_v51, %s1139_s27 }
  0x6f   :  { %628 = vrot.lane.b32.xlu1 %v627_v52, %s1140_s28 }
  0x72   :  { %640 = vrot.lane.b32.xlu0 %v639_v53, %s1141_s29  ;;  %s1147_s29 = smov 69  }
  0x73   :  { %652 = vrot.lane.b32.xlu1 %v651_v54, %s1142_s30  ;;  %s1148_s30 = smov 68  }
  0x76   :  { %664 = vrot.lane.b32.xlu0 %v663_v55, %s1143_s2 }
  0x77   :  { %676 = vrot.lane.b32.xlu1 %v675_v56, %s1144_s3 }
  0x7a   :  { %688 = vrot.lane.b32.xlu0 %v687_v57, %s1145_s11 }
  0x7b   :  { %700 = vrot.lane.b32.xlu1 %v699_v58, %s1146_s12 }
  0x7c   :  { %v17_v62 = vpop.permute.xlu0 %16  }
  0x7d   :  { %v41_v63 = vpop.permute.xlu1 %40   ;;  %774 = vst.msk [vmem:[%s2190_s1 + $0x1] sm:$0x1] %vm7_vm0, %v17_v62   ;;  %775 = vst.msk [vmem:[%s2190_s1 + $0x40] sm:$0x2] %vm7_vm0, %v17_v62  }
  0x7e   :  { %776 = vst.msk [vmem:[%s2190_s1 + $0x7f] sm:$0x4] %vm7_vm0, %v17_v62   ;;  %777 = vst.msk [vmem:[%s2190_s1 + $0xbe] sm:$0x8] %vm7_vm0, %v17_v62   ;;  %712 = vrot.lane.b32.xlu0 %v711_v60, %s1147_s29 }
  0x7f   :  { %782 = vst.msk [vmem:[%s2190_s1 + $0x3] sm:$0x1] %vm7_vm0, %v41_v63   ;;  %783 = vst.msk [vmem:[%s2190_s1 + $0x42] sm:$0x2] %vm7_vm0, %v41_v63   ;;  %724 = vrot.lane.b32.xlu1 %v723_v61, %s1148_s30 }
  0x80   :  { %784 = vst.msk [vmem:[%s2190_s1 + $0x81] sm:$0x4] %vm7_vm0, %v41_v63   ;;  %785 = vst.msk [vmem:[%s2190_s1 + $0xc0] sm:$0x8] %vm7_vm0, %v41_v63   ;;  %v29_v2 = vpop.permute.xlu0 %28  }
  0x81   :  { %v53_v3 = vpop.permute.xlu1 %52   ;;  %778 = vst.msk [vmem:[%s2190_s1 + $0x2] sm:$0x1] %vm7_vm0, %v29_v2   ;;  %779 = vst.msk [vmem:[%s2190_s1 + $0x41] sm:$0x2] %vm7_vm0, %v29_v2  }
  0x82   :  { %780 = vst.msk [vmem:[%s2190_s1 + $0x80] sm:$0x4] %vm7_vm0, %v29_v2   ;;  %781 = vst.msk [vmem:[%s2190_s1 + $0xbf] sm:$0x8] %vm7_vm0, %v29_v2   ;;  %736 = vrot.lane.b32.xlu0 %v735_v0, %s1149_s17 }
  0x83   :  { %786 = vst.msk [vmem:[%s2190_s1 + $0x4] sm:$0x1] %vm7_vm0, %v53_v3   ;;  %787 = vst.msk [vmem:[%s2190_s1 + $0x43] sm:$0x2] %vm7_vm0, %v53_v3   ;;  %748 = vrot.lane.b32.xlu1 %v747_v1, %s1150_s18 }
  0x84   :  { %788 = vst.msk [vmem:[%s2190_s1 + $0x82] sm:$0x4] %vm7_vm0, %v53_v3   ;;  %789 = vst.msk [vmem:[%s2190_s1 + $0xc1] sm:$0x8] %vm7_vm0, %v53_v3   ;;  %v65_v5 = vpop.permute.xlu0 %64  }
  0x85   :  { %v77_v6 = vpop.permute.xlu1 %76   ;;  %790 = vst.msk [vmem:[%s2190_s1 + $0x5] sm:$0x1] %vm7_vm0, %v65_v5   ;;  %791 = vst.msk [vmem:[%s2190_s1 + $0x44] sm:$0x2] %vm7_vm0, %v65_v5  }
  0x86   :  { %792 = vst.msk [vmem:[%s2190_s1 + $0x83] sm:$0x4] %vm7_vm0, %v65_v5   ;;  %793 = vst.msk [vmem:[%s2190_s1 + $0xc2] sm:$0x8] %vm7_vm0, %v65_v5   ;;  %760 = vrot.lane.b32.xlu0 %v759_v4, %s1151_s6 }
  0x87   :  { %794 = vst.msk [vmem:[%s2190_s1 + $0x6] sm:$0x1] %vm7_vm0, %v77_v6   ;;  %795 = vst.msk [vmem:[%s2190_s1 + $0x45] sm:$0x2] %vm7_vm0, %v77_v6  }
  0x88   :  { %796 = vst.msk [vmem:[%s2190_s1 + $0x84] sm:$0x4] %vm7_vm0, %v77_v6   ;;  %797 = vst.msk [vmem:[%s2190_s1 + $0xc3] sm:$0x8] %vm7_vm0, %v77_v6   ;;  %v89_v7 = vpop.permute.xlu0 %88  }
  0x89   :  { %v101_v8 = vpop.permute.xlu1 %100   ;;  %798 = vst.msk [vmem:[%s2190_s1 + $0x7] sm:$0x1] %vm7_vm0, %v89_v7   ;;  %799 = vst.msk [vmem:[%s2190_s1 + $0x46] sm:$0x2] %vm7_vm0, %v89_v7  }
  0x8a   :  { %800 = vst.msk [vmem:[%s2190_s1 + $0x85] sm:$0x4] %vm7_vm0, %v89_v7   ;;  %801 = vst.msk [vmem:[%s2190_s1 + $0xc4] sm:$0x8] %vm7_vm0, %v89_v7  }
  0x8b   :  { %802 = vst.msk [vmem:[%s2190_s1 + $0x8] sm:$0x1] %vm7_vm0, %v101_v8   ;;  %803 = vst.msk [vmem:[%s2190_s1 + $0x47] sm:$0x2] %vm7_vm0, %v101_v8  }
  0x8c   :  { %804 = vst.msk [vmem:[%s2190_s1 + $0x86] sm:$0x4] %vm7_vm0, %v101_v8   ;;  %805 = vst.msk [vmem:[%s2190_s1 + $0xc5] sm:$0x8] %vm7_vm0, %v101_v8   ;;  %v113_v9 = vpop.permute.xlu0 %112  }
  0x8d   :  { %v125_v10 = vpop.permute.xlu1 %124   ;;  %806 = vst.msk [vmem:[%s2190_s1 + $0x9] sm:$0x1] %vm7_vm0, %v113_v9   ;;  %807 = vst.msk [vmem:[%s2190_s1 + $0x48] sm:$0x2] %vm7_vm0, %v113_v9  }
  0x8e   :  { %808 = vst.msk [vmem:[%s2190_s1 + $0x87] sm:$0x4] %vm7_vm0, %v113_v9   ;;  %809 = vst.msk [vmem:[%s2190_s1 + $0xc6] sm:$0x8] %vm7_vm0, %v113_v9  }
  0x8f   :  { %810 = vst.msk [vmem:[%s2190_s1 + $0xa] sm:$0x1] %vm7_vm0, %v125_v10   ;;  %811 = vst.msk [vmem:[%s2190_s1 + $0x49] sm:$0x2] %vm7_vm0, %v125_v10  }
  0x90   :  { %812 = vst.msk [vmem:[%s2190_s1 + $0x88] sm:$0x4] %vm7_vm0, %v125_v10   ;;  %813 = vst.msk [vmem:[%s2190_s1 + $0xc7] sm:$0x8] %vm7_vm0, %v125_v10   ;;  %v137_v11 = vpop.permute.xlu0 %136  }
  0x91   :  { %v149_v12 = vpop.permute.xlu1 %148   ;;  %814 = vst.msk [vmem:[%s2190_s1 + $0xb] sm:$0x1] %vm7_vm0, %v137_v11   ;;  %815 = vst.msk [vmem:[%s2190_s1 + $0x4a] sm:$0x2] %vm7_vm0, %v137_v11  }
  0x92   :  { %816 = vst.msk [vmem:[%s2190_s1 + $0x89] sm:$0x4] %vm7_vm0, %v137_v11   ;;  %817 = vst.msk [vmem:[%s2190_s1 + $0xc8] sm:$0x8] %vm7_vm0, %v137_v11  }
  0x93   :  { %818 = vst.msk [vmem:[%s2190_s1 + $0xc] sm:$0x1] %vm7_vm0, %v149_v12   ;;  %819 = vst.msk [vmem:[%s2190_s1 + $0x4b] sm:$0x2] %vm7_vm0, %v149_v12  }
  0x94   :  { %820 = vst.msk [vmem:[%s2190_s1 + $0x8a] sm:$0x4] %vm7_vm0, %v149_v12   ;;  %821 = vst.msk [vmem:[%s2190_s1 + $0xc9] sm:$0x8] %vm7_vm0, %v149_v12   ;;  %v161_v13 = vpop.permute.xlu0 %160  }
  0x95   :  { %v173_v14 = vpop.permute.xlu1 %172   ;;  %822 = vst.msk [vmem:[%s2190_s1 + $0xd] sm:$0x1] %vm7_vm0, %v161_v13   ;;  %823 = vst.msk [vmem:[%s2190_s1 + $0x4c] sm:$0x2] %vm7_vm0, %v161_v13  }
  0x96   :  { %824 = vst.msk [vmem:[%s2190_s1 + $0x8b] sm:$0x4] %vm7_vm0, %v161_v13   ;;  %825 = vst.msk [vmem:[%s2190_s1 + $0xca] sm:$0x8] %vm7_vm0, %v161_v13  }
  0x97   :  { %826 = vst.msk [vmem:[%s2190_s1 + $0xe] sm:$0x1] %vm7_vm0, %v173_v14   ;;  %827 = vst.msk [vmem:[%s2190_s1 + $0x4d] sm:$0x2] %vm7_vm0, %v173_v14  }
  0x98   :  { %828 = vst.msk [vmem:[%s2190_s1 + $0x8c] sm:$0x4] %vm7_vm0, %v173_v14   ;;  %829 = vst.msk [vmem:[%s2190_s1 + $0xcb] sm:$0x8] %vm7_vm0, %v173_v14   ;;  %v185_v15 = vpop.permute.xlu0 %184  }
  0x99   :  { %v197_v16 = vpop.permute.xlu1 %196   ;;  %830 = vst.msk [vmem:[%s2190_s1 + $0xf] sm:$0x1] %vm7_vm0, %v185_v15   ;;  %831 = vst.msk [vmem:[%s2190_s1 + $0x4e] sm:$0x2] %vm7_vm0, %v185_v15  }
  0x9a   :  { %832 = vst.msk [vmem:[%s2190_s1 + $0x8d] sm:$0x4] %vm7_vm0, %v185_v15   ;;  %833 = vst.msk [vmem:[%s2190_s1 + $0xcc] sm:$0x8] %vm7_vm0, %v185_v15  }
  0x9b   :  { %834 = vst.msk [vmem:[%s2190_s1 + $0x10] sm:$0x1] %vm7_vm0, %v197_v16   ;;  %835 = vst.msk [vmem:[%s2190_s1 + $0x4f] sm:$0x2] %vm7_vm0, %v197_v16  }
  0x9c   :  { %836 = vst.msk [vmem:[%s2190_s1 + $0x8e] sm:$0x4] %vm7_vm0, %v197_v16   ;;  %837 = vst.msk [vmem:[%s2190_s1 + $0xcd] sm:$0x8] %vm7_vm0, %v197_v16   ;;  %v209_v17 = vpop.permute.xlu0 %208  }
  0x9d   :  { %v221_v18 = vpop.permute.xlu1 %220   ;;  %838 = vst.msk [vmem:[%s2190_s1 + $0x11] sm:$0x1] %vm7_vm0, %v209_v17   ;;  %839 = vst.msk [vmem:[%s2190_s1 + $0x50] sm:$0x2] %vm7_vm0, %v209_v17  }
  0x9e   :  { %840 = vst.msk [vmem:[%s2190_s1 + $0x8f] sm:$0x4] %vm7_vm0, %v209_v17   ;;  %841 = vst.msk [vmem:[%s2190_s1 + $0xce] sm:$0x8] %vm7_vm0, %v209_v17  }
  0x9f   :  { %842 = vst.msk [vmem:[%s2190_s1 + $0x12] sm:$0x1] %vm7_vm0, %v221_v18   ;;  %843 = vst.msk [vmem:[%s2190_s1 + $0x51] sm:$0x2] %vm7_vm0, %v221_v18  }
  0xa0   :  { %844 = vst.msk [vmem:[%s2190_s1 + $0x90] sm:$0x4] %vm7_vm0, %v221_v18   ;;  %845 = vst.msk [vmem:[%s2190_s1 + $0xcf] sm:$0x8] %vm7_vm0, %v221_v18   ;;  %v233_v19 = vpop.permute.xlu0 %232  }
  0xa1   :  { %v245_v20 = vpop.permute.xlu1 %244   ;;  %846 = vst.msk [vmem:[%s2190_s1 + $0x13] sm:$0x1] %vm7_vm0, %v233_v19   ;;  %847 = vst.msk [vmem:[%s2190_s1 + $0x52] sm:$0x2] %vm7_vm0, %v233_v19  }
  0xa2   :  { %848 = vst.msk [vmem:[%s2190_s1 + $0x91] sm:$0x4] %vm7_vm0, %v233_v19   ;;  %849 = vst.msk [vmem:[%s2190_s1 + $0xd0] sm:$0x8] %vm7_vm0, %v233_v19  }
  0xa3   :  { %850 = vst.msk [vmem:[%s2190_s1 + $0x14] sm:$0x1] %vm7_vm0, %v245_v20   ;;  %851 = vst.msk [vmem:[%s2190_s1 + $0x53] sm:$0x2] %vm7_vm0, %v245_v20  }
  0xa4   :  { %852 = vst.msk [vmem:[%s2190_s1 + $0x92] sm:$0x4] %vm7_vm0, %v245_v20   ;;  %853 = vst.msk [vmem:[%s2190_s1 + $0xd1] sm:$0x8] %vm7_vm0, %v245_v20   ;;  %v257_v21 = vpop.permute.xlu0 %256  }
  0xa5   :  { %v269_v22 = vpop.permute.xlu1 %268   ;;  %854 = vst.msk [vmem:[%s2190_s1 + $0x15] sm:$0x1] %vm7_vm0, %v257_v21   ;;  %855 = vst.msk [vmem:[%s2190_s1 + $0x54] sm:$0x2] %vm7_vm0, %v257_v21  }
  0xa6   :  { %856 = vst.msk [vmem:[%s2190_s1 + $0x93] sm:$0x4] %vm7_vm0, %v257_v21   ;;  %857 = vst.msk [vmem:[%s2190_s1 + $0xd2] sm:$0x8] %vm7_vm0, %v257_v21  }
  0xa7   :  { %858 = vst.msk [vmem:[%s2190_s1 + $0x16] sm:$0x1] %vm7_vm0, %v269_v22   ;;  %859 = vst.msk [vmem:[%s2190_s1 + $0x55] sm:$0x2] %vm7_vm0, %v269_v22  }
  0xa8   :  { %860 = vst.msk [vmem:[%s2190_s1 + $0x94] sm:$0x4] %vm7_vm0, %v269_v22   ;;  %861 = vst.msk [vmem:[%s2190_s1 + $0xd3] sm:$0x8] %vm7_vm0, %v269_v22   ;;  %v281_v23 = vpop.permute.xlu0 %280  }
  0xa9   :  { %v293_v24 = vpop.permute.xlu1 %292   ;;  %862 = vst.msk [vmem:[%s2190_s1 + $0x17] sm:$0x1] %vm7_vm0, %v281_v23   ;;  %863 = vst.msk [vmem:[%s2190_s1 + $0x56] sm:$0x2] %vm7_vm0, %v281_v23  }
  0xaa   :  { %864 = vst.msk [vmem:[%s2190_s1 + $0x95] sm:$0x4] %vm7_vm0, %v281_v23   ;;  %865 = vst.msk [vmem:[%s2190_s1 + $0xd4] sm:$0x8] %vm7_vm0, %v281_v23  }
  0xab   :  { %866 = vst.msk [vmem:[%s2190_s1 + $0x18] sm:$0x1] %vm7_vm0, %v293_v24   ;;  %867 = vst.msk [vmem:[%s2190_s1 + $0x57] sm:$0x2] %vm7_vm0, %v293_v24  }
  0xac   :  { %868 = vst.msk [vmem:[%s2190_s1 + $0x96] sm:$0x4] %vm7_vm0, %v293_v24   ;;  %869 = vst.msk [vmem:[%s2190_s1 + $0xd5] sm:$0x8] %vm7_vm0, %v293_v24   ;;  %v305_v25 = vpop.permute.xlu0 %304  }
  0xad   :  { %v317_v26 = vpop.permute.xlu1 %316   ;;  %870 = vst.msk [vmem:[%s2190_s1 + $0x19] sm:$0x1] %vm7_vm0, %v305_v25   ;;  %871 = vst.msk [vmem:[%s2190_s1 + $0x58] sm:$0x2] %vm7_vm0, %v305_v25  }
  0xae   :  { %872 = vst.msk [vmem:[%s2190_s1 + $0x97] sm:$0x4] %vm7_vm0, %v305_v25   ;;  %873 = vst.msk [vmem:[%s2190_s1 + $0xd6] sm:$0x8] %vm7_vm0, %v305_v25  }
  0xaf   :  { %874 = vst.msk [vmem:[%s2190_s1 + $0x1a] sm:$0x1] %vm7_vm0, %v317_v26   ;;  %875 = vst.msk [vmem:[%s2190_s1 + $0x59] sm:$0x2] %vm7_vm0, %v317_v26  }
  0xb0   :  { %876 = vst.msk [vmem:[%s2190_s1 + $0x98] sm:$0x4] %vm7_vm0, %v317_v26   ;;  %877 = vst.msk [vmem:[%s2190_s1 + $0xd7] sm:$0x8] %vm7_vm0, %v317_v26   ;;  %v329_v27 = vpop.permute.xlu0 %328  }
  0xb1   :  { %v341_v28 = vpop.permute.xlu1 %340   ;;  %878 = vst.msk [vmem:[%s2190_s1 + $0x1b] sm:$0x1] %vm7_vm0, %v329_v27   ;;  %879 = vst.msk [vmem:[%s2190_s1 + $0x5a] sm:$0x2] %vm7_vm0, %v329_v27  }
  0xb2   :  { %880 = vst.msk [vmem:[%s2190_s1 + $0x99] sm:$0x4] %vm7_vm0, %v329_v27   ;;  %881 = vst.msk [vmem:[%s2190_s1 + $0xd8] sm:$0x8] %vm7_vm0, %v329_v27  }
  0xb3   :  { %882 = vst.msk [vmem:[%s2190_s1 + $0x1c] sm:$0x1] %vm7_vm0, %v341_v28   ;;  %883 = vst.msk [vmem:[%s2190_s1 + $0x5b] sm:$0x2] %vm7_vm0, %v341_v28  }
  0xb4   :  { %884 = vst.msk [vmem:[%s2190_s1 + $0x9a] sm:$0x4] %vm7_vm0, %v341_v28   ;;  %885 = vst.msk [vmem:[%s2190_s1 + $0xd9] sm:$0x8] %vm7_vm0, %v341_v28   ;;  %v353_v29 = vpop.permute.xlu0 %352  }
  0xb5   :  { %v365_v30 = vpop.permute.xlu1 %364   ;;  %886 = vst.msk [vmem:[%s2190_s1 + $0x1d] sm:$0x1] %vm7_vm0, %v353_v29   ;;  %887 = vst.msk [vmem:[%s2190_s1 + $0x5c] sm:$0x2] %vm7_vm0, %v353_v29  }
  0xb6   :  { %888 = vst.msk [vmem:[%s2190_s1 + $0x9b] sm:$0x4] %vm7_vm0, %v353_v29   ;;  %889 = vst.msk [vmem:[%s2190_s1 + $0xda] sm:$0x8] %vm7_vm0, %v353_v29  }
  0xb7   :  { %890 = vst.msk [vmem:[%s2190_s1 + $0x1e] sm:$0x1] %vm7_vm0, %v365_v30   ;;  %891 = vst.msk [vmem:[%s2190_s1 + $0x5d] sm:$0x2] %vm7_vm0, %v365_v30  }
  0xb8   :  { %892 = vst.msk [vmem:[%s2190_s1 + $0x9c] sm:$0x4] %vm7_vm0, %v365_v30   ;;  %893 = vst.msk [vmem:[%s2190_s1 + $0xdb] sm:$0x8] %vm7_vm0, %v365_v30   ;;  %v377_v31 = vpop.permute.xlu0 %376  }
  0xb9   :  { %v389_v32 = vpop.permute.xlu1 %388   ;;  %894 = vst.msk [vmem:[%s2190_s1 + $0x1f] sm:$0x1] %vm7_vm0, %v377_v31   ;;  %895 = vst.msk [vmem:[%s2190_s1 + $0x5e] sm:$0x2] %vm7_vm0, %v377_v31  }
  0xba   :  { %896 = vst.msk [vmem:[%s2190_s1 + $0x9d] sm:$0x4] %vm7_vm0, %v377_v31   ;;  %897 = vst.msk [vmem:[%s2190_s1 + $0xdc] sm:$0x8] %vm7_vm0, %v377_v31  }
  0xbb   :  { %898 = vst.msk [vmem:[%s2190_s1 + $0x20] sm:$0x1] %vm7_vm0, %v389_v32   ;;  %899 = vst.msk [vmem:[%s2190_s1 + $0x5f] sm:$0x2] %vm7_vm0, %v389_v32  }
  0xbc   :  { %900 = vst.msk [vmem:[%s2190_s1 + $0x9e] sm:$0x4] %vm7_vm0, %v389_v32   ;;  %901 = vst.msk [vmem:[%s2190_s1 + $0xdd] sm:$0x8] %vm7_vm0, %v389_v32   ;;  %v401_v33 = vpop.permute.xlu0 %400  }
  0xbd   :  { %v413_v34 = vpop.permute.xlu1 %412   ;;  %902 = vst.msk [vmem:[%s2190_s1 + $0x21] sm:$0x1] %vm7_vm0, %v401_v33   ;;  %903 = vst.msk [vmem:[%s2190_s1 + $0x60] sm:$0x2] %vm7_vm0, %v401_v33  }
  0xbe   :  { %904 = vst.msk [vmem:[%s2190_s1 + $0x9f] sm:$0x4] %vm7_vm0, %v401_v33   ;;  %905 = vst.msk [vmem:[%s2190_s1 + $0xde] sm:$0x8] %vm7_vm0, %v401_v33  }
  0xbf   :  { %906 = vst.msk [vmem:[%s2190_s1 + $0x22] sm:$0x1] %vm7_vm0, %v413_v34   ;;  %907 = vst.msk [vmem:[%s2190_s1 + $0x61] sm:$0x2] %vm7_vm0, %v413_v34  }
  0xc0   :  { %908 = vst.msk [vmem:[%s2190_s1 + $0xa0] sm:$0x4] %vm7_vm0, %v413_v34   ;;  %909 = vst.msk [vmem:[%s2190_s1 + $0xdf] sm:$0x8] %vm7_vm0, %v413_v34   ;;  %v425_v35 = vpop.permute.xlu0 %424  }
  0xc1   :  { %v437_v36 = vpop.permute.xlu1 %436   ;;  %910 = vst.msk [vmem:[%s2190_s1 + $0x23] sm:$0x1] %vm7_vm0, %v425_v35   ;;  %911 = vst.msk [vmem:[%s2190_s1 + $0x62] sm:$0x2] %vm7_vm0, %v425_v35  }
  0xc2   :  { %912 = vst.msk [vmem:[%s2190_s1 + $0xa1] sm:$0x4] %vm7_vm0, %v425_v35   ;;  %913 = vst.msk [vmem:[%s2190_s1 + $0xe0] sm:$0x8] %vm7_vm0, %v425_v35  }
  0xc3   :  { %914 = vst.msk [vmem:[%s2190_s1 + $0x24] sm:$0x1] %vm7_vm0, %v437_v36   ;;  %915 = vst.msk [vmem:[%s2190_s1 + $0x63] sm:$0x2] %vm7_vm0, %v437_v36  }
  0xc4   :  { %916 = vst.msk [vmem:[%s2190_s1 + $0xa2] sm:$0x4] %vm7_vm0, %v437_v36   ;;  %917 = vst.msk [vmem:[%s2190_s1 + $0xe1] sm:$0x8] %vm7_vm0, %v437_v36   ;;  %v449_v37 = vpop.permute.xlu0 %448  }
  0xc5   :  { %v461_v38 = vpop.permute.xlu1 %460   ;;  %918 = vst.msk [vmem:[%s2190_s1 + $0x25] sm:$0x1] %vm7_vm0, %v449_v37   ;;  %919 = vst.msk [vmem:[%s2190_s1 + $0x64] sm:$0x2] %vm7_vm0, %v449_v37  }
  0xc6   :  { %920 = vst.msk [vmem:[%s2190_s1 + $0xa3] sm:$0x4] %vm7_vm0, %v449_v37   ;;  %921 = vst.msk [vmem:[%s2190_s1 + $0xe2] sm:$0x8] %vm7_vm0, %v449_v37  }
  0xc7   :  { %922 = vst.msk [vmem:[%s2190_s1 + $0x26] sm:$0x1] %vm7_vm0, %v461_v38   ;;  %923 = vst.msk [vmem:[%s2190_s1 + $0x65] sm:$0x2] %vm7_vm0, %v461_v38  }
  0xc8   :  { %924 = vst.msk [vmem:[%s2190_s1 + $0xa4] sm:$0x4] %vm7_vm0, %v461_v38   ;;  %925 = vst.msk [vmem:[%s2190_s1 + $0xe3] sm:$0x8] %vm7_vm0, %v461_v38   ;;  %v473_v39 = vpop.permute.xlu0 %472  }
  0xc9   :  { %v485_v40 = vpop.permute.xlu1 %484   ;;  %926 = vst.msk [vmem:[%s2190_s1 + $0x27] sm:$0x1] %vm7_vm0, %v473_v39   ;;  %927 = vst.msk [vmem:[%s2190_s1 + $0x66] sm:$0x2] %vm7_vm0, %v473_v39  }
  0xca   :  { %928 = vst.msk [vmem:[%s2190_s1 + $0xa5] sm:$0x4] %vm7_vm0, %v473_v39   ;;  %929 = vst.msk [vmem:[%s2190_s1 + $0xe4] sm:$0x8] %vm7_vm0, %v473_v39  }
  0xcb   :  { %930 = vst.msk [vmem:[%s2190_s1 + $0x28] sm:$0x1] %vm7_vm0, %v485_v40   ;;  %931 = vst.msk [vmem:[%s2190_s1 + $0x67] sm:$0x2] %vm7_vm0, %v485_v40  }
  0xcc   :  { %932 = vst.msk [vmem:[%s2190_s1 + $0xa6] sm:$0x4] %vm7_vm0, %v485_v40   ;;  %933 = vst.msk [vmem:[%s2190_s1 + $0xe5] sm:$0x8] %vm7_vm0, %v485_v40   ;;  %v497_v41 = vpop.permute.xlu0 %496  }
  0xcd   :  { %v509_v42 = vpop.permute.xlu1 %508   ;;  %934 = vst.msk [vmem:[%s2190_s1 + $0x29] sm:$0x1] %vm7_vm0, %v497_v41   ;;  %935 = vst.msk [vmem:[%s2190_s1 + $0x68] sm:$0x2] %vm7_vm0, %v497_v41  }
  0xce   :  { %936 = vst.msk [vmem:[%s2190_s1 + $0xa7] sm:$0x4] %vm7_vm0, %v497_v41   ;;  %937 = vst.msk [vmem:[%s2190_s1 + $0xe6] sm:$0x8] %vm7_vm0, %v497_v41  }
  0xcf   :  { %938 = vst.msk [vmem:[%s2190_s1 + $0x2a] sm:$0x1] %vm7_vm0, %v509_v42   ;;  %939 = vst.msk [vmem:[%s2190_s1 + $0x69] sm:$0x2] %vm7_vm0, %v509_v42  }
  0xd0   :  { %940 = vst.msk [vmem:[%s2190_s1 + $0xa8] sm:$0x4] %vm7_vm0, %v509_v42   ;;  %941 = vst.msk [vmem:[%s2190_s1 + $0xe7] sm:$0x8] %vm7_vm0, %v509_v42   ;;  %v521_v43 = vpop.permute.xlu0 %520  }
  0xd1   :  { %v533_v44 = vpop.permute.xlu1 %532   ;;  %942 = vst.msk [vmem:[%s2190_s1 + $0x2b] sm:$0x1] %vm7_vm0, %v521_v43   ;;  %943 = vst.msk [vmem:[%s2190_s1 + $0x6a] sm:$0x2] %vm7_vm0, %v521_v43  }
  0xd2   :  { %944 = vst.msk [vmem:[%s2190_s1 + $0xa9] sm:$0x4] %vm7_vm0, %v521_v43   ;;  %945 = vst.msk [vmem:[%s2190_s1 + $0xe8] sm:$0x8] %vm7_vm0, %v521_v43  }
  0xd3   :  { %946 = vst.msk [vmem:[%s2190_s1 + $0x2c] sm:$0x1] %vm7_vm0, %v533_v44   ;;  %947 = vst.msk [vmem:[%s2190_s1 + $0x6b] sm:$0x2] %vm7_vm0, %v533_v44  }
  0xd4   :  { %948 = vst.msk [vmem:[%s2190_s1 + $0xaa] sm:$0x4] %vm7_vm0, %v533_v44   ;;  %949 = vst.msk [vmem:[%s2190_s1 + $0xe9] sm:$0x8] %vm7_vm0, %v533_v44   ;;  %v545_v45 = vpop.permute.xlu0 %544  }
  0xd5   :  { %v557_v46 = vpop.permute.xlu1 %556   ;;  %950 = vst.msk [vmem:[%s2190_s1 + $0x2d] sm:$0x1] %vm7_vm0, %v545_v45   ;;  %951 = vst.msk [vmem:[%s2190_s1 + $0x6c] sm:$0x2] %vm7_vm0, %v545_v45  }
  0xd6   :  { %952 = vst.msk [vmem:[%s2190_s1 + $0xab] sm:$0x4] %vm7_vm0, %v545_v45   ;;  %953 = vst.msk [vmem:[%s2190_s1 + $0xea] sm:$0x8] %vm7_vm0, %v545_v45  }
  0xd7   :  { %954 = vst.msk [vmem:[%s2190_s1 + $0x2e] sm:$0x1] %vm7_vm0, %v557_v46   ;;  %955 = vst.msk [vmem:[%s2190_s1 + $0x6d] sm:$0x2] %vm7_vm0, %v557_v46  }
  0xd8   :  { %956 = vst.msk [vmem:[%s2190_s1 + $0xac] sm:$0x4] %vm7_vm0, %v557_v46   ;;  %957 = vst.msk [vmem:[%s2190_s1 + $0xeb] sm:$0x8] %vm7_vm0, %v557_v46   ;;  %v569_v47 = vpop.permute.xlu0 %568  }
  0xd9   :  { %v581_v48 = vpop.permute.xlu1 %580   ;;  %958 = vst.msk [vmem:[%s2190_s1 + $0x2f] sm:$0x1] %vm7_vm0, %v569_v47   ;;  %959 = vst.msk [vmem:[%s2190_s1 + $0x6e] sm:$0x2] %vm7_vm0, %v569_v47  }
  0xda   :  { %960 = vst.msk [vmem:[%s2190_s1 + $0xad] sm:$0x4] %vm7_vm0, %v569_v47   ;;  %961 = vst.msk [vmem:[%s2190_s1 + $0xec] sm:$0x8] %vm7_vm0, %v569_v47  }
  0xdb   :  { %962 = vst.msk [vmem:[%s2190_s1 + $0x30] sm:$0x1] %vm7_vm0, %v581_v48   ;;  %963 = vst.msk [vmem:[%s2190_s1 + $0x6f] sm:$0x2] %vm7_vm0, %v581_v48  }
  0xdc   :  { %964 = vst.msk [vmem:[%s2190_s1 + $0xae] sm:$0x4] %vm7_vm0, %v581_v48   ;;  %965 = vst.msk [vmem:[%s2190_s1 + $0xed] sm:$0x8] %vm7_vm0, %v581_v48   ;;  %v593_v49 = vpop.permute.xlu0 %592  }
  0xdd   :  { %v605_v50 = vpop.permute.xlu1 %604   ;;  %966 = vst.msk [vmem:[%s2190_s1 + $0x31] sm:$0x1] %vm7_vm0, %v593_v49   ;;  %967 = vst.msk [vmem:[%s2190_s1 + $0x70] sm:$0x2] %vm7_vm0, %v593_v49  }
  0xde   :  { %968 = vst.msk [vmem:[%s2190_s1 + $0xaf] sm:$0x4] %vm7_vm0, %v593_v49   ;;  %969 = vst.msk [vmem:[%s2190_s1 + $0xee] sm:$0x8] %vm7_vm0, %v593_v49  }
  0xdf   :  { %970 = vst.msk [vmem:[%s2190_s1 + $0x32] sm:$0x1] %vm7_vm0, %v605_v50   ;;  %971 = vst.msk [vmem:[%s2190_s1 + $0x71] sm:$0x2] %vm7_vm0, %v605_v50  }
  0xe0   :  { %972 = vst.msk [vmem:[%s2190_s1 + $0xb0] sm:$0x4] %vm7_vm0, %v605_v50   ;;  %973 = vst.msk [vmem:[%s2190_s1 + $0xef] sm:$0x8] %vm7_vm0, %v605_v50   ;;  %v617_v51 = vpop.permute.xlu0 %616  }
  0xe1   :  { %v629_v52 = vpop.permute.xlu1 %628   ;;  %974 = vst.msk [vmem:[%s2190_s1 + $0x33] sm:$0x1] %vm7_vm0, %v617_v51   ;;  %975 = vst.msk [vmem:[%s2190_s1 + $0x72] sm:$0x2] %vm7_vm0, %v617_v51  }
  0xe2   :  { %976 = vst.msk [vmem:[%s2190_s1 + $0xb1] sm:$0x4] %vm7_vm0, %v617_v51   ;;  %977 = vst.msk [vmem:[%s2190_s1 + $0xf0] sm:$0x8] %vm7_vm0, %v617_v51  }
  0xe3   :  { %978 = vst.msk [vmem:[%s2190_s1 + $0x34] sm:$0x1] %vm7_vm0, %v629_v52   ;;  %979 = vst.msk [vmem:[%s2190_s1 + $0x73] sm:$0x2] %vm7_vm0, %v629_v52  }
  0xe4   :  { %980 = vst.msk [vmem:[%s2190_s1 + $0xb2] sm:$0x4] %vm7_vm0, %v629_v52   ;;  %981 = vst.msk [vmem:[%s2190_s1 + $0xf1] sm:$0x8] %vm7_vm0, %v629_v52   ;;  %v641_v53 = vpop.permute.xlu0 %640  }
  0xe5   :  { %v653_v54 = vpop.permute.xlu1 %652   ;;  %982 = vst.msk [vmem:[%s2190_s1 + $0x35] sm:$0x1] %vm7_vm0, %v641_v53   ;;  %983 = vst.msk [vmem:[%s2190_s1 + $0x74] sm:$0x2] %vm7_vm0, %v641_v53  }
  0xe6   :  { %984 = vst.msk [vmem:[%s2190_s1 + $0xb3] sm:$0x4] %vm7_vm0, %v641_v53   ;;  %985 = vst.msk [vmem:[%s2190_s1 + $0xf2] sm:$0x8] %vm7_vm0, %v641_v53  }
  0xe7   :  { %986 = vst.msk [vmem:[%s2190_s1 + $0x36] sm:$0x1] %vm7_vm0, %v653_v54   ;;  %987 = vst.msk [vmem:[%s2190_s1 + $0x75] sm:$0x2] %vm7_vm0, %v653_v54  }
  0xe8   :  { %988 = vst.msk [vmem:[%s2190_s1 + $0xb4] sm:$0x4] %vm7_vm0, %v653_v54   ;;  %989 = vst.msk [vmem:[%s2190_s1 + $0xf3] sm:$0x8] %vm7_vm0, %v653_v54   ;;  %v665_v55 = vpop.permute.xlu0 %664  }
  0xe9   :  { %v677_v56 = vpop.permute.xlu1 %676   ;;  %990 = vst.msk [vmem:[%s2190_s1 + $0x37] sm:$0x1] %vm7_vm0, %v665_v55   ;;  %991 = vst.msk [vmem:[%s2190_s1 + $0x76] sm:$0x2] %vm7_vm0, %v665_v55  }
  0xea   :  { %992 = vst.msk [vmem:[%s2190_s1 + $0xb5] sm:$0x4] %vm7_vm0, %v665_v55   ;;  %993 = vst.msk [vmem:[%s2190_s1 + $0xf4] sm:$0x8] %vm7_vm0, %v665_v55  }
  0xeb   :  { %994 = vst.msk [vmem:[%s2190_s1 + $0x38] sm:$0x1] %vm7_vm0, %v677_v56   ;;  %995 = vst.msk [vmem:[%s2190_s1 + $0x77] sm:$0x2] %vm7_vm0, %v677_v56  }
  0xec   :  { %996 = vst.msk [vmem:[%s2190_s1 + $0xb6] sm:$0x4] %vm7_vm0, %v677_v56   ;;  %997 = vst.msk [vmem:[%s2190_s1 + $0xf5] sm:$0x8] %vm7_vm0, %v677_v56   ;;  %v689_v57 = vpop.permute.xlu0 %688  }
  0xed   :  { %v701_v58 = vpop.permute.xlu1 %700   ;;  %998 = vst.msk [vmem:[%s2190_s1 + $0x39] sm:$0x1] %vm7_vm0, %v689_v57   ;;  %999 = vst.msk [vmem:[%s2190_s1 + $0x78] sm:$0x2] %vm7_vm0, %v689_v57  }
  0xee   :  { %1000 = vst.msk [vmem:[%s2190_s1 + $0xb7] sm:$0x4] %vm7_vm0, %v689_v57   ;;  %1001 = vst.msk [vmem:[%s2190_s1 + $0xf6] sm:$0x8] %vm7_vm0, %v689_v57  }
  0xef   :  { %1002 = vst.msk [vmem:[%s2190_s1 + $0x3a] sm:$0x1] %vm7_vm0, %v701_v58   ;;  %1003 = vst.msk [vmem:[%s2190_s1 + $0x79] sm:$0x2] %vm7_vm0, %v701_v58  }
  0xf0   :  { %1004 = vst.msk [vmem:[%s2190_s1 + $0xb8] sm:$0x4] %vm7_vm0, %v701_v58   ;;  %1005 = vst.msk [vmem:[%s2190_s1 + $0xf7] sm:$0x8] %vm7_vm0, %v701_v58   ;;  %v713_v59 = vpop.permute.xlu0 %712  }
  0xf1   :  { %v725_v60 = vpop.permute.xlu1 %724   ;;  %1006 = vst.msk [vmem:[%s2190_s1 + $0x3b] sm:$0x1] %vm7_vm0, %v713_v59   ;;  %1007 = vst.msk [vmem:[%s2190_s1 + $0x7a] sm:$0x2] %vm7_vm0, %v713_v59  }
  0xf2   :  { %1008 = vst.msk [vmem:[%s2190_s1 + $0xb9] sm:$0x4] %vm7_vm0, %v713_v59   ;;  %1009 = vst.msk [vmem:[%s2190_s1 + $0xf8] sm:$0x8] %vm7_vm0, %v713_v59  }
  0xf3   :  { %1010 = vst.msk [vmem:[%s2190_s1 + $0x3c] sm:$0x1] %vm7_vm0, %v725_v60   ;;  %1011 = vst.msk [vmem:[%s2190_s1 + $0x7b] sm:$0x2] %vm7_vm0, %v725_v60  }
  0xf4   :  { %1012 = vst.msk [vmem:[%s2190_s1 + $0xba] sm:$0x4] %vm7_vm0, %v725_v60   ;;  %1013 = vst.msk [vmem:[%s2190_s1 + $0xf9] sm:$0x8] %vm7_vm0, %v725_v60   ;;  %v737_v61 = vpop.permute.xlu0 %736  }
  0xf5   :  { %v749_v62 = vpop.permute.xlu1 %748   ;;  %1014 = vst.msk [vmem:[%s2190_s1 + $0x3d] sm:$0x1] %vm7_vm0, %v737_v61   ;;  %1015 = vst.msk [vmem:[%s2190_s1 + $0x7c] sm:$0x2] %vm7_vm0, %v737_v61  }
  0xf6   :  { %1016 = vst.msk [vmem:[%s2190_s1 + $0xbb] sm:$0x4] %vm7_vm0, %v737_v61   ;;  %1017 = vst.msk [vmem:[%s2190_s1 + $0xfa] sm:$0x8] %vm7_vm0, %v737_v61  }
  0xf7   :  { %1018 = vst.msk [vmem:[%s2190_s1 + $0x3e] sm:$0x1] %vm7_vm0, %v749_v62   ;;  %1019 = vst.msk [vmem:[%s2190_s1 + $0x7d] sm:$0x2] %vm7_vm0, %v749_v62  }
  0xf8   :  { %1020 = vst.msk [vmem:[%s2190_s1 + $0xbc] sm:$0x4] %vm7_vm0, %v749_v62   ;;  %1021 = vst.msk [vmem:[%s2190_s1 + $0xfb] sm:$0x8] %vm7_vm0, %v749_v62   ;;  %v761_v63 = vpop.permute.xlu0 %760  }
  0xf9   :  { %1022 = vst.msk [vmem:[%s2190_s1 + $0x3f] sm:$0x1] %vm7_vm0, %v761_v63   ;;  %1023 = vst.msk [vmem:[%s2190_s1 + $0x7e] sm:$0x2] %vm7_vm0, %v761_v63  }
  0xfa   :  { %1024 = vst.msk [vmem:[%s2190_s1 + $0xbd] sm:$0x4] %vm7_vm0, %v761_v63   ;;  %1025 = vst.msk [vmem:[%s2190_s1 + $0xfc] sm:$0x8] %vm7_vm0, %v761_v63  }

// kernel: mv_refinement_forward.5
= control target key start
LH: loop header
LB: loop body
LE: loop exit
PB: predicated region body
PF: predicated region fallthrough
CT: control target
= control target key end

     0   :  { %s2439_s12 = smov 0   ;;  %s3265_s0 = inlined_call_operand.vmem [shape: f32[2,256,256], index: 0, kind: input, shape index: {}]   ;;  %s3266_s1 = inlined_call_operand.vmem [shape: f32[4,64,256], index: 1, kind: input, shape index: {}]   ;;  %s3267_s2 = inlined_call_operand.vmem [shape: f32[64,1], index: 2, kind: input, shape index: {}]   ;;  %s3268_s3 = inlined_call_operand.vmem [shape: f32[2,64,128], index: 3, kind: output, shape index: {}]  }
   0x1 LB: > { %s1500_s13 = sadd.s32 4294967295, %s2413_s12   ;;  %p1504_p0 = scmp.ge.s32.totalorder %s2413_s12, 1  ;;  %s2413_s12 = sphi %s2439_s12, %s13_s12  }
   0x2   : > { %p137_p1 = scmp.lt.s32.totalorder %s2413_s12, 3 }
   0x4   : > { %p138_p2 = pnand %p1504_p0, %p137_p1 }
   0x6   : > { %141 = sbr.rel (%p138_p2) target bundleno = 581 (0x245), region = 32 }
   0xd   : > { %p161_p3 = scmp.lt.s32.totalorder %s1500_s13, 1  ;;  %s2415_s18 = smov 127   ;;  %vm460_vm0 = vcmask 1039360   ;;  %vm880_vm1 = vcmask 1006592   ;;  %vm1203_vm2 = vcmask 998400  }
   0xe   : > { %s2416_s21 = smov 123   ;;  %s2417_s26 = smov 122  }
   0xf   : > { %s3283_s13 = smov (!%p161_p3, %s1500_s13), 1 }
  0x10   : > { %s1559_s14 = sshll.u32 %s3283_s13, 9  ;;  %s1560_s16 = sshll.u32 %s3283_s13, 6 }
  0x11   : > { %s2453_s17 = scalar_lea.vmem %s3265_s0, %s1559_s14  ;;  %s3250_s19 = scalar_lea.vmem %s3268_s3, %s1560_s16 }
  0x12   : > { %v2456_v0 = vld [vmem:[%s2453_s17 + $0x20] sm:$0xff]  ;;  %v176_v1 = vld [vmem:[%s2453_s17 + $0x28] sm:$0xff]  ;;  %v2467_v5 = vld [vmem:[%s2453_s17 + $0x30] sm:$0xff] }
  0x13   : > { %v2460_v2 = vld [vmem:[%s2453_s17] sm:$0xff]  ;;  %v2463_v3 = vpack.i.bf16 %v176_v1, %v2456_v0  ;;  %v172_v4 = vld [vmem:[%s2453_s17 + $0x8] sm:$0xff]  ;;  %v178_v6 = vld [vmem:[%s2453_s17 + $0x38] sm:$0xff] }
  0x14   : > { %v2471_v7 = vpack.i.bf16 %v172_v4, %v2460_v2  ;;  %v2474_v8 = vld [vmem:[%s2453_s17 + $0x10] sm:$0xff]  ;;  %v174_v9 = vld [vmem:[%s2453_s17 + $0x18] sm:$0xff]  ;;  %v2480_v10 = vpack.i.bf16 %v178_v6, %v2467_v5  ;;  %v2492_v14 = vld [vmem:[%s2453_s17 + $0x40] sm:$0xff] }
  0x15   : > { %1936 = vrot.lane.b32.xlu1 %v2463_v3, %s2415_s18  ;;  %v2483_v11 = vld [vmem:[%s2453_s17 + $0x50] sm:$0xff]  ;;  %v182_v12 = vld [vmem:[%s2453_s17 + $0x58] sm:$0xff]  ;;  %v2487_v13 = vpack.i.bf16 %v174_v9, %v2474_v8  ;;  %v180_v15 = vld [vmem:[%s2453_s17 + $0x48] sm:$0xff] }
  0x16   : > { %1926 = vrot.lane.b32.xlu0 %v2471_v7, %s2415_s18  ;;  %v2496_v16 = vld [vmem:[%s2453_s17 + $0x70] sm:$0xff]  ;;  %v2499_v17 = vpack.i.bf16 %v182_v12, %v2483_v11  ;;  %v186_v18 = vld [vmem:[%s2453_s17 + $0x78] sm:$0xff]  ;;  %v2503_v19 = vld [vmem:[%s2453_s17 + $0x60] sm:$0xff]  ;;  %v2507_v21 = vpack.i.bf16 %v180_v15, %v2492_v14 }
  0x17   : > { %v184_v20 = vld [vmem:[%s2453_s17 + $0x68] sm:$0xff]  ;;  %v2510_v22 = vld [vmem:[%s2453_s17 + $0x90] sm:$0xff]  ;;  %v190_v23 = vld [vmem:[%s2453_s17 + $0x98] sm:$0xff]  ;;  %v2514_v24 = vpack.i.bf16 %v186_v18, %v2496_v16 }
  0x18   : > { %v2517_v25 = vpack.i.bf16 %v184_v20, %v2503_v19  ;;  %v2522_v26 = vpack.i.bf16 %v190_v23, %v2510_v22  ;;  %v2527_v27 = vld [vmem:[%s2453_s17 + $0x80] sm:$0xff]  ;;  %v188_v28 = vld [vmem:[%s2453_s17 + $0x88] sm:$0xff]  ;;  %v2547_v35 = vld [vmem:[%s2453_s17 + $0x150] sm:$0xff] }
  0x19   : > { %1941 = vrot.lane.b32.xlu1 %v2480_v10, %s2415_s18  ;;  %v208_v29 = vld [vmem:[%s2453_s17 + $0x128] sm:$0xff]  ;;  %v2532_v30 = vld [vmem:[%s2453_s17 + $0x120] sm:$0xff]  ;;  %v2535_v31 = vpack.i.bf16 %v188_v28, %v2527_v27  ;;  %v214_v37 = vld [vmem:[%s2453_s17 + $0x158] sm:$0xff] }
  0x1a   : > { %1931 = vrot.lane.b32.xlu0 %v2487_v13, %s2415_s18  ;;  %v212_v32 = vld [vmem:[%s2453_s17 + $0x148] sm:$0xff]  ;;  %v2539_v33 = vld [vmem:[%s2453_s17 + $0x140] sm:$0xff]  ;;  %v2542_v34 = vpack.i.bf16 %v208_v29, %v2532_v30  ;;  %v2557_v39 = vld [vmem:[%s2453_s17 + $0x170] sm:$0xff]  ;;  %v2566_v42 = vpack.i.bf16 %v214_v37, %v2547_v35 }
  0x1b   : > { %3274 = vst [vmem:[#allocation2_spill] sm:$0xff] %v2535_v31  ;;  %v216_v36 = vld [vmem:[%s2453_s17 + $0x168] sm:$0xff]  ;;  %v2552_v38 = vpack.i.bf16 %v212_v32, %v2539_v33  ;;  %v2560_v40 = vld [vmem:[%s2453_s17 + $0x160] sm:$0xff]  ;;  %v2563_v41 = vld [vmem:[%s2453_s17 + $0x178] sm:$0xff]  ;;  %v2000_v28 = vpack.i.bf16 %v2547_v35, %v212_v32 }
  0x1c   : > { %v2569_v43 = vld [vmem:[%s2453_s17 + $0x188] sm:$0xff]  ;;  %v2573_v44 = vpack.i.bf16 %v2563_v41, %v2557_v39  ;;  %v2576_v45 = vpack.i.bf16 %v216_v36, %v2560_v40  ;;  %v2579_v46 = vld [vmem:[%s2453_s17 + $0x190] sm:$0xff]  ;;  %v2582_v47 = vld [vmem:[%s2453_s17 + $0x180] sm:$0xff] }
  0x1d   : > { %1951 = vrot.lane.b32.xlu1 %v2499_v17, %s2415_s18  ;;  %v2585_v48 = vld [vmem:[%s2453_s17 + $0x198] sm:$0xff]  ;;  %v2590_v49 = vld [vmem:[%s2453_s17 + $0x108] sm:$0xff]  ;;  %v2593_v50 = vld [vmem:[%s2453_s17 + $0x110] sm:$0xff]  ;;  %v2601_v52 = vpack.i.bf16 %v2569_v43, %v2582_v47 }
  0x1e   : > { %1946 = vrot.lane.b32.xlu0 %v2507_v21, %s2415_s18  ;;  %v2597_v51 = vpack.i.bf16 %v2585_v48, %v2579_v46  ;;  %v2606_v53 = vld [vmem:[%s2453_s17 + $0xa0] sm:$0xff]  ;;  %v224_v55 = vld [vmem:[%s2453_s17 + $0x1a8] sm:$0xff]  ;;  %v2613_v56 = vld [vmem:[%s2453_s17 + $0x1b0] sm:$0xff]  ;;  %v1980_v61 = vpack.i.bf16 %v2593_v50, %v2590_v49 }
  0x1f   : > { %v2609_v54 = vld [vmem:[%s2453_s17 + $0x100] sm:$0xff]  ;;  %v2619_v58 = vld [vmem:[%s2453_s17 + $0x1b8] sm:$0xff]  ;;  %v2637_v63 = vld [vmem:[%s2453_s17 + $0x130] sm:$0xff] }
  0x20   : > { %v2616_v57 = vld [vmem:[%s2453_s17 + $0x1a0] sm:$0xff]  ;;  %v2623_v59 = vpack.i.bf16 %v2619_v58, %v2613_v56  ;;  %v1975_v62 = vpack.i.bf16 %v2609_v54, %v2606_v53  ;;  %v2640_v1 = vld [vmem:[%s2453_s17 + $0x118] sm:$0xff]  ;;  %v2643_v4 = vld [vmem:[%s2453_s17 + $0xb0] sm:$0xff]  ;;  %v1990_v18 = vpack.i.bf16 %v2637_v63, %v208_v29  ;;  %v2010_v29 = vpack.i.bf16 %v2557_v39, %v216_v36 }
  0x21   : > { %1961 = vrot.lane.b32.xlu1 %v2514_v24, %s2415_s18  ;;  %v2626_v60 = vpack.i.bf16 %v224_v55, %v2616_v57  ;;  %v194_v6 = vld [vmem:[%s2453_s17 + $0xb8] sm:$0xff]  ;;  %v192_v9 = vld [vmem:[%s2453_s17 + $0xa8] sm:$0xff]  ;;  %v1985_v20 = vpack.i.bf16 %v2532_v30, %v2640_v1  ;;  %v2020_v36 = vpack.i.bf16 %v2579_v46, %v2569_v43 }
  0x22   : > { %1956 = vrot.lane.b32.xlu0 %v2517_v25, %s2415_s18  ;;  %3275 = vst [vmem:[#allocation3_spill] sm:$0xff] %v2623_v59  ;;  %v2648_v12 = vpack.i.bf16 %v194_v6, %v2643_v4  ;;  %v2651_v15 = vpack.i.bf16 %v192_v9, %v2606_v53  ;;  %v2659_v23 = vld [vmem:[%s2453_s17 + $0x138] sm:$0xff]  ;;  %v2671_v6 = vld [vmem:[%s2453_s17 + $0x1d0] sm:$0xff]  ;;  %v2697_v59 = vld [vmem:[%s2453_s17 + $0xc0] sm:$0xff] }
  0x23   : > { %3276 = vst [vmem:[#allocation4_spill] sm:$0xff] %v2626_v60  ;;  %v230_v32 = vld [vmem:[%s2453_s17 + $0x1d8] sm:$0xff]  ;;  %v1817_v60 = vpack.c.bf16 %v2593_v50, %v2609_v54 }
  0x24   : > { %3277 = vst [vmem:[#allocation5_spill] sm:$0xff] %v2651_v15  ;;  %v2679_v15 = vpack.i.bf16 %v230_v32, %v2671_v6  ;;  %v198_v32 = vld [vmem:[%s2453_s17 + $0xd8] sm:$0xff] }
  0x25   : > { %1971 = vrot.lane.b32.xlu1 %v2522_v26, %s2415_s18  ;;  %1818 = vmatprep.subr.bf16.mxu1 %v1817_v60  ;;  %v1827_v60 = vpack.c.bf16 %v2483_v11, %v2492_v14  ;;  %v1831_v11 = vpack.c.bf16 %v2496_v16, %v2503_v19  ;;  %v1835_v16 = vpack.c.bf16 %v2510_v22, %v2527_v27 }
  0x26   : > { %1966 = vrot.lane.b32.xlu0 %v2535_v31, %s2415_s18  ;;  %v2025_v31 = vpack.i.bf16 %v2616_v57, %v2585_v48  ;;  %v1825_v48 = vpack.c.bf16 %v2547_v35, %v2539_v33 }
  0x29   : > { %1981 = vrot.lane.b32.xlu1 %v1980_v61, %s2415_s18  ;;  %v1995_v61 = vpack.i.bf16 %v2539_v33, %v2659_v23  ;;  %v232_v33 = vld [vmem:[%s2453_s17 + $0x1e8] sm:$0xff] }
  0x2a   : > { %1976 = vrot.lane.b32.xlu0 %v1975_v62, %s2415_s18  ;;  %v2005_v62 = vpack.i.bf16 %v2560_v40, %v214_v37  ;;  %v2015_v37 = vpack.i.bf16 %v2582_v47, %v2563_v41  ;;  %v2030_v41 = vpack.i.bf16 %v2613_v56, %v224_v55  ;;  %v2035_v55 = vpack.i.bf16 %v192_v9, %v2619_v58  ;;  %v201_v58 = vld [vmem:[%s2453_s17 + $0xf0] sm:$0xff]  ;;  %v199_v9 = vld [vmem:[%s2453_s17 + $0xe0] sm:$0xff] }
  0x2d   : > { %1991 = vrot.lane.b32.xlu1 %v1990_v18, %s2415_s18  ;;  %v2675_v18 = vld [vmem:[%s2453_s17 + $0x1c0] sm:$0xff] }
  0x2e   : > { %1986 = vrot.lane.b32.xlu0 %v1985_v20, %s2415_s18  ;;  %v228_v20 = vld [vmem:[%s2453_s17 + $0x1c8] sm:$0xff]  ;;  %v1841_v22 = vpack.c.bf16 %v2671_v6, %v2675_v18 }
  0x31   : > { %2001 = vrot.lane.b32.xlu1 %v2000_v28, %s2415_s18  ;;  %v2682_v28 = vpack.i.bf16 %v228_v20, %v2675_v18  ;;  %v196_v20 = vld [vmem:[%s2453_s17 + $0xc8] sm:$0xff] }
  0x32   : > { %1996 = vrot.lane.b32.xlu0 %v1995_v61, %s2415_s18  ;;  %v2691_v61 = vld [vmem:[%s2453_s17 + $0xd0] sm:$0xff] }
  0x33   : > { %v2703_v43 = vpack.i.bf16 %v198_v32, %v2691_v61  ;;  %v1843_v27 = vpack.c.bf16 %v2691_v61, %v2697_v59 }
  0x35   : > { %2011 = vrot.lane.b32.xlu1 %v2010_v29, %s2415_s18  ;;  %v1819_v29 = vpack.c.bf16 %v2474_v8, %v2460_v2  ;;  %v1821_v2 = vpack.c.bf16 %v2637_v63, %v2532_v30  ;;  %v1823_v8 = vpack.c.bf16 %v2467_v5, %v2456_v0  ;;  %v233_v0 = vld [vmem:[%s2453_s17 + $0x1f0] sm:$0xff]  ;;  %v1829_v5 = vpack.c.bf16 %v2557_v39, %v2560_v40  ;;  %v234_v30 = vld [vmem:[%s2453_s17 + $0x1f8] sm:$0xff] }
  0x36   : > { %2006 = vrot.lane.b32.xlu0 %v2005_v62, %s2415_s18  ;;  %v2706_v62 = vpack.i.bf16 %v196_v20, %v2697_v59  ;;  %v2735_v14 = vpack.i.bf16 %v234_v30, %v233_v0  ;;  %v1833_v39 = vpack.c.bf16 %v2579_v46, %v2582_v47  ;;  %v202_v40 = vld [vmem:[%s2453_s17 + $0xf8] sm:$0xff]  ;;  %v1837_v46 = vpack.c.bf16 %v2613_v56, %v2616_v57  ;;  %v1510_v56 = vld [vmem:[%s3266_s1 + $0x88] sm:$0xff] }
  0x37   : > { %1820 = vmatpush3.bf16.msra.mxu1 %v1819_v29  ;;  %v2751_v19 = vpack.i.bf16 %v202_v40, %v201_v58  ;;  %v1839_v47 = vpack.c.bf16 %v2643_v4, %v2606_v53  ;;  %v2090_v53 = vpack.i.bf16 %v2640_v1, %v2593_v50  ;;  %589 = vmatprep.mubr.f32.mxu0 %v1510_v56  ;;  %v236_v50 = vld [vmem:[%s3266_s1 + $0x8] sm:$0xff]  ;;  %v3280_v56 = vld [vmem:[#allocation4_spill] sm:$0xff] }
  0x38   : > { %1822 = vmatprep.subr.bf16.mxu1 %v1821_v2  ;;  %v2085_v57 = vpack.i.bf16 %v2590_v49, %v2609_v54  ;;  %v1847_v4 = vpack.c.bf16 %v201_v58, %v199_v9  ;;  %694 = vmatprep.mubr.f32.mxu1 %v236_v50  ;;  %v235_v49 = vld [vmem:[%s3266_s1] sm:$0xff]  ;;  %v2130_v54 = vpack.i.bf16 %v2659_v23, %v2637_v63 }
  0x39   : > { %2021 = vrot.lane.b32.xlu1 %v2020_v36, %s2415_s18  ;;  %v200_v36 = vld [vmem:[%s2453_s17 + $0xe8] sm:$0xff] }
  0x3a   : > { %2016 = vrot.lane.b32.xlu0 %v2015_v37, %s2415_s18  ;;  %v2753_v37 = vpack.i.bf16 %v200_v36, %v199_v9 }
  0x3b   : > { %1824 = vmatpush3.bf16.msra.mxu1 %v1823_v8 }
  0x3c   : > { %1826 = vmatprep.subr.bf16.mxu1 %v1825_v48 }
  0x3d   : > { %2031 = vrot.lane.b32.xlu1 %v2030_v41, %s2415_s18 }
  0x3e   : > { %2026 = vrot.lane.b32.xlu0 %v2025_v31, %s2415_s18  ;;  %v231_v31 = vld [vmem:[%s2453_s17 + $0x1e0] sm:$0xff] }
  0x3f   : > { %1828 = vmatpush3.bf16.msra.mxu1 %v1827_v60  ;;  %v2737_v35 = vpack.i.bf16 %v232_v33, %v231_v31  ;;  %v1845_v59 = vpack.c.bf16 %v233_v0, %v231_v31 }
  0x40   : > { %1830 = vmatprep.subr.bf16.mxu1 %v1829_v5 }
  0x41   : > { %2041 = vrot.lane.b32.xlu1 %v2648_v12, %s2415_s18 }
  0x42   : > { %2036 = vrot.lane.b32.xlu0 %v2035_v55, %s2415_s18 }
  0x43   : > { %1832 = vmatpush3.bf16.msra.mxu1 %v1831_v11 }
  0x44   : > { %1834 = vmatprep.subr.bf16.mxu1 %v1833_v39 }
  0x45   : > { %2051 = vrot.lane.b32.xlu1 %v2679_v15, %s2415_s18 }
  0x46   : > { %2046 = vrot.lane.b32.xlu0 %v2682_v28, %s2415_s18 }
  0x47   : > { %1836 = vmatpush3.bf16.msra.mxu1 %v1835_v16  ;;  %v3279_v16 = vld [vmem:[#allocation3_spill] sm:$0xff] }
  0x48   : > { %1838 = vmatprep.subr.bf16.mxu1 %v1837_v46 }
  0x49   : > { %2061 = vrot.lane.b32.xlu1 %v2703_v43, %s2415_s18 }
  0x4a   : > { %2056 = vrot.lane.b32.xlu0 %v2706_v62, %s2415_s18 }
  0x4b   : > { %1840 = vmatpush3.bf16.msra.mxu1 %v1839_v47 }
  0x4c   : > { %1842 = vmatprep.subr.bf16.mxu1 %v1841_v22 }
  0x4d   : > { %2071 = vrot.lane.b32.xlu1 %v2735_v14, %s2415_s18 }
  0x4e   : > { %2066 = vrot.lane.b32.xlu0 %v2737_v35, %s2415_s18 }
  0x4f   : > { %1844 = vmatpush3.bf16.msra.mxu1 %v1843_v27 }
  0x50   : > { %1846 = vmatprep.subr.bf16.mxu1 %v1845_v59 }
  0x51   : > { %2081 = vrot.lane.b32.xlu1 %v2751_v19, %s2415_s18 }
  0x52   : > { %2076 = vrot.lane.b32.xlu0 %v2753_v37, %s2415_s18 }
  0x53   : > { %1848 = vmatpush3.bf16.msra.mxu1 %v1847_v4 }
  0x55   : > { %2091 = vrot.lane.b32.xlu1 %v2090_v53, %s2416_s21 }
  0x56   : > { %2086 = vrot.lane.b32.xlu0 %v2085_v57, %s2416_s21  ;;  %695 = vmatmul.mubr.f32.vlgmr.msra.gmra.mrb[0].mxu1 %v235_v49 }
  0x59   : > { %2101 = vrot.lane.b32.xlu1 %v2487_v13, %s2416_s21 }
  0x5a   : > { %2096 = vrot.lane.b32.xlu0 %v2471_v7, %s2416_s21 }
  0x5d   : > { %2111 = vrot.lane.b32.xlu1 %v2090_v53, %s2417_s26 }
  0x5e   : > { %2106 = vrot.lane.b32.xlu0 %v2085_v57, %s2417_s26 }
  0x61   : > { %2121 = vrot.lane.b32.xlu1 %v2487_v13, %s2417_s26 }
  0x62   : > { %2116 = vrot.lane.b32.xlu0 %v2471_v7, %s2417_s26 }
  0x65   : > { %2131 = vrot.lane.b32.xlu1 %v2130_v54, %s2416_s21 }
  0x66   : > { %2126 = vrot.lane.b32.xlu0 %v2542_v34, %s2416_s21 }
  0x69   : > { %2141 = vrot.lane.b32.xlu1 %v2480_v10, %s2416_s21 }
  0x6a   : > { %2136 = vrot.lane.b32.xlu0 %v2463_v3, %s2416_s21 }
  0x6d   : > { %2151 = vrot.lane.b32.xlu1 %v2130_v54, %s2417_s26 }
  0x6e   : > { %2146 = vrot.lane.b32.xlu0 %v2542_v34, %s2417_s26 }
  0x71   : > { %2161 = vrot.lane.b32.xlu1 %v2480_v10, %s2417_s26 }
  0x72   : > { %2156 = vrot.lane.b32.xlu0 %v2463_v3, %s2417_s26 }
  0x75   : > { %2171 = vrot.lane.b32.xlu1 %v2566_v42, %s2416_s21 }
  0x76   : > { %2166 = vrot.lane.b32.xlu0 %v2552_v38, %s2416_s21 }
  0x79   : > { %2181 = vrot.lane.b32.xlu1 %v2499_v17, %s2416_s21 }
  0x7a   : > { %2176 = vrot.lane.b32.xlu0 %v2507_v21, %s2416_s21 }
  0x7d   : > { %2191 = vrot.lane.b32.xlu1 %v2566_v42, %s2417_s26 }
  0x7e   : > { %2186 = vrot.lane.b32.xlu0 %v2552_v38, %s2417_s26 }
  0x81   : > { %2201 = vrot.lane.b32.xlu1 %v2499_v17, %s2417_s26 }
  0x82   : > { %2196 = vrot.lane.b32.xlu0 %v2507_v21, %s2417_s26 }
  0x85   : > { %2211 = vrot.lane.b32.xlu1 %v2573_v44, %s2416_s21 }
  0x86   : > { %2206 = vrot.lane.b32.xlu0 %v2576_v45, %s2416_s21 }
  0x87   : > { %v2836_v3 = vpop.permute.xlu1 %1936 }
  0x88   : > { %v1927_v7 = vpop.permute.xlu0 %1926  ;;  %v1939_v11 = vunpack.i.h.bf16 %v2836_v3 }
  0x89   : > { %2221 = vrot.lane.b32.xlu1 %v2514_v24, %s2416_s21  ;;  %v1929_v61 = vunpack.i.h.bf16 %v1927_v7  ;;  %v1928_v32 = vunpack.i.l.bf16 %v1927_v7 }
  0x8a   : > { %2216 = vrot.lane.b32.xlu0 %v2517_v25, %s2416_s21 }
  0x8b   : > { %v1942_v10 = vpop.permute.xlu1 %1941  ;;  %v461_v40 = vsel %vm460_vm0, %v1928_v32, %v1929_v61 }
  0x8c   : > { %v1932_v13 = vpop.permute.xlu0 %1931  ;;  %v1944_v20 = vunpack.i.h.bf16 %v1942_v10  ;;  %v1943_v41 = vunpack.i.l.bf16 %v1942_v10 }
  0x8d   : > { %2231 = vrot.lane.b32.xlu1 %v2573_v44, %s2417_s26  ;;  %v1934_v63 = vunpack.i.h.bf16 %v1932_v13  ;;  %v1933_v1 = vunpack.i.l.bf16 %v1932_v13 }
  0x8e   : > { %2226 = vrot.lane.b32.xlu0 %v2576_v45, %s2417_s26  ;;  %v464_v47 = vsel %vm460_vm0, %v1943_v41, %v1944_v20 }
  0x8f   : > { %v1952_v17 = vpop.permute.xlu1 %1951 }
  0x90   : > { %v1947_v21 = vpop.permute.xlu0 %1946  ;;  %v1954_v55 = vunpack.i.h.bf16 %v1952_v17  ;;  %v1953_v48 = vunpack.i.l.bf16 %v1952_v17 }
  0x91   : > { %2241 = vrot.lane.b32.xlu1 %v2514_v24, %s2417_s26  ;;  %v3278_v24 = vld [vmem:[#allocation2_spill] sm:$0xff]  ;;  %v1948_v60 = vunpack.i.l.bf16 %v1947_v21 }
  0x92   : > { %2236 = vrot.lane.b32.xlu0 %v2517_v25, %s2417_s26  ;;  %v466_v57 = vsel %vm460_vm0, %v1953_v48, %v1954_v55 }
  0x93   : > { %v2850_v34 = vpop.permute.xlu1 %1961 }
  0x94   : > { %v2852_v38 = vpop.permute.xlu0 %1956  ;;  %v1964_v22 = vunpack.i.h.bf16 %v2850_v34  ;;  %v1963_v27 = vunpack.i.l.bf16 %v2850_v34 }
  0x95   : > { %2251 = vrot.lane.b32.xlu1 %v2597_v51, %s2416_s21  ;;  %v1958_v7 = vunpack.i.l.bf16 %v2852_v38 }
  0x96   : > { %2246 = vrot.lane.b32.xlu0 %v2601_v52, %s2416_s21 }
  0x97   : > { %v2858_v42 = vpop.permute.xlu1 %1971 }
  0x98   : > { %v2860_v44 = vpop.permute.xlu0 %1966  ;;  %v1974_v32 = vunpack.i.h.bf16 %v2858_v42  ;;  %v1973_v20 = vunpack.i.l.bf16 %v2858_v42  ;;  %v237_v42 = vld [vmem:[%s3266_s1 + $0x10] sm:$0xff] }
  0x99   : > { %2261 = vrot.lane.b32.xlu1 %v2522_v26, %s2416_s21  ;;  %v1968_v55 = vunpack.i.l.bf16 %v2860_v44 }
  0x9a   : > { %2256 = vrot.lane.b32.xlu0 %v3278_v24, %s2416_s21 }
  0x9b   : > { %v1982_v25 = vpop.permute.xlu1 %1981 }
  0x9c   : > { %v2866_v45 = vpop.permute.xlu0 %1976  ;;  %v1983_v23 = vunpack.i.l.bf16 %v1982_v25  ;;  %v1984_v2 = vunpack.i.h.bf16 %v1982_v25  ;;  %v3281_v25 = vld [vmem:[#allocation5_spill] sm:$0xff] }
  0x9d   : > { %2271 = vrot.lane.b32.xlu1 %v2597_v51, %s2417_s26  ;;  %v1979_v6 = vunpack.i.h.bf16 %v2866_v45  ;;  %v462_v51 = vsel %vm460_vm0, %v1933_v1, %v1934_v63  ;;  %v468_v1 = vsel %vm460_vm0, %v1963_v27, %v1964_v22 }
  0x9e   : > { %2266 = vrot.lane.b32.xlu0 %v2601_v52, %s2417_s26  ;;  %v1949_v52 = vunpack.i.h.bf16 %v1947_v21  ;;  %v1787_v46 = vpack.c.bf16 %v462_v51, %v461_v40  ;;  %v1969_v51 = vunpack.i.h.bf16 %v2860_v44 }
  0x9f   : > { %v1992_v18 = vpop.permute.xlu1 %1991  ;;  %v477_v31 = vsel %vm460_vm0, %v1979_v6, %v1983_v23 }
  0xa0   : > { %v1987_v29 = vpop.permute.xlu0 %1986  ;;  %v1993_v0 = vunpack.i.l.bf16 %v1992_v18  ;;  %v1994_v9 = vunpack.i.h.bf16 %v1992_v18  ;;  %v465_v53 = vsel %vm460_vm0, %v1948_v60, %v1949_v52  ;;  %v469_v40 = vsel %vm460_vm0, %v1968_v55, %v1969_v51  ;;  %v246_v51 = vld [vmem:[%s3266_s1 + $0x58] sm:$0xff] }
  0xa1   : > { %v1988_v8 = vunpack.i.l.bf16 %v1987_v29  ;;  %2281 = vrot.lane.b32.xlu1 %v2522_v26, %s2417_s26  ;;  %v1989_v5 = vunpack.i.h.bf16 %v1987_v29  ;;  %v1938_v26 = vunpack.i.l.bf16 %v2836_v3  ;;  %v1959_v3 = vunpack.i.h.bf16 %v2852_v38 }
  0xa2   : > { %2276 = vrot.lane.b32.xlu0 %v3278_v24, %s2417_s26  ;;  %v1795_v63 = vpack.c.bf16 %v466_v57, %v465_v53 }
  0xa3   : > { %v2002_v30 = vpop.permute.xlu1 %2001  ;;  %v478_v33 = vsel %vm460_vm0, %v1984_v2, %v1988_v8  ;;  %v479_v49 = vsel %vm460_vm0, %v1989_v5, %v1993_v0  ;;  %v463_v17 = vsel %vm460_vm0, %v1938_v26, %v1939_v11  ;;  %v467_v2 = vsel %vm460_vm0, %v1958_v7, %v1959_v3  ;;  %v238_v8 = vld [vmem:[%s3266_s1 + $0x18] sm:$0xff]  ;;  %v240_v26 = vld [vmem:[%s3266_s1 + $0x28] sm:$0xff]  ;;  %v241_v7 = vld [vmem:[%s3266_s1 + $0x30] sm:$0xff] }
  0xa4   : > { %v1997_v58 = vpop.permute.xlu0 %1996  ;;  %v1785_v39 = vpack.c.bf16 %v478_v33, %v477_v31  ;;  %v2003_v59 = vunpack.i.l.bf16 %v2002_v30  ;;  %v2004_v21 = vunpack.i.h.bf16 %v2002_v30  ;;  %v1791_v24 = vpack.c.bf16 %v464_v47, %v463_v17  ;;  %699 = vmatprep.mubr.f32.mxu1 %v238_v8 }
  0xa5   : > { %v1998_v36 = vunpack.i.l.bf16 %v1997_v58  ;;  %2291 = vrot.lane.b32.xlu1 %v3279_v16, %s2416_s21  ;;  %v1999_v4 = vunpack.i.h.bf16 %v1997_v58  ;;  %700 = vmatmul.mubr.f32.gmra.mrb[2].mxu1 %v237_v42  ;;  %v1799_v11 = vpack.c.bf16 %v468_v1, %v467_v2 }
  0xa6   : > { %2286 = vrot.lane.b32.xlu0 %v3280_v56, %s2416_s21  ;;  %1786 = vmatprep.subr.bf16.mxu0 %v1785_v39 }
  0xa7   : > { %1788 = vmatpush3.bf16.msra.mxu0 %v1787_v46  ;;  %v2012_v50 = vpop.permute.xlu1 %2011  ;;  %v480_v54 = vsel %vm460_vm0, %v1994_v9, %v1998_v36  ;;  %v481_v18 = vsel %vm460_vm0, %v1999_v4, %v2003_v59  ;;  %v470_v9 = vsel %vm460_vm0, %v1973_v20, %v1974_v32  ;;  %704 = vmatprep.mubr.f32.mxu1 %v240_v26  ;;  %v239_v36 = vld [vmem:[%s3266_s1 + $0x20] sm:$0xff]  ;;  %v242_v4 = vld [vmem:[%s3266_s1 + $0x38] sm:$0xff] }
  0xa8   : > { %v2007_v10 = vpop.permute.xlu0 %2006  ;;  %v1789_v13 = vpack.c.bf16 %v480_v54, %v479_v49  ;;  %v2013_v23 = vunpack.i.l.bf16 %v2012_v50  ;;  %v2014_v48 = vunpack.i.h.bf16 %v2012_v50  ;;  %v1803_v59 = vpack.c.bf16 %v470_v9, %v469_v40 }
  0xa9   : > { %v2008_v34 = vunpack.i.l.bf16 %v2007_v10  ;;  %2301 = vrot.lane.b32.xlu1 %v2648_v12, %s2416_s21  ;;  %v2009_v6 = vunpack.i.h.bf16 %v2007_v10  ;;  %705 = vmatmul.mubr.f32.gmra.mrb[4].mxu1 %v239_v36  ;;  %v1978_v50 = vunpack.i.l.bf16 %v2866_v45 }
  0xaa   : > { %2296 = vrot.lane.b32.xlu0 %v3281_v25, %s2416_s21  ;;  %1790 = vmatprep.subr.bf16.mxu0 %v1789_v13 }
  0xab   : > { %1792 = vmatpush3.bf16.msra.mxu0 %v1791_v24  ;;  %v2022_v38 = vpop.permute.xlu1 %2021  ;;  %v482_v61 = vsel %vm460_vm0, %v2004_v21, %v2008_v34  ;;  %v483_v44 = vsel %vm460_vm0, %v2009_v6, %v2013_v23  ;;  %709 = vmatprep.mubr.f32.mxu1 %v242_v4  ;;  %v244_v23 = vld [vmem:[%s3266_s1 + $0x48] sm:$0xff] }
  0xac   : > { %v2017_v29 = vpop.permute.xlu0 %2016  ;;  %v1793_v41 = vpack.c.bf16 %v482_v61, %v481_v18  ;;  %v2023_v60 = vunpack.i.l.bf16 %v2022_v38  ;;  %v2024_v58 = vunpack.i.h.bf16 %v2022_v38  ;;  %v243_v18 = vld [vmem:[%s3266_s1 + $0x40] sm:$0xff] }
  0xad   : > { %v2018_v52 = vunpack.i.l.bf16 %v2017_v29  ;;  %2311 = vrot.lane.b32.xlu1 %v3279_v16, %s2417_s26  ;;  %v2019_v0 = vunpack.i.h.bf16 %v2017_v29  ;;  %710 = vmatmul.mubr.f32.gmra.mrb[6].mxu1 %v241_v7 }
  0xae   : > { %2306 = vrot.lane.b32.xlu0 %v3280_v56, %s2417_s26  ;;  %1794 = vmatprep.subr.bf16.mxu0 %v1793_v41 }
  0xaf   : > { %1796 = vmatpush3.bf16.msra.mxu0 %v1795_v63  ;;  %v2032_v5 = vpop.permute.xlu1 %2031  ;;  %v484_v30 = vsel %vm460_vm0, %v2014_v48, %v2018_v52  ;;  %v485_v22 = vsel %vm460_vm0, %v2019_v0, %v2023_v60  ;;  %714 = vmatprep.mubr.f32.mxu1 %v244_v23  ;;  %v245_v52 = vld [vmem:[%s3266_s1 + $0x50] sm:$0xff] }
  0xb0   : > { %v2027_v31 = vpop.permute.xlu0 %2026  ;;  %v1797_v33 = vpack.c.bf16 %v484_v30, %v483_v44  ;;  %v2033_v16 = vunpack.i.l.bf16 %v2032_v5  ;;  %v2034_v49 = vunpack.i.h.bf16 %v2032_v5 }
  0xb1   : > { %v2028_v39 = vunpack.i.l.bf16 %v2027_v31  ;;  %2321 = vrot.lane.b32.xlu1 %v2648_v12, %s2417_s26  ;;  %v2029_v46 = vunpack.i.h.bf16 %v2027_v31  ;;  %715 = vmatmul.mubr.f32.gmra.mrb[8].mxu1 %v243_v18 }
  0xb2   : > { %2316 = vrot.lane.b32.xlu0 %v3281_v25, %s2417_s26  ;;  %1798 = vmatprep.subr.bf16.mxu0 %v1797_v33 }
  0xb3   : > { %1800 = vmatpush3.bf16.msra.mxu0 %v1799_v11  ;;  %v2042_v47 = vpop.permute.xlu1 %2041  ;;  %v486_v12 = vsel %vm460_vm0, %v2024_v58, %v2028_v39  ;;  %v487_v45 = vsel %vm460_vm0, %v2029_v46, %v2033_v16  ;;  %719 = vmatprep.mubr.f32.mxu1 %v246_v51  ;;  %v1516_v51 = vld [vmem:[%s3266_s1 + $0xb8] sm:$0xff] }
  0xb4   : > { %v2044_v27 = vunpack.i.h.bf16 %v2042_v47  ;;  %v2043_v56 = vunpack.i.l.bf16 %v2042_v47  ;;  %v2037_v53 = vpop.permute.xlu0 %2036  ;;  %v1801_v57 = vpack.c.bf16 %v486_v12, %v485_v22 }
  0xb5   : > { %v2039_v54 = vunpack.i.h.bf16 %v2037_v53  ;;  %v2038_v3 = vunpack.i.l.bf16 %v2037_v53  ;;  %2331 = vrot.lane.b32.xlu1 %v2679_v15, %s2416_s21  ;;  %720 = vmatmul.mubr.f32.gmra.mrb[10].mxu1 %v245_v52 }
  0xb6   : > { %2326 = vrot.lane.b32.xlu0 %v2682_v28, %s2416_s21  ;;  %1802 = vmatprep.subr.bf16.mxu0 %v1801_v57  ;;  %v472_v10 = vsel %vm460_vm0, %v2043_v56, %v2044_v27 }
  0xb7   : > { %1804 = vmatpush3.bf16.msra.mxu0 %v1803_v59  ;;  %v2052_v13 = vpop.permute.xlu1 %2051  ;;  %v488_v17 = vsel %vm460_vm0, %v2034_v49, %v2038_v3  ;;  %v471_v21 = vsel %vm460_vm0, %v1978_v50, %v2039_v54  ;;  %v1509_v54 = vld [vmem:[%s3266_s1 + $0x80] sm:$0xff]  ;;  %v1542_v3 = vld [vmem:[%s3266_s1 + $0x188] sm:$0xff] }
  0xb8   : > { %v2054_v34 = vunpack.i.h.bf16 %v2052_v13  ;;  %v2053_v24 = vunpack.i.l.bf16 %v2052_v13  ;;  %v2047_v25 = vpop.permute.xlu0 %2046  ;;  %v1805_v63 = vpack.c.bf16 %v488_v17, %v487_v45  ;;  %v1807_v1 = vpack.c.bf16 %v472_v10, %v471_v21 }
  0xb9   : > { %v2049_v6 = vunpack.i.h.bf16 %v2047_v25  ;;  %v2048_v38 = vunpack.i.l.bf16 %v2047_v25  ;;  %2341 = vrot.lane.b32.xlu1 %v2703_v43, %s2416_s21 }
  0xba   : > { %2336 = vrot.lane.b32.xlu0 %v2706_v62, %s2416_s21  ;;  %1806 = vmatprep.subr.bf16.mxu0 %v1805_v63  ;;  %v490_v61 = vsel %vm460_vm0, %v2053_v24, %v2054_v34  ;;  %v1512_v34 = vld [vmem:[%s3266_s1 + $0x98] sm:$0xff] }
  0xbb   : > { %1808 = vmatpush3.bf16.msra.mxu0 %v1807_v1  ;;  %v2062_v32 = vpop.permute.xlu1 %2061  ;;  %v489_v20 = vsel %vm460_vm0, %v2048_v38, %v2049_v6  ;;  %v1511_v1 = vld [vmem:[%s3266_s1 + $0x90] sm:$0xff] }
  0xbc   : > { %v2064_v29 = vunpack.i.h.bf16 %v2062_v32  ;;  %v2063_v41 = vunpack.i.l.bf16 %v2062_v32  ;;  %v2057_v2 = vpop.permute.xlu0 %2056  ;;  %v1809_v8 = vpack.c.bf16 %v490_v61, %v489_v20  ;;  %v1514_v32 = vld [vmem:[%s3266_s1 + $0xa8] sm:$0xff] }
  0xbd   : > { %v2059_v55 = vunpack.i.h.bf16 %v2057_v2  ;;  %v2058_v48 = vunpack.i.l.bf16 %v2057_v2  ;;  %2351 = vrot.lane.b32.xlu1 %v2679_v15, %s2417_s26  ;;  %v248_v15 = vld [vmem:[%s3266_s1 + $0x68] sm:$0xff] }
  0xbe   : > { %2346 = vrot.lane.b32.xlu0 %v2682_v28, %s2417_s26  ;;  %1810 = vmatprep.subr.bf16.mxu0 %v1809_v8  ;;  %v474_v42 = vsel %vm460_vm0, %v2063_v41, %v2064_v29  ;;  %v247_v28 = vld [vmem:[%s3266_s1 + $0x60] sm:$0xff] }
  0xbf   : > { %v2072_v60 = vpop.permute.xlu1 %2071  ;;  %v473_v0 = vsel %vm460_vm0, %v2058_v48, %v2059_v55  ;;  %724 = vmatprep.mubr.f32.mxu1 %v248_v15  ;;  %v1513_v41 = vld [vmem:[%s3266_s1 + $0xa0] sm:$0xff] }
  0xc0   : > { %v2074_v5 = vunpack.i.h.bf16 %v2072_v60  ;;  %v2073_v44 = vunpack.i.l.bf16 %v2072_v60  ;;  %v2067_v30 = vpop.permute.xlu0 %2066  ;;  %v1811_v31 = vpack.c.bf16 %v474_v42, %v473_v0  ;;  %725 = vmatmul.mubr.f32.gmra.mrb[12].mxu1 %v247_v28  ;;  %v1515_v0 = vld [vmem:[%s3266_s1 + $0xb0] sm:$0xff] }
  0xc1   : > { %v2069_v33 = vunpack.i.h.bf16 %v2067_v30  ;;  %v2068_v11 = vunpack.i.l.bf16 %v2067_v30  ;;  %2361 = vrot.lane.b32.xlu1 %v2703_v43, %s2417_s26  ;;  %v250_v43 = vld [vmem:[%s3266_s1 + $0x78] sm:$0xff]  ;;  %v1518_v30 = vld [vmem:[%s3266_s1 + $0xc8] sm:$0xff] }
  0xc2   : > { %2356 = vrot.lane.b32.xlu0 %v2706_v62, %s2417_s26  ;;  %1812 = vmatpush3.bf16.msra.mxu0 %v1811_v31  ;;  %v492_v26 = vsel %vm460_vm0, %v2073_v44, %v2074_v5  ;;  %v249_v62 = vld [vmem:[%s3266_s1 + $0x70] sm:$0xff] }
  0xc3   : > { %v2082_v58 = vpop.permute.xlu1 %2081  ;;  %v491_v39 = vsel %vm460_vm0, %v2068_v11, %v2069_v33  ;;  %729 = vmatprep.mubr.f32.mxu1 %v250_v43 }
  0xc4   : > { %v2084_v40 = vunpack.i.h.bf16 %v2082_v58  ;;  %v2083_v9 = vunpack.i.l.bf16 %v2082_v58  ;;  %v2077_v36 = vpop.permute.xlu0 %2076  ;;  %v1813_v16 = vpack.c.bf16 %v492_v26, %v491_v39  ;;  %730 = vmatmul.mubr.f32.gmra.mrb[14].mxu1 %v249_v62  ;;  %v1517_v39 = vld [vmem:[%s3266_s1 + $0xc0] sm:$0xff] }
  0xc5   : > { %v2079_v46 = vunpack.i.h.bf16 %v2077_v36  ;;  %v2078_v47 = vunpack.i.l.bf16 %v2077_v36  ;;  %2371 = vrot.lane.b32.xlu1 %v2735_v14, %s2416_s21  ;;  %1332 = vmatprep.mubr.f32.mxu1 %v1542_v3  ;;  %v1520_v36 = vld [vmem:[%s3266_s1 + $0xd8] sm:$0xff] }
  0xc6   : > { %2366 = vrot.lane.b32.xlu0 %v2737_v35, %s2416_s21  ;;  %1814 = vmatprep.subr.bf16.mxu0 %v1813_v16  ;;  %v476_v22 = vsel %vm460_vm0, %v2083_v9, %v2084_v40 }
  0xc7   : > { %v2092_v12 = vpop.permute.xlu1 %2091  ;;  %v475_v27 = vsel %vm460_vm0, %v2078_v47, %v2079_v46 }
  0xc8   : > { %v2094_v56 = vunpack.i.h.bf16 %v2092_v12  ;;  %v2093_v53 = vunpack.i.l.bf16 %v2092_v12  ;;  %v2087_v57 = vpop.permute.xlu0 %2086  ;;  %v1815_v59 = vpack.c.bf16 %v476_v22, %v475_v27  ;;  %v1519_v27 = vld [vmem:[%s3266_s1 + $0xd0] sm:$0xff] }
  0xc9   : > { %v2089_v4 = vunpack.i.h.bf16 %v2087_v57  ;;  %v2088_v50 = vunpack.i.l.bf16 %v2087_v57  ;;  %2381 = vrot.lane.b32.xlu1 %v2751_v19, %s2416_s21  ;;  %v1522_v57 = vld [vmem:[%s3266_s1 + $0xe8] sm:$0xff] }
  0xca   : > { %2376 = vrot.lane.b32.xlu0 %v2753_v37, %s2416_s21  ;;  %1816 = vmatpush3.bf16.msra.mxu0 %v1815_v59  ;;  %v898_v49 = vsel %vm880_vm1, %v2093_v53, %v2094_v56 }
  0xcb   : > { %v2102_v7 = vpop.permute.xlu1 %2101  ;;  %v897_v10 = vsel %vm880_vm1, %v2088_v50, %v2089_v4 }
  0xcc   : > { %v2104_v13 = vunpack.i.h.bf16 %v2102_v7  ;;  %v2103_v45 = vunpack.i.l.bf16 %v2102_v7  ;;  %v2097_v17 = vpop.permute.xlu0 %2096  ;;  %v1849_v21 = vpack.c.bf16 %v898_v49, %v897_v10  ;;  %v1521_v10 = vld [vmem:[%s3266_s1 + $0xe0] sm:$0xff] }
  0xcd   : > { %v2099_v24 = vunpack.i.h.bf16 %v2097_v17  ;;  %v2098_v25 = vunpack.i.l.bf16 %v2097_v17  ;;  %2391 = vrot.lane.b32.xlu1 %v2735_v14, %s2417_s26  ;;  %590 = vmatmul.mubr.f32.vlgmr.msra.gmra.mrb[0].mxu0 %v1509_v54  ;;  %v1524_v17 = vld [vmem:[%s3266_s1 + $0xf8] sm:$0xff] }
  0xce   : > { %v882_v63 = vsel %vm880_vm1, %v2103_v45, %v2104_v13  ;;  %2386 = vrot.lane.b32.xlu0 %v2737_v35, %s2417_s26  ;;  %1850 = vmatprep.subr.bf16.mxu0 %v1849_v21 }
  0xcf   : > { %v881_v23 = vsel %vm880_vm1, %v2098_v25, %v2099_v24  ;;  %v2112_v6 = vpop.permute.xlu1 %2111  ;;  %594 = vmatprep.mubr.f32.mxu0 %v1512_v34 }
  0xd0   : > { %v1851_v38 = vpack.c.bf16 %v882_v63, %v881_v23  ;;  %v2114_v18 = vunpack.i.h.bf16 %v2112_v6  ;;  %v2113_v61 = vunpack.i.l.bf16 %v2112_v6  ;;  %v2107_v14 = vpop.permute.xlu0 %2106  ;;  %v1523_v6 = vld [vmem:[%s3266_s1 + $0xf0] sm:$0xff] }
  0xd1   : > { %v2109_v20 = vunpack.i.h.bf16 %v2107_v14  ;;  %v2108_v35 = vunpack.i.l.bf16 %v2107_v14  ;;  %2401 = vrot.lane.b32.xlu1 %v2751_v19, %s2417_s26  ;;  %595 = vmatmul.mubr.f32.gmra.mrb[2].mxu0 %v1511_v1 }
  0xd2   : > { %2396 = vrot.lane.b32.xlu0 %v2753_v37, %s2417_s26  ;;  %1852 = vmatpush3.bf16.msra.mxu0 %v1851_v38  ;;  %v1221_v29 = vsel %vm1203_vm2, %v2113_v61, %v2114_v18  ;;  %v1526_v61 = vld [vmem:[%s3266_s1 + $0x108] sm:$0xff] }
  0xd3   : > { %v2122_v2 = vpop.permute.xlu1 %2121  ;;  %v1220_v8 = vsel %vm1203_vm2, %v2108_v35, %v2109_v20  ;;  %599 = vmatprep.mubr.f32.mxu0 %v1514_v32 }
  0xd4   : > { %v2124_v19 = vunpack.i.h.bf16 %v2122_v2  ;;  %v2123_v55 = vunpack.i.l.bf16 %v2122_v2  ;;  %v2117_v48 = vpop.permute.xlu0 %2116  ;;  %v1881_v52 = vpack.c.bf16 %v1221_v29, %v1220_v8  ;;  %v1381_v2 = vld [vmem:[%s3267_s2] sm:$0xff]  ;;  %v1382_v8 = vld [vmem:[%s3267_s2 + $0x8] sm:$0xff] }
  0xd5   : > { %v2119_v37 = vunpack.i.h.bf16 %v2117_v48  ;;  %v2118_v42 = vunpack.i.l.bf16 %v2117_v48  ;;  %600 = vmatmul.mubr.f32.gmra.mrb[4].mxu0 %v1513_v41  ;;  %v2418_v48 = vmov 0  }
  0xd6   : > { %v1205_v60 = vsel %vm1203_vm2, %v2123_v55, %v2124_v19  ;;  %1882 = vmatprep.subr.bf16.mxu1 %v1881_v52  ;;  %604 = vmatprep.mubr.f32.mxu0 %v1516_v51 }
  0xd7   : > { %v1204_v5 = vsel %vm1203_vm2, %v2118_v42, %v2119_v37  ;;  %v2132_v44 = vpop.permute.xlu1 %2131  ;;  %2405 = vset.pattern.permute.xlu0 %v2418_v48  ;;  %2406 = vset.pattern.permute.xlu1 %v2418_v48 }
  0xd8   : > { %v1883_v31 = vpack.c.bf16 %v1205_v60, %v1204_v5  ;;  %v2134_v15 = vunpack.i.h.bf16 %v2132_v44  ;;  %v2133_v33 = vunpack.i.l.bf16 %v2132_v44  ;;  %v2127_v11 = vpop.permute.xlu0 %2126  ;;  %1391 = vperm.xlu0 %2405, %v1381_v2   ;;  %1396 = vperm.xlu1 %2406, %v1382_v8   ;;  %v1383_v44 = vld [vmem:[%s3267_s2 + $0x10] sm:$0xff] }
  0xd9   : > { %v2129_v28 = vunpack.i.h.bf16 %v2127_v11  ;;  %v2128_v26 = vunpack.i.l.bf16 %v2127_v11  ;;  %605 = vmatmul.mubr.f32.gmra.mrb[6].mxu0 %v1515_v0 }
  0xda   : > { %1884 = vmatpush3.bf16.msra.mxu1 %v1883_v31  ;;  %v900_v58 = vsel %vm880_vm1, %v2133_v33, %v2134_v15  ;;  %609 = vmatprep.mubr.f32.mxu0 %v1518_v30  ;;  %v1384_v30 = vld [vmem:[%s3267_s2 + $0x18] sm:$0xff] }
  0xdb   : > { %v2142_v40 = vpop.permute.xlu1 %2141  ;;  %v899_v9 = vsel %vm880_vm1, %v2128_v26, %v2129_v28 }
  0xdc   : > { %v2144_v16 = vunpack.i.h.bf16 %v2142_v40  ;;  %v2143_v43 = vunpack.i.l.bf16 %v2142_v40  ;;  %v2137_v46 = vpop.permute.xlu0 %2136  ;;  %v1853_v47 = vpack.c.bf16 %v900_v58, %v899_v9  ;;  %1401 = vperm.xlu1 %2406, %v1383_v44   ;;  %1406 = vperm.xlu0 %2405, %v1384_v30   ;;  %v1385_v9 = vld [vmem:[%s3267_s2 + $0x20] sm:$0xff] }
  0xdd   : > { %v2139_v62 = vunpack.i.h.bf16 %v2137_v46  ;;  %v2138_v22 = vunpack.i.l.bf16 %v2137_v46  ;;  %610 = vmatmul.mubr.f32.gmra.mrb[8].mxu0 %v1517_v39 }
  0xde   : > { %v884_v12 = vsel %vm880_vm1, %v2143_v43, %v2144_v16  ;;  %1854 = vmatprep.subr.bf16.mxu0 %v1853_v47  ;;  %614 = vmatprep.mubr.f32.mxu0 %v1520_v36  ;;  %v1386_v36 = vld [vmem:[%s3267_s2 + $0x28] sm:$0xff] }
  0xdf   : > { %v883_v56 = vsel %vm880_vm1, %v2138_v22, %v2139_v62  ;;  %v2152_v53 = vpop.permute.xlu1 %2151 }
  0xe0   : > { %v1855_v59 = vpack.c.bf16 %v884_v12, %v883_v56  ;;  %v2154_v4 = vunpack.i.h.bf16 %v2152_v53  ;;  %v2153_v50 = vunpack.i.l.bf16 %v2152_v53  ;;  %v2147_v49 = vpop.permute.xlu0 %2146  ;;  %1411 = vperm.xlu1 %2406, %v1385_v9   ;;  %1416 = vperm.xlu0 %2405, %v1386_v36   ;;  %v1387_v53 = vld [vmem:[%s3267_s2 + $0x30] sm:$0xff] }
  0xe1   : > { %v2149_v54 = vunpack.i.h.bf16 %v2147_v49  ;;  %v2148_v3 = vunpack.i.l.bf16 %v2147_v49  ;;  %615 = vmatmul.mubr.f32.gmra.mrb[10].mxu0 %v1519_v27 }
  0xe2   : > { %1856 = vmatpush3.bf16.msra.mxu0 %v1855_v59  ;;  %v1223_v7 = vsel %vm1203_vm2, %v2153_v50, %v2154_v4  ;;  %619 = vmatprep.mubr.f32.mxu0 %v1522_v57  ;;  %v1388_v57 = vld [vmem:[%s3267_s2 + $0x38] sm:$0xff] }
  0xe3   : > { %v2162_v13 = vpop.permute.xlu1 %2161  ;;  %v1222_v45 = vsel %vm1203_vm2, %v2148_v3, %v2149_v54 }
  0xe4   : > { %v2164_v21 = vunpack.i.h.bf16 %v2162_v13  ;;  %v2163_v34 = vunpack.i.l.bf16 %v2162_v13  ;;  %v2157_v24 = vpop.permute.xlu0 %2156  ;;  %v1885_v25 = vpack.c.bf16 %v1223_v7, %v1222_v45  ;;  %1421 = vperm.xlu1 %2406, %v1387_v53   ;;  %1426 = vperm.xlu0 %2405, %v1388_v57  }
  0xe5   : > { %v2159_v63 = vunpack.i.h.bf16 %v2157_v24  ;;  %v2158_v1 = vunpack.i.l.bf16 %v2157_v24  ;;  %620 = vmatmul.mubr.f32.gmra.mrb[12].mxu0 %v1521_v10 }
  0xe6   : > { %v1207_v23 = vsel %vm1203_vm2, %v2163_v34, %v2164_v21  ;;  %1886 = vmatprep.subr.bf16.mxu1 %v1885_v25  ;;  %624 = vmatprep.mubr.f32.mxu0 %v1524_v17 }
  0xe7   : > { %v1206_v38 = vsel %vm1203_vm2, %v2158_v1, %v2159_v63  ;;  %v2172_v18 = vpop.permute.xlu1 %2171 }
  0xe8   : > { %v1887_v14 = vpack.c.bf16 %v1207_v23, %v1206_v38  ;;  %v2174_v32 = vunpack.i.h.bf16 %v2172_v18  ;;  %v2173_v20 = vunpack.i.l.bf16 %v2172_v18  ;;  %v2167_v35 = vpop.permute.xlu0 %2166 }
  0xe9   : > { %v2169_v29 = vunpack.i.h.bf16 %v2167_v35  ;;  %v2168_v41 = vunpack.i.l.bf16 %v2167_v35  ;;  %625 = vmatmul.mubr.f32.gmra.mrb[14].mxu0 %v1523_v6 }
  0xea   : > { %1888 = vmatpush3.bf16.msra.mxu1 %v1887_v14  ;;  %v902_v51 = vsel %vm880_vm1, %v2173_v20, %v2174_v32  ;;  %1009 = vmatprep.mubr.f32.mxu0 %v1526_v61 }
  0xeb   : > { %v2182_v19 = vpop.permute.xlu1 %2181  ;;  %v901_v55 = vsel %vm880_vm1, %v2168_v41, %v2169_v29 }
  0xec   : > { %v2184_v52 = vunpack.i.h.bf16 %v2182_v19  ;;  %v2183_v37 = vunpack.i.l.bf16 %v2182_v19  ;;  %v2177_v42 = vpop.permute.xlu0 %2176  ;;  %v1857_v60 = vpack.c.bf16 %v902_v51, %v901_v55 }
  0xed   : > { %v2179_v0 = vunpack.i.h.bf16 %v2177_v42  ;;  %v2178_v5 = vunpack.i.l.bf16 %v2177_v42 }
  0xee   : > { %v886_v31 = vsel %vm880_vm1, %v2183_v37, %v2184_v52  ;;  %1858 = vmatprep.subr.bf16.mxu0 %v1857_v60 }
  0xef   : > { %v885_v15 = vsel %vm880_vm1, %v2178_v5, %v2179_v0  ;;  %v2192_v33 = vpop.permute.xlu1 %2191 }
  0xf0   : > { %v1859_v11 = vpack.c.bf16 %v886_v31, %v885_v15  ;;  %v2194_v28 = vunpack.i.h.bf16 %v2192_v33  ;;  %v2193_v26 = vunpack.i.l.bf16 %v2192_v33  ;;  %v2187_v58 = vpop.permute.xlu0 %2186 }
  0xf1   : > { %v2189_v39 = vunpack.i.h.bf16 %v2187_v58  ;;  %v2188_v40 = vunpack.i.l.bf16 %v2187_v58 }
  0xf2   : > { %1860 = vmatpush3.bf16.msra.mxu0 %v1859_v11  ;;  %v1225_v16 = vsel %vm1203_vm2, %v2193_v26, %v2194_v28 }
  0xf3   : > { %v2202_v43 = vpop.permute.xlu1 %2201  ;;  %v1224_v46 = vsel %vm1203_vm2, %v2188_v40, %v2189_v39 }
  0xf4   : > { %v2204_v47 = vunpack.i.h.bf16 %v2202_v43  ;;  %v2203_v62 = vunpack.i.l.bf16 %v2202_v43  ;;  %v2197_v22 = vpop.permute.xlu0 %2196  ;;  %v1889_v12 = vpack.c.bf16 %v1225_v16, %v1224_v46 }
  0xf5   : > { %v2199_v27 = vunpack.i.h.bf16 %v2197_v22  ;;  %v2198_v56 = vunpack.i.l.bf16 %v2197_v22 }
  0xf6   : > { %v1209_v59 = vsel %vm1203_vm2, %v2203_v62, %v2204_v47  ;;  %1890 = vmatprep.subr.bf16.mxu1 %v1889_v12 }
  0xf7   : > { %v1208_v4 = vsel %vm1203_vm2, %v2198_v56, %v2199_v27  ;;  %v2212_v50 = vpop.permute.xlu1 %2211 }
  0xf8   : > { %v1891_v49 = vpack.c.bf16 %v1209_v59, %v1208_v4  ;;  %v2214_v54 = vunpack.i.h.bf16 %v2212_v50  ;;  %v2213_v3 = vunpack.i.l.bf16 %v2212_v50  ;;  %v2207_v7 = vpop.permute.xlu0 %2206 }
  0xf9   : > { %v2209_v10 = vunpack.i.h.bf16 %v2207_v7  ;;  %v2208_v13 = vunpack.i.l.bf16 %v2207_v7 }
  0xfa   : > { %1892 = vmatpush3.bf16.msra.mxu1 %v1891_v49  ;;  %v904_v45 = vsel %vm880_vm1, %v2213_v3, %v2214_v54 }
  0xfb   : > { %v2222_v17 = vpop.permute.xlu1 %2221  ;;  %v903_v21 = vsel %vm880_vm1, %v2208_v13, %v2209_v10 }
  0xfc   : > { %v2224_v34 = vunpack.i.h.bf16 %v2222_v17  ;;  %v2223_v24 = vunpack.i.l.bf16 %v2222_v17  ;;  %v2217_v25 = vpop.permute.xlu0 %2216  ;;  %v1861_v63 = vpack.c.bf16 %v904_v45, %v903_v21 }
  0xfd   : > { %v2219_v1 = vunpack.i.h.bf16 %v2217_v25  ;;  %v2218_v23 = vunpack.i.l.bf16 %v2217_v25 }
  0xfe   : > { %v888_v6 = vsel %vm880_vm1, %v2223_v24, %v2224_v34  ;;  %1862 = vmatprep.subr.bf16.mxu0 %v1861_v63 }
  0xff   : > { %v887_v38 = vsel %vm880_vm1, %v2218_v23, %v2219_v1  ;;  %v2232_v18 = vpop.permute.xlu1 %2231 }
 0x100   : > { %v1863_v61 = vpack.c.bf16 %v888_v6, %v887_v38  ;;  %v2234_v14 = vunpack.i.h.bf16 %v2232_v18  ;;  %v2233_v32 = vunpack.i.l.bf16 %v2232_v18  ;;  %v2227_v20 = vpop.permute.xlu0 %2226 }
 0x101   : > { %v2229_v35 = vunpack.i.h.bf16 %v2227_v20  ;;  %v2228_v29 = vunpack.i.l.bf16 %v2227_v20 }
 0x102   : > { %1864 = vmatpush3.bf16.msra.mxu0 %v1863_v61  ;;  %v1227_v41 = vsel %vm1203_vm2, %v2233_v32, %v2234_v14 }
 0x103   : > { %v2242_v2 = vpop.permute.xlu1 %2241  ;;  %v1226_v8 = vsel %vm1203_vm2, %v2228_v29, %v2229_v35 }
 0x104   : > { %v2244_v51 = vunpack.i.h.bf16 %v2242_v2  ;;  %v2243_v19 = vunpack.i.l.bf16 %v2242_v2  ;;  %v2237_v55 = vpop.permute.xlu0 %2236  ;;  %v1893_v48 = vpack.c.bf16 %v1227_v41, %v1226_v8 }
 0x105   : > { %v2239_v52 = vunpack.i.h.bf16 %v2237_v55  ;;  %v2238_v37 = vunpack.i.l.bf16 %v2237_v55 }
 0x106   : > { %v1211_v42 = vsel %vm1203_vm2, %v2243_v19, %v2244_v51  ;;  %1894 = vmatprep.subr.bf16.mxu1 %v1893_v48 }
 0x107   : > { %v1210_v60 = vsel %vm1203_vm2, %v2238_v37, %v2239_v52  ;;  %v2252_v0 = vpop.permute.xlu1 %2251 }
 0x108   : > { %v1895_v5 = vpack.c.bf16 %v1211_v42, %v1210_v60  ;;  %v2254_v44 = vunpack.i.h.bf16 %v2252_v0  ;;  %v2253_v30 = vunpack.i.l.bf16 %v2252_v0  ;;  %v2247_v31 = vpop.permute.xlu0 %2246 }
 0x109   : > { %v2249_v15 = vunpack.i.h.bf16 %v2247_v31  ;;  %v2248_v33 = vunpack.i.l.bf16 %v2247_v31 }
 0x10a   : > { %1896 = vmatpush3.bf16.msra.mxu1 %v1895_v5  ;;  %v906_v11 = vsel %vm880_vm1, %v2253_v30, %v2254_v44 }
 0x10b   : > { %v2262_v28 = vpop.permute.xlu1 %2261  ;;  %v905_v26 = vsel %vm880_vm1, %v2248_v33, %v2249_v15 }
 0x10c   : > { %v2264_v58 = vunpack.i.h.bf16 %v2262_v28  ;;  %v2263_v39 = vunpack.i.l.bf16 %v2262_v28  ;;  %v2257_v40 = vpop.permute.xlu0 %2256  ;;  %v1865_v9 = vpack.c.bf16 %v906_v11, %v905_v26 }
 0x10d   : > { %v2259_v36 = vunpack.i.h.bf16 %v2257_v40  ;;  %v2258_v16 = vunpack.i.l.bf16 %v2257_v40 }
 0x10e   : > { %v890_v43 = vsel %vm880_vm1, %v2263_v39, %v2264_v58  ;;  %1866 = vmatprep.subr.bf16.mxu0 %v1865_v9 }
 0x10f   : > { %v889_v46 = vsel %vm880_vm1, %v2258_v16, %v2259_v36  ;;  %v2272_v47 = vpop.permute.xlu1 %2271 }
 0x110   : > { %v1867_v62 = vpack.c.bf16 %v890_v43, %v889_v46  ;;  %v2274_v22 = vunpack.i.h.bf16 %v2272_v47  ;;  %v2273_v12 = vunpack.i.l.bf16 %v2272_v47  ;;  %v2267_v27 = vpop.permute.xlu0 %2266 }
 0x111   : > { %v2269_v56 = vunpack.i.h.bf16 %v2267_v27  ;;  %v2268_v53 = vunpack.i.l.bf16 %v2267_v27 }
 0x112   : > { %1868 = vmatpush3.bf16.msra.mxu0 %v1867_v62  ;;  %v1229_v57 = vsel %vm1203_vm2, %v2273_v12, %v2274_v22 }
 0x113   : > { %v2282_v59 = vpop.permute.xlu1 %2281  ;;  %v1228_v4 = vsel %vm1203_vm2, %v2268_v53, %v2269_v56 }
 0x114   : > { %v2284_v50 = vunpack.i.h.bf16 %v2282_v59  ;;  %v2283_v49 = vunpack.i.l.bf16 %v2282_v59  ;;  %v2277_v54 = vpop.permute.xlu0 %2276  ;;  %v1897_v3 = vpack.c.bf16 %v1229_v57, %v1228_v4 }
 0x115   : > { %v2279_v7 = vunpack.i.h.bf16 %v2277_v54  ;;  %v2278_v10 = vunpack.i.l.bf16 %v2277_v54 }
 0x116   : > { %v1213_v13 = vsel %vm1203_vm2, %v2283_v49, %v2284_v50  ;;  %1898 = vmatprep.subr.bf16.mxu1 %v1897_v3 }
 0x117   : > { %v1212_v45 = vsel %vm1203_vm2, %v2278_v10, %v2279_v7  ;;  %v2292_v17 = vpop.permute.xlu1 %2291 }
 0x118   : > { %v1899_v21 = vpack.c.bf16 %v1213_v13, %v1212_v45  ;;  %v2294_v34 = vunpack.i.h.bf16 %v2292_v17  ;;  %v2293_v24 = vunpack.i.l.bf16 %v2292_v17  ;;  %v2287_v25 = vpop.permute.xlu0 %2286 }
 0x119   : > { %v2289_v63 = vunpack.i.h.bf16 %v2287_v25  ;;  %v2288_v1 = vunpack.i.l.bf16 %v2287_v25 }
 0x11a   : > { %1900 = vmatpush3.bf16.msra.mxu1 %v1899_v21  ;;  %v908_v23 = vsel %vm880_vm1, %v2293_v24, %v2294_v34 }
 0x11b   : > { %v2302_v6 = vpop.permute.xlu1 %2301  ;;  %v907_v38 = vsel %vm880_vm1, %v2288_v1, %v2289_v63 }
 0x11c   : > { %v2304_v18 = vunpack.i.h.bf16 %v2302_v6  ;;  %v2303_v61 = vunpack.i.l.bf16 %v2302_v6  ;;  %v2297_v14 = vpop.permute.xlu0 %2296  ;;  %v1869_v32 = vpack.c.bf16 %v908_v23, %v907_v38 }
 0x11d   : > { %v2299_v20 = vunpack.i.h.bf16 %v2297_v14  ;;  %v2298_v35 = vunpack.i.l.bf16 %v2297_v14 }
 0x11e   : > { %v892_v29 = vsel %vm880_vm1, %v2303_v61, %v2304_v18  ;;  %1870 = vmatprep.subr.bf16.mxu0 %v1869_v32 }
 0x11f   : > { %v891_v41 = vsel %vm880_vm1, %v2298_v35, %v2299_v20  ;;  %v2312_v2 = vpop.permute.xlu1 %2311 }
 0x120   : > { %v1871_v8 = vpack.c.bf16 %v892_v29, %v891_v41  ;;  %v2314_v51 = vunpack.i.h.bf16 %v2312_v2  ;;  %v2313_v19 = vunpack.i.l.bf16 %v2312_v2  ;;  %v2307_v55 = vpop.permute.xlu0 %2306 }
 0x121   : > { %v2309_v48 = vunpack.i.h.bf16 %v2307_v55  ;;  %v2308_v52 = vunpack.i.l.bf16 %v2307_v55 }
 0x122   : > { %1872 = vmatpush3.bf16.msra.mxu0 %v1871_v8  ;;  %v1231_v37 = vsel %vm1203_vm2, %v2313_v19, %v2314_v51 }
 0x123   : > { %v2322_v42 = vpop.permute.xlu1 %2321  ;;  %v1230_v60 = vsel %vm1203_vm2, %v2308_v52, %v2309_v48 }
 0x124   : > { %v2324_v0 = vunpack.i.h.bf16 %v2322_v42  ;;  %v2323_v5 = vunpack.i.l.bf16 %v2322_v42  ;;  %v2317_v44 = vpop.permute.xlu0 %2316  ;;  %v1901_v30 = vpack.c.bf16 %v1231_v37, %v1230_v60 }
 0x125   : > { %v2319_v31 = vunpack.i.h.bf16 %v2317_v44  ;;  %v2318_v15 = vunpack.i.l.bf16 %v2317_v44 }
 0x126   : > { %v1215_v33 = vsel %vm1203_vm2, %v2323_v5, %v2324_v0  ;;  %1902 = vmatprep.subr.bf16.mxu1 %v1901_v30 }
 0x127   : > { %v1214_v11 = vsel %vm1203_vm2, %v2318_v15, %v2319_v31  ;;  %v2332_v28 = vpop.permute.xlu1 %2331 }
 0x128   : > { %v1903_v26 = vpack.c.bf16 %v1215_v33, %v1214_v11  ;;  %v2334_v58 = vunpack.i.h.bf16 %v2332_v28  ;;  %v2333_v39 = vunpack.i.l.bf16 %v2332_v28  ;;  %v2327_v40 = vpop.permute.xlu0 %2326  ;;  %v1525_v28 = vld [vmem:[%s3266_s1 + $0x100] sm:$0xff] }
 0x129   : > { %v2329_v9 = vunpack.i.h.bf16 %v2327_v40  ;;  %v2328_v36 = vunpack.i.l.bf16 %v2327_v40  ;;  %v1649_v53 = vpop.f32.mrb[0].mxu1  ;;  %v1528_v40 = vld [vmem:[%s3266_s1 + $0x118] sm:$0xff] }
 0x12a   : > { %1904 = vmatpush3.bf16.msra.mxu1 %v1903_v26  ;;  %v910_v16 = vsel %vm880_vm1, %v2333_v39, %v2334_v58  ;;  %v1650_v59 = vpop.f32.mrb[1].mxu1 }
 0x12b   : > { %v2342_v43 = vpop.permute.xlu1 %2341  ;;  %v909_v46 = vsel %vm880_vm1, %v2328_v36, %v2329_v9  ;;  %v3137_v49 = vadd.f32 %v1650_v59, %v1649_v53  ;;  %v1529_v53 = vld [vmem:[%s3266_s1 + $0x120] sm:$0xff]  ;;  %v1532_v59 = vld [vmem:[%s3266_s1 + $0x138] sm:$0xff] }
 0x12c   : > { %v2344_v47 = vunpack.i.h.bf16 %v2342_v43  ;;  %v2343_v62 = vunpack.i.l.bf16 %v2342_v43  ;;  %v2337_v22 = vpop.permute.xlu0 %2336  ;;  %v1873_v12 = vpack.c.bf16 %v910_v16, %v909_v46 }
 0x12d   : > { %v2339_v27 = vunpack.i.h.bf16 %v2337_v22  ;;  %v2338_v56 = vunpack.i.l.bf16 %v2337_v22  ;;  %v1527_v22 = vld [vmem:[%s3266_s1 + $0x110] sm:$0xff] }
 0x12e   : > { %v894_v57 = vsel %vm880_vm1, %v2343_v62, %v2344_v47  ;;  %1874 = vmatprep.subr.bf16.mxu0 %v1873_v12 }
 0x12f   : > { %v893_v4 = vsel %vm880_vm1, %v2338_v56, %v2339_v27  ;;  %v2352_v50 = vpop.permute.xlu1 %2351  ;;  %v1530_v27 = vld [vmem:[%s3266_s1 + $0x128] sm:$0xff] }
 0x130   : > { %v1875_v54 = vpack.c.bf16 %v894_v57, %v893_v4  ;;  %v2354_v3 = vunpack.i.h.bf16 %v2352_v50  ;;  %v2353_v7 = vunpack.i.l.bf16 %v2352_v50  ;;  %v2347_v10 = vpop.permute.xlu0 %2346  ;;  %v1541_v57 = vld [vmem:[%s3266_s1 + $0x180] sm:$0xff]  ;;  %v1544_v4 = vld [vmem:[%s3266_s1 + $0x198] sm:$0xff]  ;;  %v1531_v50 = vld [vmem:[%s3266_s1 + $0x130] sm:$0xff] }
 0x131   : > { %v2349_v13 = vunpack.i.h.bf16 %v2347_v10  ;;  %v2348_v45 = vunpack.i.l.bf16 %v2347_v10  ;;  %v1533_v10 = vld [vmem:[%s3266_s1 + $0x140] sm:$0xff] }
 0x132   : > { %1876 = vmatpush3.bf16.msra.mxu0 %v1875_v54  ;;  %v1233_v17 = vsel %vm1203_vm2, %v2353_v7, %v2354_v3  ;;  %v1543_v54 = vld [vmem:[%s3266_s1 + $0x190] sm:$0xff]  ;;  %v1534_v3 = vld [vmem:[%s3266_s1 + $0x148] sm:$0xff] }
 0x133   : > { %v2362_v21 = vpop.permute.xlu1 %2361  ;;  %v1232_v34 = vsel %vm1203_vm2, %v2348_v45, %v2349_v13  ;;  %v1546_v7 = vld [vmem:[%s3266_s1 + $0x1a8] sm:$0xff]  ;;  %v1545_v13 = vld [vmem:[%s3266_s1 + $0x1a0] sm:$0xff]  ;;  %v1536_v45 = vld [vmem:[%s3266_s1 + $0x158] sm:$0xff] }
 0x134   : > { %v2364_v24 = vunpack.i.h.bf16 %v2362_v21  ;;  %v2363_v25 = vunpack.i.l.bf16 %v2362_v21  ;;  %v2357_v63 = vpop.permute.xlu0 %2356  ;;  %v1905_v1 = vpack.c.bf16 %v1233_v17, %v1232_v34  ;;  %v1548_v17 = vld [vmem:[%s3266_s1 + $0x1b8] sm:$0xff]  ;;  %v1535_v21 = vld [vmem:[%s3266_s1 + $0x150] sm:$0xff] }
 0x135   : > { %v2359_v23 = vunpack.i.h.bf16 %v2357_v63  ;;  %v2358_v6 = vunpack.i.l.bf16 %v2357_v63  ;;  %v1547_v34 = vld [vmem:[%s3266_s1 + $0x1b0] sm:$0xff]  ;;  %v1537_v63 = vld [vmem:[%s3266_s1 + $0x160] sm:$0xff] }
 0x136   : > { %v1217_v38 = vsel %vm1203_vm2, %v2363_v25, %v2364_v24  ;;  %1906 = vmatprep.subr.bf16.mxu1 %v1905_v1  ;;  %v1538_v24 = vld [vmem:[%s3266_s1 + $0x168] sm:$0xff]  ;;  %v1549_v1 = vld [vmem:[%s3266_s1 + $0x1c0] sm:$0xff] }
 0x137   : > { %v1216_v18 = vsel %vm1203_vm2, %v2358_v6, %v2359_v23  ;;  %v2372_v61 = vpop.permute.xlu1 %2371  ;;  %v1550_v25 = vld [vmem:[%s3266_s1 + $0x1c8] sm:$0xff]  ;;  %v1540_v23 = vld [vmem:[%s3266_s1 + $0x178] sm:$0xff] }
 0x138   : > { %v1907_v14 = vpack.c.bf16 %v1217_v38, %v1216_v18  ;;  %v2374_v32 = vunpack.i.h.bf16 %v2372_v61  ;;  %v2373_v20 = vunpack.i.l.bf16 %v2372_v61  ;;  %v2367_v35 = vpop.permute.xlu0 %2366  ;;  %v1552_v6 = vld [vmem:[%s3266_s1 + $0x1d8] sm:$0xff]  ;;  %v1539_v38 = vld [vmem:[%s3266_s1 + $0x170] sm:$0xff]  ;;  %v1554_v61 = vld [vmem:[%s3266_s1 + $0x1e8] sm:$0xff] }
 0x139   : > { %v2369_v29 = vunpack.i.h.bf16 %v2367_v35  ;;  %v2368_v41 = vunpack.i.l.bf16 %v2367_v35  ;;  %v1551_v18 = vld [vmem:[%s3266_s1 + $0x1d0] sm:$0xff] }
 0x13a   : > { %1908 = vmatpush3.bf16.msra.mxu1 %v1907_v14  ;;  %v912_v2 = vsel %vm880_vm1, %v2373_v20, %v2374_v32  ;;  %v1553_v14 = vld [vmem:[%s3266_s1 + $0x1e0] sm:$0xff]  ;;  %v1556_v32 = vld [vmem:[%s3266_s1 + $0x1f8] sm:$0xff]  ;;  %v1555_v20 = vld [vmem:[%s3266_s1 + $0x1f0] sm:$0xff] }
 0x13b   : > { %v2382_v8 = vpop.permute.xlu1 %2381  ;;  %v911_v51 = vsel %vm880_vm1, %v2368_v41, %v2369_v29 }
 0x13c   : > { %v2384_v19 = vunpack.i.h.bf16 %v2382_v8  ;;  %v2383_v55 = vunpack.i.l.bf16 %v2382_v8  ;;  %v2377_v48 = vpop.permute.xlu0 %2376  ;;  %v1877_v52 = vpack.c.bf16 %v912_v2, %v911_v51 }
 0x13d   : > { %v2379_v37 = vunpack.i.h.bf16 %v2377_v48  ;;  %v2378_v42 = vunpack.i.l.bf16 %v2377_v48 }
 0x13e   : > { %v896_v60 = vsel %vm880_vm1, %v2383_v55, %v2384_v19  ;;  %1878 = vmatprep.subr.bf16.mxu0 %v1877_v52 }
 0x13f   : > { %v895_v0 = vsel %vm880_vm1, %v2378_v42, %v2379_v37  ;;  %v2392_v5 = vpop.permute.xlu1 %2391 }
 0x140   : > { %v1879_v44 = vpack.c.bf16 %v896_v60, %v895_v0  ;;  %v2394_v30 = vunpack.i.h.bf16 %v2392_v5  ;;  %v2393_v31 = vunpack.i.l.bf16 %v2392_v5  ;;  %v2387_v15 = vpop.permute.xlu0 %2386 }
 0x141   : > { %v2389_v33 = vunpack.i.h.bf16 %v2387_v15  ;;  %v2388_v11 = vunpack.i.l.bf16 %v2387_v15 }
 0x142   : > { %1880 = vmatpush3.bf16.msra.mxu0 %v1879_v44  ;;  %v1235_v26 = vsel %vm1203_vm2, %v2393_v31, %v2394_v30 }
 0x143   : > { %v2402_v58 = vpop.permute.xlu1 %2401  ;;  %v1234_v39 = vsel %vm1203_vm2, %v2388_v11, %v2389_v33 }
 0x144   : > { %v2404_v9 = vunpack.i.h.bf16 %v2402_v58  ;;  %v2403_v36 = vunpack.i.l.bf16 %v2402_v58  ;;  %v2397_v16 = vpop.permute.xlu0 %2396  ;;  %v1909_v43 = vpack.c.bf16 %v1235_v26, %v1234_v39 }
 0x145   : > { %v2399_v46 = vunpack.i.h.bf16 %v2397_v16  ;;  %v2398_v47 = vunpack.i.l.bf16 %v2397_v16  ;;  %1010 = vmatmul.mubr.f32.vlgmr.msra.gmra.mrb[16].mxu0 %v1525_v28 }
 0x146   : > { %v1219_v62 = vsel %vm1203_vm2, %v2403_v36, %v2404_v9  ;;  %1910 = vmatprep.subr.bf16.mxu1 %v1909_v43  ;;  %1014 = vmatprep.mubr.f32.mxu0 %v1528_v40 }
 0x147   : > { %v1218_v12 = vsel %vm1203_vm2, %v2398_v47, %v2399_v46 }
 0x148   : > { %v1911_v56 = vpack.c.bf16 %v1219_v62, %v1218_v12 }
 0x149   : > { %1015 = vmatmul.mubr.f32.gmra.mrb[18].mxu0 %v1527_v22 }
 0x14a   : > { %1912 = vmatpush3.bf16.msra.mxu1 %v1911_v56  ;;  %1019 = vmatprep.mubr.f32.mxu0 %v1530_v27 }
 0x14d   : > { %1020 = vmatmul.mubr.f32.gmra.mrb[20].mxu0 %v1529_v53  ;;  %1333 = vmatmul.mubr.f32.vlgmr.msra.gmra.mrb[16].mxu1 %v1541_v57 }
 0x14e   : > { %1024 = vmatprep.mubr.f32.mxu0 %v1532_v59  ;;  %1337 = vmatprep.mubr.f32.mxu1 %v1544_v4 }
 0x151   : > { %1025 = vmatmul.mubr.f32.gmra.mrb[22].mxu0 %v1531_v50  ;;  %1338 = vmatmul.mubr.f32.gmra.mrb[18].mxu1 %v1543_v54 }
 0x152   : > { %1029 = vmatprep.mubr.f32.mxu0 %v1534_v3  ;;  %1342 = vmatprep.mubr.f32.mxu1 %v1546_v7 }
 0x155   : > { %1030 = vmatmul.mubr.f32.gmra.mrb[24].mxu0 %v1533_v10  ;;  %1343 = vmatmul.mubr.f32.gmra.mrb[20].mxu1 %v1545_v13 }
 0x156   : > { %1034 = vmatprep.mubr.f32.mxu0 %v1536_v45  ;;  %1347 = vmatprep.mubr.f32.mxu1 %v1548_v17 }
 0x159   : > { %1035 = vmatmul.mubr.f32.gmra.mrb[26].mxu0 %v1535_v21  ;;  %1348 = vmatmul.mubr.f32.gmra.mrb[22].mxu1 %v1547_v34 }
 0x15a   : > { %1039 = vmatprep.mubr.f32.mxu0 %v1538_v24  ;;  %1352 = vmatprep.mubr.f32.mxu1 %v1550_v25 }
 0x15d   : > { %1040 = vmatmul.mubr.f32.gmra.mrb[28].mxu0 %v1537_v63  ;;  %1353 = vmatmul.mubr.f32.gmra.mrb[24].mxu1 %v1549_v1 }
 0x15e   : > { %1044 = vmatprep.mubr.f32.mxu0 %v1540_v23  ;;  %1357 = vmatprep.mubr.f32.mxu1 %v1552_v6 }
 0x161   : > { %1045 = vmatmul.mubr.f32.gmra.mrb[30].mxu0 %v1539_v38  ;;  %1358 = vmatmul.mubr.f32.gmra.mrb[26].mxu1 %v1551_v18 }
 0x162   : > { %1362 = vmatprep.mubr.f32.mxu1 %v1554_v61 }
 0x165   : > { %1363 = vmatmul.mubr.f32.gmra.mrb[28].mxu1 %v1553_v14 }
 0x166   : > { %1367 = vmatprep.mubr.f32.mxu1 %v1556_v32 }
 0x169   : > { %1368 = vmatmul.mubr.f32.gmra.mrb[30].mxu1 %v1555_v20 }
 0x178   : > { %v1652_v35 = vpop.f32.mrb[2].mxu1 }
 0x179   : > { %v1653_v29 = vpop.f32.mrb[3].mxu1 }
 0x17a   : > { %v1654_v41 = vadd.f32 %v1653_v29, %v1652_v35 }
 0x17c   : > { %v1655_v2 = vpop.f32.mrb[4].mxu1 }
 0x17d   : > { %v1656_v8 = vpop.f32.mrb[5].mxu1 }
 0x17e   : > { %v1657_v51 = vadd.f32 %v1656_v8, %v1655_v2  ;;  %v1392_v2 = vpop.permute.xlu0 %1391  ;;  %v1397_v8 = vpop.permute.xlu1 %1396 }
 0x180   : > { %v1658_v19 = vpop.f32.mrb[6].mxu1 }
 0x181   : > { %v1659_v55 = vpop.f32.mrb[7].mxu1 }
 0x182   : > { %v1660_v48 = vadd.f32 %v1659_v55, %v1658_v19 }
 0x184   : > { %v1661_v52 = vpop.f32.mrb[8].mxu1 }
 0x185   : > { %v1662_v37 = vpop.f32.mrb[9].mxu1 }
 0x186   : > { %v1663_v42 = vadd.f32 %v1662_v37, %v1661_v52 }
 0x188   : > { %v1664_v60 = vpop.f32.mrb[10].mxu1 }
 0x189   : > { %v1665_v0 = vpop.f32.mrb[11].mxu1 }
 0x18a   : > { %v1666_v5 = vadd.f32 %v1665_v0, %v1664_v60 }
 0x193   : > { %v1667_v44 = vpop.f32.mrb[12].mxu1 }
 0x194   : > { %v1668_v30 = vpop.f32.mrb[13].mxu1 }
 0x195   : > { %v1669_v31 = vadd.f32 %v1668_v30, %v1667_v44 }
 0x197   : > { %v1670_v15 = vpop.f32.mrb[14].mxu1 }
 0x198   : > { %v1671_v33 = vpop.f32.mrb[15].mxu1 }
 0x199   : > { %v1672_v11 = vadd.f32 %v1671_v33, %v1670_v15 }
 0x1a0   : > { %v1593_v28 = vpop.f32.mrb[0].mxu0 }
 0x1a1   : > { %v1594_v26 = vpop.f32.mrb[1].mxu0 }
 0x1a2   : > { %v1595_v58 = vadd.f32 %v1594_v26, %v1593_v28 }
 0x1a4   : > { %v697_v39 = vadd.f32 %v3137_v49, %v1595_v58  ;;  %v1596_v40 = vpop.f32.mrb[2].mxu0  ;;  %v1402_v58 = vpop.permute.xlu1 %1401 }
 0x1a5   : > { %v1597_v9 = vpop.f32.mrb[3].mxu0 }
 0x1a6   : > { %v1598_v36 = vadd.f32 %v1597_v9, %v1596_v40 }
 0x1a8   : > { %v702_v16 = vadd.f32 %v1654_v41, %v1598_v36  ;;  %v1599_v43 = vpop.f32.mrb[4].mxu0 }
 0x1a9   : > { %v1600_v46 = vpop.f32.mrb[5].mxu0 }
 0x1aa   : > { %v1601_v47 = vadd.f32 %v1600_v46, %v1599_v43 }
 0x1ac   : > { %v707_v62 = vadd.f32 %v1657_v51, %v1601_v47  ;;  %v1602_v22 = vpop.f32.mrb[6].mxu0 }
 0x1ad   : > { %v1603_v12 = vpop.f32.mrb[7].mxu0 }
 0x1ae   : > { %v1604_v27 = vadd.f32 %v1603_v12, %v1602_v22  ;;  %v1407_v22 = vpop.permute.xlu0 %1406 }
 0x1b0   : > { %v712_v56 = vadd.f32 %v1660_v48, %v1604_v27  ;;  %v1605_v53 = vpop.f32.mrb[8].mxu0 }
 0x1b1   : > { %v1606_v57 = vpop.f32.mrb[9].mxu0 }
 0x1b2   : > { %v1607_v59 = vadd.f32 %v1606_v57, %v1605_v53 }
 0x1b4   : > { %v717_v4 = vadd.f32 %v1663_v42, %v1607_v59  ;;  %v1608_v50 = vpop.f32.mrb[10].mxu0 }
 0x1b5   : > { %v1609_v54 = vpop.f32.mrb[11].mxu0 }
 0x1b6   : > { %v1610_v3 = vadd.f32 %v1609_v54, %v1608_v50 }
 0x1b8   : > { %v722_v49 = vadd.f32 %v1666_v5, %v1610_v3  ;;  %v1611_v7 = vpop.f32.mrb[12].mxu0  ;;  %v1412_v3 = vpop.permute.xlu1 %1411 }
 0x1b9   : > { %v1612_v10 = vpop.f32.mrb[13].mxu0 }
 0x1ba   : > { %v1613_v13 = vadd.f32 %v1612_v10, %v1611_v7 }
 0x1bc   : > { %v1614_v45 = vpop.f32.mrb[14].mxu0  ;;  %v3242_v17 = vadd.f32 %v1669_v31, %v1613_v13 }
 0x1bd   : > { %v1615_v21 = vpop.f32.mrb[15].mxu0 }
 0x1be   : > { %v1616_v34 = vadd.f32 %v1615_v21, %v1614_v45 }
 0x1c0   : > { %v3244_v24 = vadd.f32 %v1672_v11, %v1616_v34 }
 0x218   : > { %v1705_v25 = vpop.f32.mrb[16].mxu0 }
 0x219   : > { %v1706_v63 = vpop.f32.mrb[17].mxu0 }
 0x21a   : > { %v1707_v1 = vadd.f32 %v1706_v63, %v1705_v25 }
 0x21c   : > { %v1050_v23 = vadd.f32 %v1707_v1, %v697_v39  ;;  %v1708_v6 = vpop.f32.mrb[18].mxu0 }
 0x21d   : > { %v1709_v38 = vpop.f32.mrb[19].mxu0 }
 0x21e   : > { %v1710_v18 = vadd.f32 %v1709_v38, %v1708_v6  ;;  %v1417_v38 = vpop.permute.xlu0 %1416 }
 0x220   : > { %v1051_v61 = vadd.f32 %v1710_v18, %v702_v16  ;;  %v1711_v14 = vpop.f32.mrb[20].mxu0  ;;  %v1761_v32 = vpop.f32.mrb[16].mxu1 }
 0x221   : > { %v1712_v20 = vpop.f32.mrb[21].mxu0  ;;  %v1762_v35 = vpop.f32.mrb[17].mxu1 }
 0x222   : > { %v1713_v29 = vadd.f32 %v1712_v20, %v1711_v14  ;;  %v1763_v41 = vadd.f32 %v1762_v35, %v1761_v32  ;;  %v1422_v20 = vpop.permute.xlu1 %1421 }
 0x224   : > { %v1052_v51 = vadd.f32 %v1713_v29, %v707_v62  ;;  %v1714_v19 = vpop.f32.mrb[22].mxu0  ;;  %v1764_v55 = vpop.f32.mrb[18].mxu1  ;;  %v1373_v48 = vadd.f32 %v1763_v41, %v1050_v23 }
 0x225   : > { %v1715_v52 = vpop.f32.mrb[23].mxu0  ;;  %v1765_v37 = vpop.f32.mrb[19].mxu1 }
 0x226   : > { %v1429_v42 = vadd.f32 %v1392_v2, %v1373_v48  ;;  %v1716_v60 = vadd.f32 %v1715_v52, %v1714_v19  ;;  %v1766_v0 = vadd.f32 %v1765_v37, %v1764_v55 }
 0x228   : > { %1437 = vst [vmem:[%s3250_s19] sm:$0xff] %v1429_v42  ;;  %v1053_v5 = vadd.f32 %v1716_v60, %v712_v56  ;;  %v1717_v44 = vpop.f32.mrb[24].mxu0  ;;  %v1767_v30 = vpop.f32.mrb[20].mxu1  ;;  %v1374_v31 = vadd.f32 %v1766_v0, %v1051_v61 }
 0x229   : > { %v1718_v15 = vpop.f32.mrb[25].mxu0  ;;  %v1768_v33 = vpop.f32.mrb[21].mxu1 }
 0x22a   : > { %v1430_v11 = vadd.f32 %v1397_v8, %v1374_v31  ;;  %v1719_v28 = vadd.f32 %v1718_v15, %v1717_v44  ;;  %v1769_v26 = vadd.f32 %v1768_v33, %v1767_v30  ;;  %v1427_v8 = vpop.permute.xlu0 %1426 }
 0x22c   : > { %1438 = vst [vmem:[%s3250_s19 + $0x8] sm:$0xff] %v1430_v11  ;;  %v1054_v39 = vadd.f32 %v1719_v28, %v717_v4  ;;  %v1720_v40 = vpop.f32.mrb[26].mxu0  ;;  %v1770_v9 = vpop.f32.mrb[22].mxu1  ;;  %v1375_v36 = vadd.f32 %v1769_v26, %v1052_v51 }
 0x22d   : > { %v1721_v16 = vpop.f32.mrb[27].mxu0  ;;  %v1771_v43 = vpop.f32.mrb[23].mxu1 }
 0x22e   : > { %v1431_v46 = vadd.f32 %v1402_v58, %v1375_v36  ;;  %v1722_v47 = vadd.f32 %v1721_v16, %v1720_v40  ;;  %v1772_v62 = vadd.f32 %v1771_v43, %v1770_v9 }
 0x230   : > { %1439 = vst [vmem:[%s3250_s19 + $0x10] sm:$0xff] %v1431_v46  ;;  %v1055_v12 = vadd.f32 %v1722_v47, %v722_v49  ;;  %v1376_v27 = vadd.f32 %v1772_v62, %v1053_v5  ;;  %v1723_v56 = vpop.f32.mrb[28].mxu0  ;;  %v1773_v53 = vpop.f32.mrb[24].mxu1 }
 0x231   : > { %v1724_v57 = vpop.f32.mrb[29].mxu0  ;;  %v1774_v59 = vpop.f32.mrb[25].mxu1 }
 0x232   : > { %v1432_v50 = vadd.f32 %v1407_v22, %v1376_v27  ;;  %v1725_v4 = vadd.f32 %v1724_v57, %v1723_v56  ;;  %v1775_v54 = vadd.f32 %v1774_v59, %v1773_v53 }
 0x234   : > { %1440 = vst [vmem:[%s3250_s19 + $0x18] sm:$0xff] %v1432_v50  ;;  %v1056_v7 = vadd.f32 %v1725_v4, %v3242_v17  ;;  %v1377_v10 = vadd.f32 %v1775_v54, %v1054_v39  ;;  %v1726_v13 = vpop.f32.mrb[30].mxu0  ;;  %v1776_v45 = vpop.f32.mrb[26].mxu1 }
 0x235   : > { %v1727_v21 = vpop.f32.mrb[31].mxu0  ;;  %v1777_v34 = vpop.f32.mrb[27].mxu1 }
 0x236   : > { %v1433_v49 = vadd.f32 %v1412_v3, %v1377_v10  ;;  %v1728_v25 = vadd.f32 %v1727_v21, %v1726_v13  ;;  %v1778_v63 = vadd.f32 %v1777_v34, %v1776_v45 }
 0x238   : > { %1441 = vst [vmem:[%s3250_s19 + $0x20] sm:$0xff] %v1433_v49  ;;  %v1057_v1 = vadd.f32 %v1728_v25, %v3244_v24  ;;  %v1378_v23 = vadd.f32 %v1778_v63, %v1055_v12  ;;  %v1779_v6 = vpop.f32.mrb[28].mxu1 }
 0x239   : > { %v1780_v18 = vpop.f32.mrb[29].mxu1 }
 0x23a   : > { %v1434_v61 = vadd.f32 %v1417_v38, %v1378_v23  ;;  %v1781_v17 = vadd.f32 %v1780_v18, %v1779_v6 }
 0x23c   : > { %1442 = vst [vmem:[%s3250_s19 + $0x28] sm:$0xff] %v1434_v61  ;;  %v1379_v14 = vadd.f32 %v1781_v17, %v1056_v7  ;;  %v1782_v32 = vpop.f32.mrb[30].mxu1 }
 0x23d   : > { %v1783_v35 = vpop.f32.mrb[31].mxu1 }
 0x23e   : > { %v1435_v29 = vadd.f32 %v1422_v20, %v1379_v14  ;;  %v1784_v41 = vadd.f32 %v1783_v35, %v1782_v32 }
 0x240   : > { %1443 = vst [vmem:[%s3250_s19 + $0x30] sm:$0xff] %v1435_v29  ;;  %v1380_v2 = vadd.f32 %v1784_v41, %v1057_v1 }
 0x242   : > { %v1436_v51 = vadd.f32 %v1427_v8, %v1380_v2 }
 0x244   : > { %1444 = vst [vmem:[%s3250_s19 + $0x38] sm:$0xff] %v1436_v51 }
 0x245 PF: > { %s13_s12 = sadd.s32 1, %s2413_s12  }
 0x246   : > { %p10_p4 = scmp.ge.s32.totalorder %s13_s12, 4  }
 0x248   :  { %12 = sbr.rel (!%p10_p4) target bundleno = 1 (0x1), region = 65 }

// kernel: mv_refinement_forward.6
= control target key start
LH: loop header
LB: loop body
LE: loop exit
PB: predicated region body
PF: predicated region fallthrough
CT: control target
= control target key end

     0   :  { %s4556_s18 = smov 0   ;;  %s6053_s0 = inlined_call_operand.vmem [shape: f32[2,64,256], index: 0, kind: input, shape index: {}]   ;;  %s6054_s1 = inlined_call_operand.vmem [shape: f32[4,256,64], index: 1, kind: input, shape index: {}]   ;;  %s6055_s2 = inlined_call_operand.vmem [shape: f32[256,1], index: 2, kind: input, shape index: {}]   ;;  %s6056_s3 = inlined_call_operand.vmem [shape: f32[64,64], index: 3, kind: input, shape index: {}]   ;;  %s6057_s4 = inlined_call_operand.vmem [shape: f32[64,1], index: 4, kind: input, shape index: {}]   ;;  %s6058_s5 = inlined_call_operand.vmem [shape: f32[2,256,128], index: 5, kind: output, shape index: {}]  }
   0x1 LB: > { %s3223_s19 = sadd.s32 4294967295, %s4520_s18   ;;  %p3227_p0 = scmp.ge.s32.totalorder %s4520_s18, 1  ;;  %s4520_s18 = sphi %s4556_s18, %s15_s18  }
   0x2   : > { %p187_p1 = scmp.lt.s32.totalorder %s4520_s18, 3 }
   0x4   : > { %p188_p2 = pnand %p3227_p0, %p187_p1 }
   0x5   : > { %p215_p3 = scmp.lt.s32.totalorder (!%p188_p2), %s3223_s19, 1  ;;  %v241_v0 = vld [vmem:[%s6054_s1] sm:$0xff] (!%p188_p2)  ;;  %vm371_vm0 = vcmask (!%p188_p2), 523264   ;;  %s4522_s26 = smov (!%p188_p2), 123   ;;  %v242_v29 = vld [vmem:[%s6054_s1 + $0x8] sm:$0xff] (!%p188_p2)  ;;  %v243_v30 = vld [vmem:[%s6054_s1 + $0x10] sm:$0xff] (!%p188_p2) }
   0x6   : > { %191 = sbr.rel (%p188_p2) target bundleno = 758 (0x2f6), region = 40  ;;  %3796 = vmatprep.mubr.msk.f32.mxu0 (!%p188_p2), %vm371_vm0, %v241_v0  ;;  %s4523_s27 = smov (!%p188_p2), 127   ;;  %v244_v31 = vld [vmem:[%s6054_s1 + $0x18] sm:$0xff] (!%p188_p2)  ;;  %v3232_v32 = vld [vmem:[%s6054_s1 + $0x100] sm:$0xff] (!%p188_p2)  ;;  %v246_v34 = vld [vmem:[%s6054_s1 + $0x28] sm:$0xff] (!%p188_p2)  ;;  %v4525_v40 = vmov (!%p188_p2), 0  }
   0x7   : > { %v245_v33 = vld [vmem:[%s6054_s1 + $0x20] sm:$0xff] (!%p188_p2)  ;;  %3732 = vmatprep.mubr.msk.f32.mxu1 (!%p188_p2), %vm371_vm0, %v3232_v32  ;;  %v247_v35 = vld [vmem:[%s6054_s1 + $0x30] sm:$0xff] (!%p188_p2)  ;;  %v248_v36 = vld [vmem:[%s6054_s1 + $0x38] sm:$0xff] (!%p188_p2)  ;;  %s4524_s21 = smov (!%p188_p2), 122   ;;  %4449 = vset.pattern.permute.xlu1 (!%p188_p2), %v4525_v40  ;;  %vm1079_vm1 = vcmask (!%p188_p2), 1006592   ;;  %vm354_vm2 = vcmask (!%p188_p2), 1039360  }
   0x8   : > { %v249_v37 = vld [vmem:[%s6054_s1 + $0x40] sm:$0xff] (!%p188_p2)  ;;  %v250_v38 = vld [vmem:[%s6054_s1 + $0x48] sm:$0xff] (!%p188_p2)  ;;  %v251_v39 = vld [vmem:[%s6054_s1 + $0x50] sm:$0xff] (!%p188_p2)  ;;  %4448 = vset.pattern.permute.xlu0 (!%p188_p2), %v4525_v40  ;;  %vm1514_vm3 = vcmask (!%p188_p2), 998400  }
   0x9   : > { %v252_v41 = vld [vmem:[%s6054_s1 + $0x58] sm:$0xff] (!%p188_p2)  ;;  %v253_v42 = vld [vmem:[%s6054_s1 + $0x60] sm:$0xff] (!%p188_p2)  ;;  %v254_v43 = vld [vmem:[%s6054_s1 + $0x68] sm:$0xff] (!%p188_p2) }
   0xa   : > { %v255_v44 = vld [vmem:[%s6054_s1 + $0x70] sm:$0xff] (!%p188_p2)  ;;  %v1885_v45 = vld [vmem:[%s6055_s2 + $0x8] sm:$0xff] (!%p188_p2)  ;;  %v1884_v46 = vld [vmem:[%s6055_s2] sm:$0xff] (!%p188_p2) }
   0xb   : > { %v256_v47 = vld [vmem:[%s6054_s1 + $0x78] sm:$0xff] (!%p188_p2)  ;;  %v3328_v48 = vld [vmem:[%s6054_s1 + $0x200] sm:$0xff] (!%p188_p2)  ;;  %v1886_v49 = vld [vmem:[%s6055_s2 + $0x10] sm:$0xff] (!%p188_p2) }
   0xc   : > { %v1887_v50 = vld [vmem:[%s6055_s2 + $0x18] sm:$0xff] (!%p188_p2)  ;;  %v1888_v51 = vld [vmem:[%s6055_s2 + $0x20] sm:$0xff] (!%p188_p2)  ;;  %v1889_v52 = vld [vmem:[%s6055_s2 + $0x28] sm:$0xff] (!%p188_p2) }
   0xd   : > { %s6060_s19 = smov (!%p215_p3, %s3223_s19), 1  ;;  %v1890_v53 = vld [vmem:[%s6055_s2 + $0x30] sm:$0xff]  ;;  %v1891_v54 = vld [vmem:[%s6055_s2 + $0x38] sm:$0xff]  ;;  %v1892_v55 = vld [vmem:[%s6055_s2 + $0x40] sm:$0xff] }
   0xe   : > { %s3490_s22 = sshll.u32 %s6060_s19, 7  ;;  %v1893_v56 = vld [vmem:[%s6055_s2 + $0x48] sm:$0xff]  ;;  %v1894_v57 = vld [vmem:[%s6055_s2 + $0x50] sm:$0xff]  ;;  %v1895_v58 = vld [vmem:[%s6055_s2 + $0x58] sm:$0xff]  ;;  %s3491_s9 = sshll.u32 %s6060_s19, 8 }
   0xf   : > { %s219_s25 = scalar_lea.vmem %s6053_s0, %s3490_s22  ;;  %v1896_v59 = vld [vmem:[%s6055_s2 + $0x60] sm:$0xff]  ;;  %v1897_v60 = vld [vmem:[%s6055_s2 + $0x68] sm:$0xff]  ;;  %v1898_v61 = vld [vmem:[%s6055_s2 + $0x70] sm:$0xff]  ;;  %s5692_s11 = scalar_lea.vmem %s6058_s5, %s3491_s9 }
  0x10   : > { %v229_v1 = vld [vmem:[%s219_s25 + $0x20] sm:$0xff]  ;;  %v230_v2 = vld [vmem:[%s219_s25 + $0x28] sm:$0xff]  ;;  %v231_v6 = vld [vmem:[%s219_s25 + $0x30] sm:$0xff] }
  0x11   : > { %v225_v3 = vld [vmem:[%s219_s25] sm:$0xff]  ;;  %v4574_v4 = vpack.i.bf16 %v230_v2, %v229_v1  ;;  %v226_v5 = vld [vmem:[%s219_s25 + $0x8] sm:$0xff]  ;;  %v232_v7 = vld [vmem:[%s219_s25 + $0x38] sm:$0xff]  ;;  %v4590_v19 = vpack.c.bf16 %v231_v6, %v229_v1 }
  0x12   : > { %v4576_v8 = vpack.i.bf16 %v226_v5, %v225_v3  ;;  %v227_v9 = vld [vmem:[%s219_s25 + $0x10] sm:$0xff]  ;;  %v228_v10 = vld [vmem:[%s219_s25 + $0x18] sm:$0xff]  ;;  %v4580_v11 = vpack.i.bf16 %v232_v7, %v231_v6  ;;  %v233_v15 = vld [vmem:[%s219_s25 + $0x40] sm:$0xff] }
  0x13   : > { %4339 = vrot.lane.b32.xlu1 %v4574_v4, %s4522_s26  ;;  %v4333_v12 = vpack.i.bf16 %v228_v10, %v227_v9  ;;  %v235_v13 = vld [vmem:[%s219_s25 + $0x50] sm:$0xff]  ;;  %v236_v14 = vld [vmem:[%s219_s25 + $0x58] sm:$0xff]  ;;  %v234_v16 = vld [vmem:[%s219_s25 + $0x48] sm:$0xff]  ;;  %v4588_v18 = vpack.c.bf16 %v227_v9, %v225_v3 }
  0x14   : > { %4329 = vrot.lane.b32.xlu0 %v4576_v8, %s4522_s26  ;;  %v4586_v17 = vpack.i.bf16 %v236_v14, %v235_v13  ;;  %v4348_v20 = vpack.i.bf16 %v234_v16, %v233_v15  ;;  %v239_v21 = vld [vmem:[%s219_s25 + $0x70] sm:$0xff]  ;;  %v240_v22 = vld [vmem:[%s219_s25 + $0x78] sm:$0xff]  ;;  %v237_v23 = vld [vmem:[%s219_s25 + $0x60] sm:$0xff]  ;;  %v4598_v26 = vpack.c.bf16 %v235_v13, %v233_v15 }
  0x15   : > { %v238_v24 = vld [vmem:[%s219_s25 + $0x68] sm:$0xff]  ;;  %4101 = vmatprep.subr.bf16.mxu0 %v4588_v18  ;;  %v4363_v25 = vpack.i.bf16 %v240_v22, %v239_v21  ;;  %v4604_v28 = vpack.c.bf16 %v239_v21, %v237_v23  ;;  %v1899_v62 = vld [vmem:[%s6055_s2 + $0x78] sm:$0xff]  ;;  %v1900_v63 = vld [vmem:[%s6055_s2 + $0x80] sm:$0xff] }
  0x16   : > { %4103 = vmatpush3.bf16.msra.mxu0 %v4588_v18  ;;  %v4358_v27 = vpack.i.bf16 %v238_v24, %v237_v23  ;;  %v1901_v0 = vld [vmem:[%s6055_s2 + $0x88] sm:$0xff]  ;;  %v1902_v1 = vld [vmem:[%s6055_s2 + $0x90] sm:$0xff]  ;;  %v1903_v2 = vld [vmem:[%s6055_s2 + $0x98] sm:$0xff] }
  0x17   : > { %4344 = vrot.lane.b32.xlu1 %v4580_v11, %s4522_s26  ;;  %4105 = vmatprep.subr.bf16.mxu0 %v4590_v19  ;;  %v1904_v3 = vld [vmem:[%s6055_s2 + $0xa0] sm:$0xff]  ;;  %v1906_v5 = vld [vmem:[%s6055_s2 + $0xb0] sm:$0xff]  ;;  %v1907_v6 = vld [vmem:[%s6055_s2 + $0xb8] sm:$0xff] }
  0x18   : > { %4334 = vrot.lane.b32.xlu0 %v4333_v12, %s4522_s26  ;;  %v1908_v7 = vld [vmem:[%s6055_s2 + $0xc0] sm:$0xff]  ;;  %v1910_v9 = vld [vmem:[%s6055_s2 + $0xd0] sm:$0xff]  ;;  %v1911_v10 = vld [vmem:[%s6055_s2 + $0xd8] sm:$0xff] }
  0x19   : > { %v1914_v13 = vld [vmem:[%s6055_s2 + $0xf0] sm:$0xff]  ;;  %v1915_v14 = vld [vmem:[%s6055_s2 + $0xf8] sm:$0xff]  ;;  %v4785_v15 = vld [vmem:[%s6057_s4] sm:$0xff] }
  0x1a   : > { %4107 = vmatpush3.bf16.msra.mxu0 %v4590_v19  ;;  %v4790_v16 = vld [vmem:[%s6057_s4 + $0x8] sm:$0xff]  ;;  %v4802_v21 = vld [vmem:[%s6057_s4 + $0x18] sm:$0xff]  ;;  %v4809_v23 = vld [vmem:[%s6057_s4 + $0x20] sm:$0xff] }
  0x1b   : > { %4354 = vrot.lane.b32.xlu1 %v4586_v17, %s4522_s26  ;;  %4109 = vmatprep.subr.bf16.mxu0 %v4598_v26 }
  0x1c   : > { %4349 = vrot.lane.b32.xlu0 %v4348_v20, %s4522_s26 }
  0x1e   : > { %4111 = vmatpush3.bf16.msra.mxu0 %v4598_v26 }
  0x1f   : > { %4364 = vrot.lane.b32.xlu1 %v4363_v25, %s4522_s26  ;;  %4113 = vmatprep.subr.bf16.mxu0 %v4604_v28 }
  0x20   : > { %4359 = vrot.lane.b32.xlu0 %v4358_v27, %s4522_s26 }
  0x22   : > { %4115 = vmatpush3.bf16.msra.mxu0 %v4604_v28 }
  0x23   : > { %4374 = vrot.lane.b32.xlu1 %v4333_v12, %s4523_s27 }
  0x24   : > { %4369 = vrot.lane.b32.xlu0 %v4576_v8, %s4523_s27 }
  0x25   : > { %3797 = vmatmul.mubr.msk.f32.vlgmr.msra.gmra.mrb[0].mxu0 %vm371_vm0, %v242_v29 }
  0x26   : > { %3799 = vmatprep.mubr.msk.f32.mxu0 %vm371_vm0, %v243_v30 }
  0x27   : > { %4384 = vrot.lane.b32.xlu1 %v4580_v11, %s4523_s27 }
  0x28   : > { %4379 = vrot.lane.b32.xlu0 %v4574_v4, %s4523_s27 }
  0x29   : > { %3800 = vmatmul.mubr.msk.f32.gmra.mrb[2].mxu0 %vm371_vm0, %v244_v31  ;;  %v4814_v31 = vld [vmem:[%s6057_s4 + $0x28] sm:$0xff] }
  0x2a   : > { %3802 = vmatprep.mubr.msk.f32.mxu0 %vm371_vm0, %v245_v33 }
  0x2b   : > { %4394 = vrot.lane.b32.xlu1 %v4586_v17, %s4523_s27 }
  0x2c   : > { %4389 = vrot.lane.b32.xlu0 %v4348_v20, %s4523_s27 }
  0x2d   : > { %3803 = vmatmul.mubr.msk.f32.gmra.mrb[4].mxu0 %vm371_vm0, %v246_v34 }
  0x2e   : > { %3805 = vmatprep.mubr.msk.f32.mxu0 %vm371_vm0, %v247_v35 }
  0x2f   : > { %4404 = vrot.lane.b32.xlu1 %v4363_v25, %s4523_s27 }
  0x30   : > { %4399 = vrot.lane.b32.xlu0 %v4358_v27, %s4523_s27 }
  0x31   : > { %3806 = vmatmul.mubr.msk.f32.gmra.mrb[6].mxu0 %vm371_vm0, %v248_v36 }
  0x32   : > { %3808 = vmatprep.mubr.msk.f32.mxu0 %vm371_vm0, %v249_v37  ;;  %v4821_v37 = vld [vmem:[%s6057_s4 + $0x30] sm:$0xff] }
  0x33   : > { %4414 = vrot.lane.b32.xlu1 %v4333_v12, %s4524_s21  ;;  %v1913_v12 = vld [vmem:[%s6055_s2 + $0xe8] sm:$0xff] }
  0x34   : > { %4409 = vrot.lane.b32.xlu0 %v4576_v8, %s4524_s21  ;;  %v1909_v8 = vld [vmem:[%s6055_s2 + $0xc8] sm:$0xff] }
  0x35   : > { %3809 = vmatmul.mubr.msk.f32.gmra.mrb[8].mxu0 %vm371_vm0, %v250_v38 }
  0x36   : > { %3811 = vmatprep.mubr.msk.f32.mxu0 %vm371_vm0, %v251_v39 }
  0x37   : > { %4424 = vrot.lane.b32.xlu1 %v4580_v11, %s4524_s21  ;;  %v1912_v11 = vld [vmem:[%s6055_s2 + $0xe0] sm:$0xff] }
  0x38   : > { %4419 = vrot.lane.b32.xlu0 %v4574_v4, %s4524_s21  ;;  %v1905_v4 = vld [vmem:[%s6055_s2 + $0xa8] sm:$0xff] }
  0x39   : > { %3812 = vmatmul.mubr.msk.f32.gmra.mrb[10].mxu0 %vm371_vm0, %v252_v41 }
  0x3a   : > { %3814 = vmatprep.mubr.msk.f32.mxu0 %vm371_vm0, %v253_v42 }
  0x3b   : > { %4434 = vrot.lane.b32.xlu1 %v4586_v17, %s4524_s21  ;;  %v4797_v17 = vld [vmem:[%s6057_s4 + $0x10] sm:$0xff] }
  0x3c   : > { %4429 = vrot.lane.b32.xlu0 %v4348_v20, %s4524_s21 }
  0x3d   : > { %3815 = vmatmul.mubr.msk.f32.gmra.mrb[12].mxu0 %vm371_vm0, %v254_v43  ;;  %v4830_v43 = vld [vmem:[%s6057_s4 + $0x38] sm:$0xff] }
  0x3e   : > { %3817 = vmatprep.mubr.msk.f32.mxu0 %vm371_vm0, %v255_v44 }
  0x3f   : > { %4444 = vrot.lane.b32.xlu1 %v4363_v25, %s4524_s21 }
  0x40   : > { %4439 = vrot.lane.b32.xlu0 %v4358_v27, %s4524_s21 }
  0x41   : > { %3818 = vmatmul.mubr.msk.f32.gmra.mrb[14].mxu0 %vm371_vm0, %v256_v47 }
  0x42   : > { %3860 = vmatprep.mubr.msk.f32.mxu0 %vm371_vm0, %v3328_v48 }
  0x43   : > { %1923 = vperm.xlu1 %4449, %v1885_v45  }
  0x44   : > { %1918 = vperm.xlu0 %4448, %v1884_v46  }
  0x47   : > { %1928 = vperm.xlu1 %4449, %v1886_v49  }
  0x48   : > { %1933 = vperm.xlu0 %4448, %v1887_v50  }
  0x4b   : > { %1938 = vperm.xlu1 %4449, %v1888_v51  }
  0x4c   : > { %1943 = vperm.xlu0 %4448, %v1889_v52  }
  0x4f   : > { %1948 = vperm.xlu1 %4449, %v1890_v53  }
  0x50   : > { %1953 = vperm.xlu0 %4448, %v1891_v54  }
  0x53   : > { %1958 = vperm.xlu1 %4449, %v1892_v55  }
  0x54   : > { %1963 = vperm.xlu0 %4448, %v1893_v56  }
  0x57   : > { %1968 = vperm.xlu1 %4449, %v1894_v57  }
  0x58   : > { %1973 = vperm.xlu0 %4448, %v1895_v58  }
  0x5b   : > { %1978 = vperm.xlu1 %4449, %v1896_v59  }
  0x5c   : > { %1983 = vperm.xlu0 %4448, %v1897_v60  }
  0x5f   : > { %1988 = vperm.xlu1 %4449, %v1898_v61  }
  0x60   : > { %1993 = vperm.xlu0 %4448, %v1899_v62  }
  0x63   : > { %1998 = vperm.xlu1 %4449, %v1900_v63  }
  0x64   : > { %2003 = vperm.xlu0 %4448, %v1901_v0  }
  0x67   : > { %2008 = vperm.xlu1 %4449, %v1902_v1  }
  0x68   : > { %2013 = vperm.xlu0 %4448, %v1903_v2  }
  0x6b   : > { %2018 = vperm.xlu1 %4449, %v1904_v3  }
  0x6c   : > { %2023 = vperm.xlu0 %4448, %v1905_v4  }
  0x6f   : > { %2028 = vperm.xlu1 %4449, %v1906_v5  }
  0x70   : > { %2033 = vperm.xlu0 %4448, %v1907_v6  }
  0x73   : > { %2038 = vperm.xlu1 %4449, %v1908_v7  }
  0x74   : > { %2043 = vperm.xlu0 %4448, %v1909_v8  }
  0x77   : > { %2048 = vperm.xlu1 %4449, %v1910_v9  }
  0x78   : > { %2053 = vperm.xlu0 %4448, %v1911_v10  }
  0x7b   : > { %2058 = vperm.xlu1 %4449, %v1912_v11  }
  0x7c   : > { %2063 = vperm.xlu0 %4448, %v1913_v12  }
  0x7f   : > { %2068 = vperm.xlu1 %4449, %v1914_v13  }
  0x80   : > { %2073 = vperm.xlu0 %4448, %v1915_v14  }
  0x83   : > { %2134 = vperm.xlu1 %4449, %v4785_v15  }
  0x84   : > { %2139 = vperm.xlu0 %4448, %v4790_v16  }
  0x85   : > { %v4340_v20 = vpop.permute.xlu1 %4339 }
  0x86   : > { %v4330_v22 = vpop.permute.xlu0 %4329  ;;  %v4342_v24 = vunpack.i.h.bf16 %v4340_v20  ;;  %v4341_v25 = vunpack.i.l.bf16 %v4340_v20  ;;  %v3329_v20 = vld [vmem:[%s6054_s1 + $0x208] sm:$0xff] }
  0x87   : > { %2144 = vperm.xlu1 %4449, %v4797_v17   ;;  %v4332_v27 = vunpack.i.h.bf16 %v4330_v22  ;;  %v4331_v29 = vunpack.i.l.bf16 %v4330_v22 }
  0x88   : > { %2149 = vperm.xlu0 %4448, %v4802_v21   ;;  %v1082_v41 = vsel %vm1079_vm1, %v4341_v25, %v4342_v24 }
  0x89   : > { %v4345_v30 = vpop.permute.xlu1 %4344  ;;  %v1080_v38 = vsel %vm1079_vm1, %v4331_v29, %v4332_v27 }
  0x8a   : > { %v4347_v32 = vunpack.i.h.bf16 %v4345_v30  ;;  %v4346_v33 = vunpack.i.l.bf16 %v4345_v30  ;;  %v4335_v34 = vpop.permute.xlu0 %4334 }
  0x8b   : > { %v4337_v35 = vunpack.i.h.bf16 %v4335_v34  ;;  %v4336_v36 = vunpack.i.l.bf16 %v4335_v34  ;;  %2154 = vperm.xlu1 %4449, %v4809_v23  }
  0x8c   : > { %2159 = vperm.xlu0 %4448, %v4814_v31   ;;  %v1083_v42 = vsel %vm1079_vm1, %v4346_v33, %v4347_v32  ;;  %v3330_v32 = vld [vmem:[%s6054_s1 + $0x210] sm:$0xff] }
  0x8d   : > { %v1081_v39 = vsel %vm1079_vm1, %v4336_v36, %v4337_v35  ;;  %v4355_v40 = vpop.permute.xlu1 %4354  ;;  %v4120_v50 = vpack.c.bf16 %v1083_v42, %v1082_v41  ;;  %v3331_v36 = vld [vmem:[%s6054_s1 + $0x218] sm:$0xff] }
  0x8e   : > { %v4116_v44 = vpack.c.bf16 %v1081_v39, %v1080_v38  ;;  %v4357_v45 = vunpack.i.h.bf16 %v4355_v40  ;;  %v4356_v46 = vunpack.i.l.bf16 %v4355_v40  ;;  %v4350_v47 = vpop.permute.xlu0 %4349 }
  0x8f   : > { %v4352_v48 = vunpack.i.h.bf16 %v4350_v47  ;;  %v4351_v49 = vunpack.i.l.bf16 %v4350_v47  ;;  %2164 = vperm.xlu1 %4449, %v4821_v37  }
  0x90   : > { %4117 = vmatprep.subr.bf16.mxu0 %v4116_v44  ;;  %v1085_v51 = vsel %vm1079_vm1, %v4356_v46, %v4357_v45  ;;  %2169 = vperm.xlu0 %4448, %v4830_v43   ;;  %v3332_v45 = vld [vmem:[%s6054_s1 + $0x220] sm:$0xff] }
  0x91   : > { %4119 = vmatpush3.bf16.msra.mxu0 %v4116_v44  ;;  %v4365_v52 = vpop.permute.xlu1 %4364  ;;  %v1084_v53 = vsel %vm1079_vm1, %v4351_v49, %v4352_v48  ;;  %v3333_v49 = vld [vmem:[%s6054_s1 + $0x228] sm:$0xff] }
  0x92   : > { %4121 = vmatprep.subr.bf16.mxu0 %v4120_v50  ;;  %v4367_v54 = vunpack.i.h.bf16 %v4365_v52  ;;  %v4366_v55 = vunpack.i.l.bf16 %v4365_v52  ;;  %v4360_v56 = vpop.permute.xlu0 %4359  ;;  %v4124_v57 = vpack.c.bf16 %v1085_v51, %v1084_v53 }
  0x93   : > { %v4362_v58 = vunpack.i.h.bf16 %v4360_v56  ;;  %v4361_v59 = vunpack.i.l.bf16 %v4360_v56  ;;  %2399 = vperm.xlu1 %4449, %v4785_v15   ;;  %v3334_v56 = vld [vmem:[%s6054_s1 + $0x230] sm:$0xff] }
  0x94   : > { %v1087_v60 = vsel %vm1079_vm1, %v4366_v55, %v4367_v54  ;;  %2404 = vperm.xlu0 %4448, %v4790_v16  }
  0x95   : > { %4123 = vmatpush3.bf16.msra.mxu0 %v4120_v50  ;;  %v4375_v61 = vpop.permute.xlu1 %4374  ;;  %v1086_v62 = vsel %vm1079_vm1, %v4361_v59, %v4362_v58 }
  0x96   : > { %4125 = vmatprep.subr.bf16.mxu0 %v4124_v57  ;;  %v4377_v63 = vunpack.i.h.bf16 %v4375_v61  ;;  %v4376_v0 = vunpack.i.l.bf16 %v4375_v61  ;;  %v4370_v1 = vpop.permute.xlu0 %4369  ;;  %v4128_v2 = vpack.c.bf16 %v1087_v60, %v1086_v62  ;;  %v3335_v60 = vld [vmem:[%s6054_s1 + $0x238] sm:$0xff]  ;;  %v3233_v61 = vld [vmem:[%s6054_s1 + $0x108] sm:$0xff] }
  0x97   : > { %v4372_v3 = vunpack.i.h.bf16 %v4370_v1  ;;  %v4371_v4 = vunpack.i.l.bf16 %v4370_v1  ;;  %2409 = vperm.xlu1 %4449, %v4797_v17  }
  0x98   : > { %v356_v5 = vsel %vm354_vm2, %v4376_v0, %v4377_v63  ;;  %2414 = vperm.xlu0 %4448, %v4802_v21   ;;  %v3336_v0 = vld [vmem:[%s6054_s1 + $0x240] sm:$0xff] }
  0x99   : > { %4127 = vmatpush3.bf16.msra.mxu0 %v4124_v57  ;;  %v4385_v6 = vpop.permute.xlu1 %4384  ;;  %v355_v7 = vsel %vm354_vm2, %v4371_v4, %v4372_v3 }
  0x9a   : > { %4129 = vmatprep.subr.bf16.mxu0 %v4128_v2  ;;  %v4387_v8 = vunpack.i.h.bf16 %v4385_v6  ;;  %v4386_v9 = vunpack.i.l.bf16 %v4385_v6  ;;  %v4380_v10 = vpop.permute.xlu0 %4379  ;;  %v4084_v11 = vpack.c.bf16 %v356_v5, %v355_v7  ;;  %v3234_v5 = vld [vmem:[%s6054_s1 + $0x110] sm:$0xff] }
  0x9b   : > { %v4382_v12 = vunpack.i.h.bf16 %v4380_v10  ;;  %v4381_v13 = vunpack.i.l.bf16 %v4380_v10  ;;  %2419 = vperm.xlu1 %4449, %v4809_v23   ;;  %v3235_v10 = vld [vmem:[%s6054_s1 + $0x118] sm:$0xff] }
  0x9c   : > { %4085 = vmatprep.subr.bf16.mxu1 %v4084_v11  ;;  %v358_v14 = vsel %vm354_vm2, %v4386_v9, %v4387_v8  ;;  %2424 = vperm.xlu0 %4448, %v4814_v31   ;;  %v3337_v9 = vld [vmem:[%s6054_s1 + $0x248] sm:$0xff] }
  0x9d   : > { %4131 = vmatpush3.bf16.msra.mxu0 %v4128_v2  ;;  %4087 = vmatpush3.bf16.msra.mxu1 %v4084_v11  ;;  %v4395_v22 = vpop.permute.xlu1 %4394  ;;  %v357_v24 = vsel %vm354_vm2, %v4381_v13, %v4382_v12  ;;  %v3338_v13 = vld [vmem:[%s6054_s1 + $0x250] sm:$0xff] }
  0x9e   : > { %v4397_v25 = vunpack.i.h.bf16 %v4395_v22  ;;  %v4396_v27 = vunpack.i.l.bf16 %v4395_v22  ;;  %v4390_v29 = vpop.permute.xlu0 %4389  ;;  %v4088_v30 = vpack.c.bf16 %v358_v14, %v357_v24  ;;  %v3236_v14 = vld [vmem:[%s6054_s1 + $0x120] sm:$0xff] }
  0x9f   : > { %v4392_v33 = vunpack.i.h.bf16 %v4390_v29  ;;  %v4391_v34 = vunpack.i.l.bf16 %v4390_v29  ;;  %2429 = vperm.xlu1 %4449, %v4821_v37  }
  0xa0   : > { %3861 = vmatmul.mubr.msk.f32.vlgmr.msra.gmra.mrb[0].mxu0 %vm371_vm0, %v3329_v20  ;;  %4089 = vmatprep.subr.bf16.mxu1 %v4088_v30  ;;  %v360_v35 = vsel %vm354_vm2, %v4396_v27, %v4397_v25 }
  0xa1   : > { %3863 = vmatprep.mubr.msk.f32.mxu0 %vm371_vm0, %v3330_v32  ;;  %4091 = vmatpush3.bf16.msra.mxu1 %v4088_v30  ;;  %v4405_v38 = vpop.permute.xlu1 %4404  ;;  %v359_v39 = vsel %vm354_vm2, %v4391_v34, %v4392_v33  ;;  %v3339_v32 = vld [vmem:[%s6054_s1 + $0x258] sm:$0xff] }
  0xa2   : > { %v4407_v40 = vunpack.i.h.bf16 %v4405_v38  ;;  %v4406_v41 = vunpack.i.l.bf16 %v4405_v38  ;;  %v4400_v42 = vpop.permute.xlu0 %4399  ;;  %v4092_v44 = vpack.c.bf16 %v360_v35, %v359_v39  ;;  %2434 = vperm.xlu0 %4448, %v4830_v43   ;;  %v3340_v35 = vld [vmem:[%s6054_s1 + $0x260] sm:$0xff] }
  0xa3   : > { %v4402_v46 = vunpack.i.h.bf16 %v4400_v42  ;;  %v4401_v47 = vunpack.i.l.bf16 %v4400_v42  ;;  %2664 = vperm.xlu1 %4449, %v4785_v15  }
  0xa4   : > { %3864 = vmatmul.mubr.msk.f32.gmra.mrb[2].mxu0 %vm371_vm0, %v3331_v36  ;;  %4093 = vmatprep.subr.bf16.mxu1 %v4092_v44  ;;  %v362_v48 = vsel %vm354_vm2, %v4406_v41, %v4407_v40  ;;  %v3238_v36 = vld [vmem:[%s6054_s1 + $0x130] sm:$0xff] }
  0xa5   : > { %3866 = vmatprep.mubr.msk.f32.mxu0 %vm371_vm0, %v3332_v45  ;;  %4095 = vmatpush3.bf16.msra.mxu1 %v4092_v44  ;;  %v4415_v50 = vpop.permute.xlu1 %4414  ;;  %v361_v51 = vsel %vm354_vm2, %v4401_v47, %v4402_v46  ;;  %v3341_v46 = vld [vmem:[%s6054_s1 + $0x268] sm:$0xff]  ;;  %v3239_v47 = vld [vmem:[%s6054_s1 + $0x138] sm:$0xff] }
  0xa6   : > { %v4417_v52 = vunpack.i.h.bf16 %v4415_v50  ;;  %v4416_v53 = vunpack.i.l.bf16 %v4415_v50  ;;  %v4410_v54 = vpop.permute.xlu0 %4409  ;;  %v4096_v55 = vpack.c.bf16 %v362_v48, %v361_v51  ;;  %2669 = vperm.xlu0 %4448, %v4790_v16   ;;  %v3342_v48 = vld [vmem:[%s6054_s1 + $0x270] sm:$0xff]  ;;  %v3343_v51 = vld [vmem:[%s6054_s1 + $0x278] sm:$0xff] }
  0xa7   : > { %v4412_v57 = vunpack.i.h.bf16 %v4410_v54  ;;  %v4411_v58 = vunpack.i.l.bf16 %v4410_v54  ;;  %2674 = vperm.xlu1 %4449, %v4797_v17   ;;  %v3345_v54 = vld [vmem:[%s6054_s1 + $0x288] sm:$0xff] }
  0xa8   : > { %3867 = vmatmul.mubr.msk.f32.gmra.mrb[4].mxu0 %vm371_vm0, %v3333_v49  ;;  %4097 = vmatprep.subr.bf16.mxu1 %v4096_v55  ;;  %v1516_v59 = vsel %vm1514_vm3, %v4416_v53, %v4417_v52  ;;  %v3240_v49 = vld [vmem:[%s6054_s1 + $0x140] sm:$0xff]  ;;  %v3241_v52 = vld [vmem:[%s6054_s1 + $0x148] sm:$0xff]  ;;  %v3242_v53 = vld [vmem:[%s6054_s1 + $0x150] sm:$0xff] }
  0xa9   : > { %3869 = vmatprep.mubr.msk.f32.mxu0 %vm371_vm0, %v3334_v56  ;;  %4099 = vmatpush3.bf16.msra.mxu1 %v4096_v55  ;;  %v1515_v62 = vsel %vm1514_vm3, %v4411_v58, %v4412_v57  ;;  %v4425_v63 = vpop.permute.xlu1 %4424  ;;  %v3243_v55 = vld [vmem:[%s6054_s1 + $0x158] sm:$0xff]  ;;  %v3244_v56 = vld [vmem:[%s6054_s1 + $0x160] sm:$0xff]  ;;  %v3245_v58 = vld [vmem:[%s6054_s1 + $0x168] sm:$0xff] }
  0xaa   : > { %v4132_v1 = vpack.c.bf16 %v1516_v59, %v1515_v62  ;;  %v4427_v2 = vunpack.i.h.bf16 %v4425_v63  ;;  %v4426_v3 = vunpack.i.l.bf16 %v4425_v63  ;;  %v4420_v4 = vpop.permute.xlu0 %4419  ;;  %4212 = vmatprep.subr.bf16.mxu1 %v4588_v18  ;;  %2679 = vperm.xlu0 %4448, %v4802_v21   ;;  %v3347_v57 = vld [vmem:[%s6054_s1 + $0x298] sm:$0xff]  ;;  %v3348_v59 = vld [vmem:[%s6054_s1 + $0x2a0] sm:$0xff] }
  0xab   : > { %v4422_v6 = vunpack.i.h.bf16 %v4420_v4  ;;  %v4421_v7 = vunpack.i.l.bf16 %v4420_v4  ;;  %2684 = vperm.xlu1 %4449, %v4809_v23   ;;  %v3247_v62 = vld [vmem:[%s6054_s1 + $0x178] sm:$0xff]  ;;  %v3253_v4 = vld [vmem:[%s6054_s1 + $0x1a8] sm:$0xff] }
  0xac   : > { %3870 = vmatmul.mubr.msk.f32.gmra.mrb[6].mxu0 %vm371_vm0, %v3335_v60  ;;  %3733 = vmatmul.mubr.msk.f32.vlgmr.msra.gmra.mrb[0].mxu1 %vm371_vm0, %v3233_v61  ;;  %v1518_v8 = vsel %vm1514_vm3, %v4426_v3, %v4427_v2  ;;  %v3246_v60 = vld [vmem:[%s6054_s1 + $0x170] sm:$0xff]  ;;  %v3349_v61 = vld [vmem:[%s6054_s1 + $0x2a8] sm:$0xff]  ;;  %v3351_v63 = vld [vmem:[%s6054_s1 + $0x2b8] sm:$0xff] }
  0xad   : > { %3872 = vmatprep.mubr.msk.f32.mxu0 %vm371_vm0, %v3336_v0  ;;  %4133 = vmatprep.subr.bf16.mxu0 %v4132_v1  ;;  %v1517_v11 = vsel %vm1514_vm3, %v4421_v7, %v4422_v6  ;;  %v4435_v12 = vpop.permute.xlu1 %4434  ;;  %v3249_v0 = vld [vmem:[%s6054_s1 + $0x188] sm:$0xff]  ;;  %v3251_v2 = vld [vmem:[%s6054_s1 + $0x198] sm:$0xff]  ;;  %v3358_v7 = vld [vmem:[%s6054_s1 + $0x2f0] sm:$0xff] }
  0xae   : > { %4135 = vmatpush3.bf16.msra.mxu0 %v4132_v1  ;;  %3735 = vmatprep.mubr.msk.f32.mxu1 %vm371_vm0, %v3234_v5  ;;  %v4136_v20 = vpack.c.bf16 %v1518_v8, %v1517_v11  ;;  %v4437_v22 = vunpack.i.h.bf16 %v4435_v12  ;;  %v4436_v24 = vunpack.i.l.bf16 %v4435_v12  ;;  %v4430_v25 = vpop.permute.xlu0 %4429  ;;  %v3353_v1 = vld [vmem:[%s6054_s1 + $0x2c8] sm:$0xff]  ;;  %v3355_v3 = vld [vmem:[%s6054_s1 + $0x2d8] sm:$0xff]  ;;  %v3256_v8 = vld [vmem:[%s6054_s1 + $0x1c0] sm:$0xff] }
  0xaf   : > { %v4432_v27 = vunpack.i.h.bf16 %v4430_v25  ;;  %v4431_v29 = vunpack.i.l.bf16 %v4430_v25  ;;  %4216 = vmatpush3.bf16.msra.mxu1 %v4588_v18  ;;  %2689 = vperm.xlu0 %4448, %v4814_v31   ;;  %v3237_v18 = vld [vmem:[%s6054_s1 + $0x128] sm:$0xff]  ;;  %v3255_v6 = vld [vmem:[%s6054_s1 + $0x1b8] sm:$0xff]  ;;  %v3392_v11 = vld [vmem:[%s6054_s1 + $0x300] sm:$0xff] }
  0xb0   : > { %3873 = vmatmul.mubr.msk.f32.gmra.mrb[8].mxu0 %vm371_vm0, %v3337_v9  ;;  %3736 = vmatmul.mubr.msk.f32.gmra.mrb[2].mxu1 %vm371_vm0, %v3235_v10  ;;  %v1520_v30 = vsel %vm1514_vm3, %v4436_v24, %v4437_v22  ;;  %v3357_v5 = vld [vmem:[%s6054_s1 + $0x2e8] sm:$0xff]  ;;  %v3359_v9 = vld [vmem:[%s6054_s1 + $0x2f8] sm:$0xff]  ;;  %v3258_v12 = vld [vmem:[%s6054_s1 + $0x1d0] sm:$0xff] }
  0xb1   : > { %3875 = vmatprep.mubr.msk.f32.mxu0 %vm371_vm0, %v3338_v13  ;;  %3738 = vmatprep.mubr.msk.f32.mxu1 %vm371_vm0, %v3236_v14  ;;  %v1519_v33 = vsel %vm1514_vm3, %v4431_v29, %v4432_v27  ;;  %v4445_v34 = vpop.permute.xlu1 %4444  ;;  %v3257_v10 = vld [vmem:[%s6054_s1 + $0x1c8] sm:$0xff]  ;;  %v3259_v14 = vld [vmem:[%s6054_s1 + $0x1d8] sm:$0xff]  ;;  %v3260_v22 = vld [vmem:[%s6054_s1 + $0x1e0] sm:$0xff] }
  0xb2   : > { %4137 = vmatprep.subr.bf16.mxu0 %v4136_v20  ;;  %v4140_v38 = vpack.c.bf16 %v1520_v30, %v1519_v33  ;;  %v4447_v39 = vunpack.i.h.bf16 %v4445_v34  ;;  %v4446_v40 = vunpack.i.l.bf16 %v4445_v34  ;;  %v4440_v41 = vpop.permute.xlu0 %4439  ;;  %4213 = vmatprep.subr.bf16.mxu1 %v4590_v19  ;;  %v3393_v13 = vld [vmem:[%s6054_s1 + $0x308] sm:$0xff]  ;;  %v3395_v24 = vld [vmem:[%s6054_s1 + $0x318] sm:$0xff]  ;;  %v3396_v27 = vld [vmem:[%s6054_s1 + $0x320] sm:$0xff] }
  0xb3   : > { %4139 = vmatpush3.bf16.msra.mxu0 %v4136_v20  ;;  %v4442_v42 = vunpack.i.h.bf16 %v4440_v41  ;;  %v4441_v44 = vunpack.i.l.bf16 %v4440_v41  ;;  %4217 = vmatpush3.bf16.msra.mxu1 %v4590_v19  ;;  %v3394_v20 = vld [vmem:[%s6054_s1 + $0x310] sm:$0xff]  ;;  %v3261_v25 = vld [vmem:[%s6054_s1 + $0x1e8] sm:$0xff]  ;;  %v257_v33 = vld [vmem:[%s6054_s1 + $0x80] sm:$0xff] }
  0xb4   : > { %3876 = vmatmul.mubr.msk.f32.gmra.mrb[10].mxu0 %vm371_vm0, %v3339_v32  ;;  %3739 = vmatmul.mubr.msk.f32.gmra.mrb[4].mxu1 %vm371_vm0, %v3237_v18  ;;  %v1522_v45 = vsel %vm1514_vm3, %v4446_v40, %v4447_v39  ;;  %v3262_v29 = vld [vmem:[%s6054_s1 + $0x1f0] sm:$0xff]  ;;  %v3397_v30 = vld [vmem:[%s6054_s1 + $0x328] sm:$0xff]  ;;  %v3263_v32 = vld [vmem:[%s6054_s1 + $0x1f8] sm:$0xff] }
  0xb5   : > { %3878 = vmatprep.mubr.msk.f32.mxu0 %vm371_vm0, %v3340_v35  ;;  %3741 = vmatprep.mubr.msk.f32.mxu1 %vm371_vm0, %v3238_v36  ;;  %v1521_v19 = vsel %vm1514_vm3, %v4441_v44, %v4442_v42  ;;  %v3398_v18 = vld [vmem:[%s6054_s1 + $0x330] sm:$0xff]  ;;  %v3399_v34 = vld [vmem:[%s6054_s1 + $0x338] sm:$0xff]  ;;  %v258_v35 = vld [vmem:[%s6054_s1 + $0x88] sm:$0xff] }
  0xb6   : > { %4141 = vmatprep.subr.bf16.mxu0 %v4140_v38  ;;  %v4144_v50 = vpack.c.bf16 %v1522_v45, %v1521_v19  ;;  %4214 = vmatprep.subr.bf16.mxu1 %v4598_v26  ;;  %v3400_v36 = vld [vmem:[%s6054_s1 + $0x340] sm:$0xff]  ;;  %v3401_v39 = vld [vmem:[%s6054_s1 + $0x348] sm:$0xff]  ;;  %v260_v40 = vld [vmem:[%s6054_s1 + $0x98] sm:$0xff] }
  0xb7   : > { %4143 = vmatpush3.bf16.msra.mxu0 %v4140_v38  ;;  %4218 = vmatpush3.bf16.msra.mxu1 %v4598_v26  ;;  %v3344_v26 = vld [vmem:[%s6054_s1 + $0x280] sm:$0xff]  ;;  %v259_v38 = vld [vmem:[%s6054_s1 + $0x90] sm:$0xff]  ;;  %v3403_v44 = vld [vmem:[%s6054_s1 + $0x358] sm:$0xff] }
  0xb8   : > { %3879 = vmatmul.mubr.msk.f32.gmra.mrb[12].mxu0 %vm371_vm0, %v3341_v46  ;;  %3742 = vmatmul.mubr.msk.f32.gmra.mrb[6].mxu1 %vm371_vm0, %v3239_v47  ;;  %v3402_v41 = vld [vmem:[%s6054_s1 + $0x350] sm:$0xff]  ;;  %v261_v42 = vld [vmem:[%s6054_s1 + $0xa0] sm:$0xff]  ;;  %v262_v45 = vld [vmem:[%s6054_s1 + $0xa8] sm:$0xff] }
  0xb9   : > { %3881 = vmatprep.mubr.msk.f32.mxu0 %vm371_vm0, %v3342_v48  ;;  %3744 = vmatprep.mubr.msk.f32.mxu1 %vm371_vm0, %v3240_v49  ;;  %v3404_v46 = vld [vmem:[%s6054_s1 + $0x360] sm:$0xff]  ;;  %v263_v47 = vld [vmem:[%s6054_s1 + $0xb0] sm:$0xff]  ;;  %v3405_v19 = vld [vmem:[%s6054_s1 + $0x368] sm:$0xff] }
  0xba   : > { %4145 = vmatprep.subr.bf16.mxu0 %v4144_v50  ;;  %4215 = vmatprep.subr.bf16.mxu1 %v4604_v28  ;;  %v264_v48 = vld [vmem:[%s6054_s1 + $0xb8] sm:$0xff]  ;;  %v3406_v49 = vld [vmem:[%s6054_s1 + $0x370] sm:$0xff] }
  0xbb   : > { %4147 = vmatpush3.bf16.msra.mxu0 %v4144_v50  ;;  %4219 = vmatpush3.bf16.msra.mxu1 %v4604_v28  ;;  %v3346_v28 = vld [vmem:[%s6054_s1 + $0x290] sm:$0xff]  ;;  %v265_v50 = vld [vmem:[%s6054_s1 + $0xc0] sm:$0xff] }
  0xbc   : > { %3882 = vmatmul.mubr.msk.f32.gmra.mrb[14].mxu0 %vm371_vm0, %v3343_v51  ;;  %3745 = vmatmul.mubr.msk.f32.gmra.mrb[8].mxu1 %vm371_vm0, %v3241_v52  ;;  %v3407_v51 = vld [vmem:[%s6054_s1 + $0x378] sm:$0xff]  ;;  %v266_v52 = vld [vmem:[%s6054_s1 + $0xc8] sm:$0xff] }
  0xbd   : > { %3884 = vmatprep.mubr.msk.f32.mxu0 %vm371_vm0, %v3344_v26  ;;  %3747 = vmatprep.mubr.msk.f32.mxu1 %vm371_vm0, %v3242_v53  ;;  %v3408_v26 = vld [vmem:[%s6054_s1 + $0x380] sm:$0xff]  ;;  %v267_v53 = vld [vmem:[%s6054_s1 + $0xd0] sm:$0xff] }
  0xbe   : > { %2694 = vperm.xlu1 %4449, %v4821_v37   ;;  %2699 = vperm.xlu0 %4448, %v4830_v43  }
  0xc0   : > { %3885 = vmatmul.mubr.msk.f32.gmra.mrb[16].mxu0 %vm371_vm0, %v3345_v54  ;;  %3748 = vmatmul.mubr.msk.f32.gmra.mrb[10].mxu1 %vm371_vm0, %v3243_v55  ;;  %v3409_v54 = vld [vmem:[%s6054_s1 + $0x388] sm:$0xff]  ;;  %v268_v55 = vld [vmem:[%s6054_s1 + $0xd8] sm:$0xff] }
  0xc1   : > { %3887 = vmatprep.mubr.msk.f32.mxu0 %vm371_vm0, %v3346_v28  ;;  %3750 = vmatprep.mubr.msk.f32.mxu1 %vm371_vm0, %v3244_v56  ;;  %v3410_v28 = vld [vmem:[%s6054_s1 + $0x390] sm:$0xff]  ;;  %v269_v56 = vld [vmem:[%s6054_s1 + $0xe0] sm:$0xff] }
  0xc2   : > { %2929 = vperm.xlu1 %4449, %v4785_v15   ;;  %2934 = vperm.xlu0 %4448, %v4790_v16   ;;  %v3350_v15 = vld [vmem:[%s6054_s1 + $0x2b0] sm:$0xff]  ;;  %v3248_v16 = vld [vmem:[%s6054_s1 + $0x180] sm:$0xff] }
  0xc4   : > { %3888 = vmatmul.mubr.msk.f32.gmra.mrb[18].mxu0 %vm371_vm0, %v3347_v57  ;;  %3751 = vmatmul.mubr.msk.f32.gmra.mrb[12].mxu1 %vm371_vm0, %v3245_v58  ;;  %v3411_v57 = vld [vmem:[%s6054_s1 + $0x398] sm:$0xff]  ;;  %v270_v58 = vld [vmem:[%s6054_s1 + $0xe8] sm:$0xff] }
  0xc5   : > { %3890 = vmatprep.mubr.msk.f32.mxu0 %vm371_vm0, %v3348_v59  ;;  %3753 = vmatprep.mubr.msk.f32.mxu1 %vm371_vm0, %v3246_v60  ;;  %v3412_v59 = vld [vmem:[%s6054_s1 + $0x3a0] sm:$0xff]  ;;  %v271_v60 = vld [vmem:[%s6054_s1 + $0xf0] sm:$0xff] }
  0xc6   : > { %2939 = vperm.xlu1 %4449, %v4797_v17   ;;  %2944 = vperm.xlu0 %4448, %v4802_v21   ;;  %v3352_v17 = vld [vmem:[%s6054_s1 + $0x2c0] sm:$0xff]  ;;  %v3250_v21 = vld [vmem:[%s6054_s1 + $0x190] sm:$0xff] }
  0xc8   : > { %3891 = vmatmul.mubr.msk.f32.gmra.mrb[20].mxu0 %vm371_vm0, %v3349_v61  ;;  %3754 = vmatmul.mubr.msk.f32.gmra.mrb[14].mxu1 %vm371_vm0, %v3247_v62  ;;  %v3413_v61 = vld [vmem:[%s6054_s1 + $0x3a8] sm:$0xff]  ;;  %v272_v62 = vld [vmem:[%s6054_s1 + $0xf8] sm:$0xff] }
  0xc9   : > { %3893 = vmatprep.mubr.msk.f32.mxu0 %vm371_vm0, %v3350_v15  ;;  %3756 = vmatprep.mubr.msk.f32.mxu1 %vm371_vm0, %v3248_v16  ;;  %v3414_v15 = vld [vmem:[%s6054_s1 + $0x3b0] sm:$0xff]  ;;  %v3415_v16 = vld [vmem:[%s6054_s1 + $0x3b8] sm:$0xff] }
  0xca   : > { %2949 = vperm.xlu1 %4449, %v4809_v23   ;;  %2954 = vperm.xlu0 %4448, %v4814_v31   ;;  %v3354_v23 = vld [vmem:[%s6054_s1 + $0x2d0] sm:$0xff]  ;;  %v3252_v31 = vld [vmem:[%s6054_s1 + $0x1a0] sm:$0xff] }
  0xcc   : > { %3894 = vmatmul.mubr.msk.f32.gmra.mrb[22].mxu0 %vm371_vm0, %v3351_v63  ;;  %3757 = vmatmul.mubr.msk.f32.gmra.mrb[16].mxu1 %vm371_vm0, %v3249_v0  ;;  %v3416_v63 = vld [vmem:[%s6054_s1 + $0x3c0] sm:$0xff]  ;;  %v3417_v0 = vld [vmem:[%s6054_s1 + $0x3c8] sm:$0xff] }
  0xcd   : > { %3896 = vmatprep.mubr.msk.f32.mxu0 %vm371_vm0, %v3352_v17  ;;  %3759 = vmatprep.mubr.msk.f32.mxu1 %vm371_vm0, %v3250_v21  ;;  %v3418_v17 = vld [vmem:[%s6054_s1 + $0x3d0] sm:$0xff]  ;;  %v3419_v21 = vld [vmem:[%s6054_s1 + $0x3d8] sm:$0xff] }
  0xce   : > { %2959 = vperm.xlu1 %4449, %v4821_v37   ;;  %2964 = vperm.xlu0 %4448, %v4830_v43   ;;  %v3356_v37 = vld [vmem:[%s6054_s1 + $0x2e0] sm:$0xff]  ;;  %v3254_v43 = vld [vmem:[%s6054_s1 + $0x1b0] sm:$0xff] }
  0xd0   : > { %3897 = vmatmul.mubr.msk.f32.gmra.mrb[24].mxu0 %vm371_vm0, %v3353_v1  ;;  %3760 = vmatmul.mubr.msk.f32.gmra.mrb[18].mxu1 %vm371_vm0, %v3251_v2  ;;  %v3420_v1 = vld [vmem:[%s6054_s1 + $0x3e0] sm:$0xff]  ;;  %v3421_v2 = vld [vmem:[%s6054_s1 + $0x3e8] sm:$0xff] }
  0xd1   : > { %3899 = vmatprep.mubr.msk.f32.mxu0 %vm371_vm0, %v3354_v23  ;;  %3762 = vmatprep.mubr.msk.f32.mxu1 %vm371_vm0, %v3252_v31  ;;  %v3422_v23 = vld [vmem:[%s6054_s1 + $0x3f0] sm:$0xff]  ;;  %v3423_v31 = vld [vmem:[%s6054_s1 + $0x3f8] sm:$0xff] }
  0xd4   : > { %3900 = vmatmul.mubr.msk.f32.gmra.mrb[26].mxu0 %vm371_vm0, %v3355_v3  ;;  %3763 = vmatmul.mubr.msk.f32.gmra.mrb[20].mxu1 %vm371_vm0, %v3253_v4  ;;  %v5329_v3 = vld [vmem:[%s6056_s3] sm:$0xff] }
  0xd5   : > { %3902 = vmatprep.mubr.msk.f32.mxu0 %vm371_vm0, %v3356_v37  ;;  %3765 = vmatprep.mubr.msk.f32.mxu1 %vm371_vm0, %v3254_v43 }
  0xd8   : > { %3903 = vmatmul.mubr.msk.f32.gmra.mrb[28].mxu0 %vm371_vm0, %v3357_v5  ;;  %3766 = vmatmul.mubr.msk.f32.gmra.mrb[22].mxu1 %vm371_vm0, %v3255_v6 }
  0xd9   : > { %3905 = vmatprep.mubr.msk.f32.mxu0 %vm371_vm0, %v3358_v7  ;;  %3768 = vmatprep.mubr.msk.f32.mxu1 %vm371_vm0, %v3256_v8 }
  0xdc   : > { %3906 = vmatmul.mubr.msk.f32.gmra.mrb[30].mxu0 %vm371_vm0, %v3359_v9  ;;  %3769 = vmatmul.mubr.msk.f32.gmra.mrb[24].mxu1 %vm371_vm0, %v3257_v10 }
  0xdd   : > { %3924 = vmatprep.mubr.msk.f32.mxu0 %vm371_vm0, %v3392_v11  ;;  %3771 = vmatprep.mubr.msk.f32.mxu1 %vm371_vm0, %v3258_v12  ;;  %v1924_v12 = vpop.permute.xlu1 %1923 }
  0xe0   : > { %3925 = vmatmul.mubr.msk.f32.vlgmr.msra.gmra.mrb[0].mxu0 %vm371_vm0, %v3393_v13  ;;  %3772 = vmatmul.mubr.msk.f32.gmra.mrb[26].mxu1 %vm371_vm0, %v3259_v14  ;;  %v1919_v13 = vpop.permute.xlu0 %1918 }
  0xe1   : > { %3927 = vmatprep.mubr.msk.f32.mxu0 %vm371_vm0, %v3394_v20  ;;  %3774 = vmatprep.mubr.msk.f32.mxu1 %vm371_vm0, %v3260_v22  ;;  %v1929_v22 = vpop.permute.xlu1 %1928 }
  0xe4   : > { %3928 = vmatmul.mubr.msk.f32.gmra.mrb[2].mxu0 %vm371_vm0, %v3395_v24  ;;  %3775 = vmatmul.mubr.msk.f32.gmra.mrb[28].mxu1 %vm371_vm0, %v3261_v25  ;;  %v1934_v25 = vpop.permute.xlu0 %1933 }
  0xe5   : > { %3930 = vmatprep.mubr.msk.f32.mxu0 %vm371_vm0, %v3396_v27  ;;  %3777 = vmatprep.mubr.msk.f32.mxu1 %vm371_vm0, %v3262_v29 }
  0xe8   : > { %3931 = vmatmul.mubr.msk.f32.gmra.mrb[4].mxu0 %vm371_vm0, %v3397_v30  ;;  %3778 = vmatmul.mubr.msk.f32.gmra.mrb[30].mxu1 %vm371_vm0, %v3263_v32  ;;  %v1939_v32 = vpop.permute.xlu1 %1938 }
  0xe9   : > { %3933 = vmatprep.mubr.msk.f32.mxu0 %vm371_vm0, %v3398_v18  ;;  %3820 = vmatprep.mubr.msk.f32.mxu1 %vm371_vm0, %v257_v33  ;;  %v1944_v18 = vpop.permute.xlu0 %1943 }
  0xec   : > { %3934 = vmatmul.mubr.msk.f32.gmra.mrb[6].mxu0 %vm371_vm0, %v3399_v34  ;;  %3821 = vmatmul.mubr.msk.f32.vlgmr.msra.gmra.mrb[16].mxu1 %vm371_vm0, %v258_v35  ;;  %v1949_v33 = vpop.permute.xlu1 %1948 }
  0xed   : > { %3936 = vmatprep.mubr.msk.f32.mxu0 %vm371_vm0, %v3400_v36  ;;  %3823 = vmatprep.mubr.msk.f32.mxu1 %vm371_vm0, %v259_v38  ;;  %v1954_v34 = vpop.permute.xlu0 %1953 }
  0xf0   : > { %3937 = vmatmul.mubr.msk.f32.gmra.mrb[8].mxu0 %vm371_vm0, %v3401_v39  ;;  %3824 = vmatmul.mubr.msk.f32.gmra.mrb[18].mxu1 %vm371_vm0, %v260_v40  ;;  %v1959_v35 = vpop.permute.xlu1 %1958 }
  0xf1   : > { %3939 = vmatprep.mubr.msk.f32.mxu0 %vm371_vm0, %v3402_v41  ;;  %3826 = vmatprep.mubr.msk.f32.mxu1 %vm371_vm0, %v261_v42  ;;  %v1964_v36 = vpop.permute.xlu0 %1963 }
  0xf4   : > { %3940 = vmatmul.mubr.msk.f32.gmra.mrb[10].mxu0 %vm371_vm0, %v3403_v44  ;;  %3827 = vmatmul.mubr.msk.f32.gmra.mrb[20].mxu1 %vm371_vm0, %v262_v45  ;;  %v5349_v38 = vpop.permute.xlu1 %1968 }
  0xf5   : > { %3942 = vmatprep.mubr.msk.f32.mxu0 %vm371_vm0, %v3404_v46  ;;  %3829 = vmatprep.mubr.msk.f32.mxu1 %vm371_vm0, %v263_v47  ;;  %v5351_v39 = vpop.permute.xlu0 %1973 }
  0xf8   : > { %3943 = vmatmul.mubr.msk.f32.gmra.mrb[12].mxu0 %vm371_vm0, %v3405_v19  ;;  %3830 = vmatmul.mubr.msk.f32.gmra.mrb[22].mxu1 %vm371_vm0, %v264_v48  ;;  %v5353_v44 = vpop.permute.xlu1 %1978 }
  0xf9   : > { %3945 = vmatprep.mubr.msk.f32.mxu0 %vm371_vm0, %v3406_v49  ;;  %3832 = vmatprep.mubr.msk.f32.mxu1 %vm371_vm0, %v265_v50  ;;  %v5355_v46 = vpop.permute.xlu0 %1983 }
  0xfc   : > { %3946 = vmatmul.mubr.msk.f32.gmra.mrb[14].mxu0 %vm371_vm0, %v3407_v51  ;;  %3833 = vmatmul.mubr.msk.f32.gmra.mrb[24].mxu1 %vm371_vm0, %v266_v52 }
  0xfd   : > { %3948 = vmatprep.mubr.msk.f32.mxu0 %vm371_vm0, %v3408_v26  ;;  %3835 = vmatprep.mubr.msk.f32.mxu1 %vm371_vm0, %v267_v53 }
 0x100   : > { %3949 = vmatmul.mubr.msk.f32.gmra.mrb[16].mxu0 %vm371_vm0, %v3409_v54  ;;  %3836 = vmatmul.mubr.msk.f32.gmra.mrb[26].mxu1 %vm371_vm0, %v268_v55  ;;  %v5367_v54 = vpop.permute.xlu1 %1988 }
 0x101   : > { %3951 = vmatprep.mubr.msk.f32.mxu0 %vm371_vm0, %v3410_v28  ;;  %3838 = vmatprep.mubr.msk.f32.mxu1 %vm371_vm0, %v269_v56 }
 0x104   : > { %3952 = vmatmul.mubr.msk.f32.gmra.mrb[18].mxu0 %vm371_vm0, %v3411_v57  ;;  %3839 = vmatmul.mubr.msk.f32.gmra.mrb[28].mxu1 %vm371_vm0, %v270_v58  ;;  %v5371_v57 = vpop.permute.xlu0 %1993 }
 0x105   : > { %3954 = vmatprep.mubr.msk.f32.mxu0 %vm371_vm0, %v3412_v59  ;;  %3841 = vmatprep.mubr.msk.f32.mxu1 %vm371_vm0, %v271_v60 }
 0x108   : > { %3955 = vmatmul.mubr.msk.f32.gmra.mrb[20].mxu0 %vm371_vm0, %v3413_v61  ;;  %3842 = vmatmul.mubr.msk.f32.gmra.mrb[30].mxu1 %vm371_vm0, %v272_v62 }
 0x109   : > { %3957 = vmatprep.mubr.msk.f32.mxu0 %vm371_vm0, %v3414_v15  ;;  %3988 = vmatprep.mubr.msk.f32.mxu1 %vm371_vm0, %v5329_v3 }
 0x10c   : > { %3958 = vmatmul.mubr.msk.f32.gmra.mrb[22].mxu0 %vm371_vm0, %v3415_v16 }
 0x10d   : > { %3960 = vmatprep.mubr.msk.f32.mxu0 %vm371_vm0, %v3416_v63 }
 0x110   : > { %3961 = vmatmul.mubr.msk.f32.gmra.mrb[24].mxu0 %vm371_vm0, %v3417_v0 }
 0x111   : > { %3963 = vmatprep.mubr.msk.f32.mxu0 %vm371_vm0, %v3418_v17 }
 0x114   : > { %3964 = vmatmul.mubr.msk.f32.gmra.mrb[26].mxu0 %vm371_vm0, %v3419_v21 }
 0x115   : > { %3966 = vmatprep.mubr.msk.f32.mxu0 %vm371_vm0, %v3420_v1 }
 0x118   : > { %3967 = vmatmul.mubr.msk.f32.gmra.mrb[28].mxu0 %vm371_vm0, %v3421_v2 }
 0x119   : > { %3969 = vmatprep.mubr.msk.f32.mxu0 %vm371_vm0, %v3422_v23 }
 0x11c   : > { %3970 = vmatmul.mubr.msk.f32.gmra.mrb[30].mxu0 %vm371_vm0, %v3423_v31 }
 0x17f   : > { %v3734_v4 = vpop.f32.mrb[0].mxu1 }
 0x180   : > { %v534_v37 = vpop.f32.mrb[1].mxu1 }
 0x183   : > { %v3737_v43 = vpop.f32.mrb[2].mxu1 }
 0x184   : > { %v544_v5 = vpop.f32.mrb[3].mxu1 }
 0x187   : > { %v3740_v6 = vpop.f32.mrb[4].mxu1 }
 0x188   : > { %v554_v7 = vpop.f32.mrb[5].mxu1 }
 0x18b   : > { %v3743_v8 = vpop.f32.mrb[6].mxu1 }
 0x18c   : > { %v564_v9 = vpop.f32.mrb[7].mxu1 }
 0x18f   : > { %v5333_v10 = vpop.f32.mrb[8].mxu1 }
 0x190   : > { %v5335_v11 = vpop.f32.mrb[9].mxu1 }
 0x193   : > { %v5337_v14 = vpop.f32.mrb[10].mxu1 }
 0x194   : > { %v5339_v20 = vpop.f32.mrb[11].mxu1 }
 0x197   : > { %v5341_v24 = vpop.f32.mrb[12].mxu1 }
 0x198   : > { %v5343_v27 = vpop.f32.mrb[13].mxu1 }
 0x19b   : > { %v5345_v29 = vpop.f32.mrb[14].mxu1 }
 0x19c   : > { %v5347_v30 = vpop.f32.mrb[15].mxu1 }
 0x1b3   : > { %v3926_v40 = vpop.f32.mrb[0].mxu0 }
 0x1b4   : > { %v4220_v41 = vadd.f32 %v3926_v40, %v3734_v4  ;;  %v1693_v42 = vpop.f32.mrb[1].mxu0 }
 0x1b5   : > { %v4221_v45 = vadd.f32 %v1693_v42, %v534_v37  ;;  %v5389_v37 = vpop.permute.xlu1 %1998 }
 0x1b6   : > { %v5357_v47 = vadd.f32 %v4220_v41, %v1924_v12 }
 0x1b7   : > { %v5359_v19 = vadd.f32 %v4221_v45, %v1919_v13  ;;  %v3929_v48 = vpop.f32.mrb[2].mxu0 }
 0x1b8   : > { %v2117_v49 = vmul.f32 %v5357_v47, %v5357_v47  ;;  %v4222_v50 = vadd.f32 %v3929_v48, %v3737_v43  ;;  %v1703_v51 = vpop.f32.mrb[3].mxu0  ;;  %v5391_v43 = vpop.permute.xlu0 %2003 }
 0x1b9   : > { %v2116_v52 = vmul.f32 %v5359_v19, %v5359_v19  ;;  %v4223_v26 = vadd.f32 %v1703_v51, %v544_v5 }
 0x1ba   : > { %v5365_v53 = vadd.f32 %v4222_v50, %v1934_v25 }
 0x1bb   : > { %v5369_v55 = vadd.f32 %v4223_v26, %v1929_v22  ;;  %v3932_v28 = vpop.f32.mrb[4].mxu0  ;;  %v4148_v56 = vpack.c.bf16 %v2117_v49, %v2116_v52 }
 0x1bc   : > { %v2119_v58 = vmul.f32 %v5365_v53, %v5365_v53  ;;  %v4224_v59 = vadd.f32 %v3932_v28, %v3740_v6  ;;  %v1713_v60 = vpop.f32.mrb[5].mxu0  ;;  %v5423_v50 = vpop.permute.xlu0 %2013 }
 0x1bd   : > { %v2118_v61 = vmul.f32 %v5369_v55, %v5369_v55  ;;  %v4225_v62 = vadd.f32 %v1713_v60, %v554_v7  ;;  %4149 = vmatprep.subr.bf16.mxu1 %v4148_v56 }
 0x1be   : > { %v5377_v15 = vadd.f32 %v4224_v59, %v1944_v18  ;;  %4151 = vmatpush3.bf16.msra.mxu1 %v4148_v56  ;;  %v5441_v56 = vld [vmem:[%s6056_s3 + $0x10] sm:$0xff] }
 0x1bf   : > { %v5379_v16 = vadd.f32 %v4225_v62, %v1939_v32  ;;  %v3935_v63 = vpop.f32.mrb[6].mxu0  ;;  %v4152_v0 = vpack.c.bf16 %v2119_v58, %v2118_v61  ;;  %v5381_v17 = vpop.f32.mrb[16].mxu1 }
 0x1c0   : > { %v2121_v21 = vmul.f32 %v5377_v15, %v5377_v15  ;;  %v4226_v1 = vadd.f32 %v3935_v63, %v3743_v8  ;;  %v1723_v2 = vpop.f32.mrb[7].mxu0  ;;  %v5385_v23 = vpop.f32.mrb[17].mxu1 }
 0x1c1   : > { %v2120_v31 = vmul.f32 %v5379_v16, %v5379_v16  ;;  %v4227_v4 = vadd.f32 %v1723_v2, %v564_v9  ;;  %4153 = vmatprep.subr.bf16.mxu1 %v4152_v0 }
 0x1c2   : > { %v5393_v5 = vadd.f32 %v4226_v1, %v1954_v34  ;;  %4155 = vmatpush3.bf16.msra.mxu1 %v4152_v0 }
 0x1c3   : > { %v5395_v6 = vadd.f32 %v4227_v4, %v1949_v33  ;;  %v3938_v7 = vpop.f32.mrb[8].mxu0  ;;  %v4156_v12 = vpack.c.bf16 %v2121_v21, %v2120_v31  ;;  %v5397_v8 = vpop.f32.mrb[18].mxu1 }
 0x1c4   : > { %v2123_v13 = vmul.f32 %v5393_v5, %v5393_v5  ;;  %v4228_v22 = vadd.f32 %v3938_v7, %v5333_v10  ;;  %v1733_v9 = vpop.f32.mrb[9].mxu0  ;;  %v5402_v25 = vpop.f32.mrb[19].mxu1 }
 0x1c5   : > { %v2122_v32 = vmul.f32 %v5395_v6, %v5395_v6  ;;  %v4229_v18 = vadd.f32 %v1733_v9, %v5335_v11  ;;  %4157 = vmatprep.subr.bf16.mxu1 %v4156_v12 }
 0x1c6   : > { %v5407_v33 = vadd.f32 %v4228_v22, %v1964_v36  ;;  %4159 = vmatpush3.bf16.msra.mxu1 %v4156_v12 }
 0x1c7   : > { %v5409_v34 = vadd.f32 %v4229_v18, %v1959_v35  ;;  %v3941_v40 = vpop.f32.mrb[10].mxu0  ;;  %v4160_v41 = vpack.c.bf16 %v2123_v13, %v2122_v32  ;;  %v5411_v42 = vpop.f32.mrb[20].mxu1 }
 0x1c8   : > { %v2382_v10 = vmul.f32 %v5407_v33, %v5407_v33  ;;  %v4230_v45 = vadd.f32 %v3941_v40, %v5337_v14  ;;  %v1743_v48 = vpop.f32.mrb[11].mxu0  ;;  %v5416_v49 = vpop.f32.mrb[21].mxu1  ;;  %v5431_v14 = vld [vmem:[%s6056_s3 + $0x8] sm:$0xff] }
 0x1c9   : > { %v2381_v11 = vmul.f32 %v5409_v34, %v5409_v34  ;;  %v4231_v36 = vadd.f32 %v1743_v48, %v5339_v20  ;;  %4161 = vmatprep.subr.bf16.mxu1 %v4160_v41  ;;  %v5421_v35 = vpop.permute.xlu1 %2008  ;;  %v2024_v13 = vpop.permute.xlu0 %2023 }
 0x1ca   : > { %v5426_v51 = vadd.f32 %v4230_v45, %v5351_v39  ;;  %4163 = vmatpush3.bf16.msra.mxu1 %v4160_v41 }
 0x1cb   : > { %v5434_v52 = vadd.f32 %v4231_v36, %v5349_v38  ;;  %v3944_v26 = vpop.f32.mrb[12].mxu0  ;;  %v4164_v28 = vpack.c.bf16 %v2382_v10, %v2381_v11  ;;  %v5436_v20 = vpop.f32.mrb[22].mxu1 }
 0x1cc   : > { %v2384_v39 = vmul.f32 %v5426_v51, %v5426_v51  ;;  %v4232_v58 = vadd.f32 %v3944_v26, %v5341_v24  ;;  %v1753_v59 = vpop.f32.mrb[13].mxu0  ;;  %v5446_v60 = vpop.f32.mrb[23].mxu1  ;;  %v5461_v24 = vld [vmem:[%s6056_s3 + $0x18] sm:$0xff] }
 0x1cd   : > { %v2383_v38 = vmul.f32 %v5434_v52, %v5434_v52  ;;  %v4233_v61 = vadd.f32 %v1753_v59, %v5343_v27  ;;  %3989 = vmatmul.mubr.msk.f32.vlgmr.msra.gmra.mrb[32].mxu1 %vm371_vm0, %v5431_v14  ;;  %4165 = vmatprep.subr.bf16.mxu1 %v4164_v28  ;;  %v2019_v12 = vpop.permute.xlu1 %2018 }
 0x1ce   : > { %v5454_v62 = vadd.f32 %v4232_v58, %v5355_v46  ;;  %4167 = vmatpush3.bf16.msra.mxu1 %v4164_v28  ;;  %3991 = vmatprep.mubr.msk.f32.mxu1 %vm371_vm0, %v5441_v56  ;;  %v5471_v46 = vld [vmem:[%s6056_s3 + $0x20] sm:$0xff] }
 0x1cf   : > { %v5464_v63 = vadd.f32 %v4233_v61, %v5353_v44  ;;  %v3947_v27 = vpop.f32.mrb[14].mxu0  ;;  %v4168_v0 = vpack.c.bf16 %v2384_v39, %v2383_v38  ;;  %v5466_v21 = vpop.f32.mrb[24].mxu1 }
 0x1d0   : > { %v2386_v1 = vmul.f32 %v5454_v62, %v5454_v62  ;;  %v4234_v2 = vadd.f32 %v3947_v27, %v5345_v29  ;;  %v1763_v31 = vpop.f32.mrb[15].mxu0  ;;  %v5476_v4 = vpop.f32.mrb[25].mxu1  ;;  %v5491_v29 = vld [vmem:[%s6056_s3 + $0x28] sm:$0xff] }
 0x1d1   : > { %v2385_v44 = vmul.f32 %v5464_v63, %v5464_v63  ;;  %v4235_v7 = vadd.f32 %v1763_v31, %v5347_v30  ;;  %3992 = vmatmul.mubr.msk.f32.gmra.mrb[34].mxu1 %vm371_vm0, %v5461_v24  ;;  %4169 = vmatprep.subr.bf16.mxu1 %v4168_v0  ;;  %v2034_v38 = vpop.permute.xlu0 %2033 }
 0x1d2   : > { %v5484_v22 = vadd.f32 %v4234_v2, %v5371_v57  ;;  %4171 = vmatpush3.bf16.msra.mxu1 %v4168_v0  ;;  %3994 = vmatprep.mubr.msk.f32.mxu1 %vm371_vm0, %v5471_v46  ;;  %v5501_v57 = vld [vmem:[%s6056_s3 + $0x30] sm:$0xff] }
 0x1d3   : > { %v5494_v30 = vadd.f32 %v4235_v7, %v5367_v54  ;;  %v3950_v9 = vpop.f32.mrb[16].mxu0  ;;  %v4172_v32 = vpack.c.bf16 %v2386_v1, %v2385_v44  ;;  %v5496_v18 = vpop.f32.mrb[26].mxu1 }
 0x1d4   : > { %v2388_v40 = vmul.f32 %v5484_v22, %v5484_v22  ;;  %v4236_v41 = vadd.f32 %v3950_v9, %v5381_v17  ;;  %v1773_v10 = vpop.f32.mrb[17].mxu0  ;;  %v5506_v45 = vpop.f32.mrb[27].mxu1  ;;  %v5521_v17 = vld [vmem:[%s6056_s3 + $0x38] sm:$0xff] }
 0x1d5   : > { %v2387_v54 = vmul.f32 %v5494_v30, %v5494_v30  ;;  %v4237_v48 = vadd.f32 %v1773_v10, %v5385_v23  ;;  %3995 = vmatmul.mubr.msk.f32.gmra.mrb[36].mxu1 %vm371_vm0, %v5491_v29  ;;  %4173 = vmatprep.subr.bf16.mxu1 %v4172_v32 }
 0x1d6   : > { %v5514_v11 = vadd.f32 %v4236_v41, %v5391_v43  ;;  %4175 = vmatpush3.bf16.msra.mxu1 %v4172_v32  ;;  %3997 = vmatprep.mubr.msk.f32.mxu1 %vm371_vm0, %v5501_v57 }
 0x1d7   : > { %v5524_v36 = vadd.f32 %v4237_v48, %v5389_v37  ;;  %v3953_v23 = vpop.f32.mrb[18].mxu0  ;;  %v4176_v26 = vpack.c.bf16 %v2388_v40, %v2387_v54  ;;  %v5526_v28 = vpop.f32.mrb[28].mxu1 }
 0x1d8   : > { %v2647_v43 = vmul.f32 %v5514_v11, %v5514_v11  ;;  %v4238_v39 = vadd.f32 %v3953_v23, %v5397_v8  ;;  %v1783_v58 = vpop.f32.mrb[19].mxu0  ;;  %v5531_v59 = vpop.f32.mrb[29].mxu1 }
 0x1d9   : > { %v2646_v61 = vmul.f32 %v5524_v36, %v5524_v36  ;;  %v4239_v27 = vadd.f32 %v1783_v58, %v5402_v25  ;;  %3998 = vmatmul.mubr.msk.f32.gmra.mrb[38].mxu1 %vm371_vm0, %v5521_v17  ;;  %4177 = vmatprep.subr.bf16.mxu1 %v4176_v26  ;;  %v2029_v37 = vpop.permute.xlu1 %2028  ;;  %v2044_v40 = vpop.permute.xlu0 %2043 }
 0x1da   : > { %v5539_v0 = vadd.f32 %v4238_v39, %v5423_v50  ;;  %4179 = vmatpush3.bf16.msra.mxu1 %v4176_v26  ;;  %4016 = vmatprep.mubr.msk.f32.mxu1 %vm371_vm0, %v5329_v3 }
 0x1db   : > { %v5544_v8 = vadd.f32 %v4239_v27, %v5421_v35  ;;  %v3956_v1 = vpop.f32.mrb[20].mxu0  ;;  %v4180_v2 = vpack.c.bf16 %v2647_v43, %v2646_v61  ;;  %v5546_v31 = vpop.f32.mrb[30].mxu1 }
 0x1dc   : > { %v2649_v25 = vmul.f32 %v5539_v0, %v5539_v0  ;;  %v4240_v44 = vadd.f32 %v3956_v1, %v5411_v42  ;;  %v1793_v7 = vpop.f32.mrb[21].mxu0  ;;  %v5551_v9 = vpop.f32.mrb[31].mxu1 }
 0x1dd   : > { %v2648_v50 = vmul.f32 %v5544_v8, %v5544_v8  ;;  %v4241_v32 = vadd.f32 %v1793_v7, %v5416_v49  ;;  %4017 = vmatmul.mubr.msk.f32.vlgmr.msra.gmra.mrb[40].mxu1 %vm371_vm0, %v5431_v14  ;;  %4181 = vmatprep.subr.bf16.mxu1 %v4180_v2  ;;  %v2039_v54 = vpop.permute.xlu1 %2038  ;;  %v2054_v27 = vpop.permute.xlu0 %2053 }
 0x1de   : > { %v5558_v35 = vadd.f32 %v4240_v44, %v2024_v13  ;;  %4183 = vmatpush3.bf16.msra.mxu1 %v4180_v2  ;;  %4019 = vmatprep.mubr.msk.f32.mxu1 %vm371_vm0, %v5441_v56 }
 0x1df   : > { %v5562_v42 = vadd.f32 %v4241_v32, %v2019_v12  ;;  %v3959_v41 = vpop.f32.mrb[22].mxu0  ;;  %v4184_v10 = vpack.c.bf16 %v2649_v25, %v2648_v50 }
 0x1e0   : > { %v2651_v48 = vmul.f32 %v5558_v35, %v5558_v35  ;;  %v4242_v49 = vadd.f32 %v3959_v41, %v5436_v20  ;;  %v1803_v23 = vpop.f32.mrb[23].mxu0 }
 0x1e1   : > { %v2650_v13 = vmul.f32 %v5562_v42, %v5562_v42  ;;  %v4243_v26 = vadd.f32 %v1803_v23, %v5446_v60  ;;  %4020 = vmatmul.mubr.msk.f32.gmra.mrb[42].mxu1 %vm371_vm0, %v5461_v24  ;;  %4185 = vmatprep.subr.bf16.mxu1 %v4184_v10 }
 0x1e2   : > { %v5572_v12 = vadd.f32 %v4242_v49, %v2034_v38  ;;  %4187 = vmatpush3.bf16.msra.mxu1 %v4184_v10  ;;  %4022 = vmatprep.mubr.msk.f32.mxu1 %vm371_vm0, %v5471_v46  ;;  %v2064_v10 = vpop.permute.xlu0 %2063 }
 0x1e3   : > { %v5576_v43 = vadd.f32 %v4243_v26, %v2029_v37  ;;  %v3962_v39 = vpop.f32.mrb[24].mxu0  ;;  %v4188_v20 = vpack.c.bf16 %v2651_v48, %v2650_v13  ;;  %v2049_v37 = vpop.permute.xlu1 %2048 }
 0x1e4   : > { %v2653_v58 = vmul.f32 %v5572_v12, %v5572_v12  ;;  %v4244_v61 = vadd.f32 %v3962_v39, %v5466_v21  ;;  %v1813_v60 = vpop.f32.mrb[25].mxu0 }
 0x1e5   : > { %v2652_v1 = vmul.f32 %v5576_v43, %v5576_v43  ;;  %v4245_v38 = vadd.f32 %v1813_v60, %v5476_v4  ;;  %4023 = vmatmul.mubr.msk.f32.gmra.mrb[44].mxu1 %vm371_vm0, %v5491_v29  ;;  %4189 = vmatprep.subr.bf16.mxu1 %v4188_v20 }
 0x1e6   : > { %v5586_v2 = vadd.f32 %v4244_v61, %v2044_v40  ;;  %4191 = vmatpush3.bf16.msra.mxu1 %v4188_v20  ;;  %4025 = vmatprep.mubr.msk.f32.mxu1 %vm371_vm0, %v5501_v57 }
 0x1e7   : > { %v5590_v25 = vadd.f32 %v4245_v38, %v2039_v54  ;;  %v3965_v21 = vpop.f32.mrb[26].mxu0  ;;  %v4192_v44 = vpack.c.bf16 %v2653_v58, %v2652_v1  ;;  %v2059_v49 = vpop.permute.xlu1 %2058 }
 0x1e8   : > { %v2912_v7 = vmul.f32 %v5586_v2, %v5586_v2  ;;  %v4246_v4 = vadd.f32 %v3965_v21, %v5496_v18  ;;  %v1823_v50 = vpop.f32.mrb[27].mxu0  ;;  %v2074_v1 = vpop.permute.xlu0 %2073 }
 0x1e9   : > { %v2911_v32 = vmul.f32 %v5590_v25, %v5590_v25  ;;  %v4247_v40 = vadd.f32 %v1823_v50, %v5506_v45  ;;  %4026 = vmatmul.mubr.msk.f32.gmra.mrb[46].mxu1 %vm371_vm0, %v5521_v17  ;;  %4193 = vmatprep.subr.bf16.mxu1 %v4192_v44 }
 0x1ea   : > { %v5600_v41 = vadd.f32 %v4246_v4, %v2054_v27  ;;  %4195 = vmatpush3.bf16.msra.mxu1 %v4192_v44  ;;  %4044 = vmatprep.mubr.msk.f32.mxu1 %vm371_vm0, %v5329_v3 }
 0x1eb   : > { %v5604_v54 = vadd.f32 %v4247_v40, %v2049_v37  ;;  %v3968_v18 = vpop.f32.mrb[28].mxu0  ;;  %v4196_v48 = vpack.c.bf16 %v2912_v7, %v2911_v32  ;;  %v2069_v21 = vpop.permute.xlu1 %2068 }
 0x1ec   : > { %v2914_v23 = vmul.f32 %v5600_v41, %v5600_v41  ;;  %v4248_v45 = vadd.f32 %v3968_v18, %v5526_v28  ;;  %v1833_v13 = vpop.f32.mrb[29].mxu0 }
 0x1ed   : > { %v2913_v26 = vmul.f32 %v5604_v54, %v5604_v54  ;;  %v4249_v39 = vadd.f32 %v1833_v13, %v5531_v59  ;;  %4045 = vmatmul.mubr.msk.f32.vlgmr.msra.gmra.mrb[48].mxu1 %vm371_vm0, %v5431_v14  ;;  %4197 = vmatprep.subr.bf16.mxu1 %v4196_v48 }
 0x1ee   : > { %v5614_v20 = vadd.f32 %v4248_v45, %v2064_v10  ;;  %4199 = vmatpush3.bf16.msra.mxu1 %v4196_v48  ;;  %4047 = vmatprep.mubr.msk.f32.mxu1 %vm371_vm0, %v5441_v56 }
 0x1ef   : > { %v5618_v58 = vadd.f32 %v4249_v39, %v2059_v49  ;;  %v3971_v61 = vpop.f32.mrb[30].mxu0  ;;  %v4200_v28 = vpack.c.bf16 %v2914_v23, %v2913_v26 }
 0x1f0   : > { %v2916_v60 = vmul.f32 %v5614_v20, %v5614_v20  ;;  %v4250_v27 = vadd.f32 %v3971_v61, %v5546_v31  ;;  %v1843_v59 = vpop.f32.mrb[31].mxu0 }
 0x1f1   : > { %v2915_v38 = vmul.f32 %v5618_v58, %v5618_v58  ;;  %v4251_v37 = vadd.f32 %v1843_v59, %v5551_v9  ;;  %4048 = vmatmul.mubr.msk.f32.gmra.mrb[50].mxu1 %vm371_vm0, %v5461_v24  ;;  %4201 = vmatprep.subr.bf16.mxu1 %v4200_v28 }
 0x1f2   : > { %v5628_v44 = vadd.f32 %v4250_v27, %v2074_v1  ;;  %4203 = vmatpush3.bf16.msra.mxu1 %v4200_v28  ;;  %4050 = vmatprep.mubr.msk.f32.mxu1 %vm371_vm0, %v5471_v46 }
 0x1f3   : > { %v5632_v7 = vadd.f32 %v4251_v37, %v2069_v21  ;;  %v4204_v31 = vpack.c.bf16 %v2916_v60, %v2915_v38 }
 0x1f4   : > { %v2918_v4 = vmul.f32 %v5628_v44, %v5628_v44 }
 0x1f5   : > { %v2917_v9 = vmul.f32 %v5632_v7, %v5632_v7  ;;  %4051 = vmatmul.mubr.msk.f32.gmra.mrb[52].mxu1 %vm371_vm0, %v5491_v29  ;;  %4205 = vmatprep.subr.bf16.mxu1 %v4204_v31 }
 0x1f6   : > { %4207 = vmatpush3.bf16.msra.mxu1 %v4204_v31  ;;  %4053 = vmatprep.mubr.msk.f32.mxu1 %vm371_vm0, %v5501_v57 }
 0x1f7   : > { %v4208_v50 = vpack.c.bf16 %v2918_v4, %v2917_v9 }
 0x1f9   : > { %4054 = vmatmul.mubr.msk.f32.gmra.mrb[54].mxu1 %vm371_vm0, %v5521_v17  ;;  %4209 = vmatprep.subr.bf16.mxu1 %v4208_v50 }
 0x1fa   : > { %4211 = vmatpush3.bf16.msra.mxu1 %v4208_v50  ;;  %4072 = vmatprep.mubr.msk.f32.mxu1 %vm371_vm0, %v5329_v3  ;;  %v2140_v3 = vpop.permute.xlu0 %2139 }
 0x1fd   : > { %4073 = vmatmul.mubr.msk.f32.vlgmr.msra.gmra.mrb[56].mxu1 %vm371_vm0, %v5431_v14  ;;  %v2135_v14 = vpop.permute.xlu1 %2134 }
 0x1fe   : > { %4075 = vmatprep.mubr.msk.f32.mxu1 %vm371_vm0, %v5441_v56  ;;  %v2150_v32 = vpop.permute.xlu0 %2149 }
 0x201   : > { %4076 = vmatmul.mubr.msk.f32.gmra.mrb[58].mxu1 %vm371_vm0, %v5461_v24  ;;  %v2145_v40 = vpop.permute.xlu1 %2144 }
 0x202   : > { %4078 = vmatprep.mubr.msk.f32.mxu1 %vm371_vm0, %v5471_v46  ;;  %v2160_v56 = vpop.permute.xlu0 %2159 }
 0x205   : > { %4079 = vmatmul.mubr.msk.f32.gmra.mrb[60].mxu1 %vm371_vm0, %v5491_v29  ;;  %v2155_v10 = vpop.permute.xlu1 %2154 }
 0x206   : > { %4081 = vmatprep.mubr.msk.f32.mxu1 %vm371_vm0, %v5501_v57  ;;  %v2170_v18 = vpop.permute.xlu0 %2169 }
 0x209   : > { %4082 = vmatmul.mubr.msk.f32.gmra.mrb[62].mxu1 %vm371_vm0, %v5521_v17  ;;  %v2165_v24 = vpop.permute.xlu1 %2164 }
 0x20a   : > { %v2405_v48 = vpop.permute.xlu0 %2404 }
 0x20d   : > { %v2400_v29 = vpop.permute.xlu1 %2399 }
 0x20e   : > { %v5660_v13 = vpop.permute.xlu0 %2414 }
 0x211   : > { %v5668_v28 = vpop.permute.xlu1 %2409 }
 0x212   : > { %v5674_v1 = vpop.permute.xlu0 %2424 }
 0x2a0   : > { %v3990_v49 = vpop.f32.mrb[32].mxu1 }
 0x2a1   : > { %v2268_v46 = vadd.f32 %v3990_v49, %v2140_v3  ;;  %v2262_v23 = vpop.f32.mrb[33].mxu1 }
 0x2a2   : > { %v2263_v45 = vadd.f32 %v2262_v23, %v2135_v14  ;;  %v5683_v14 = vpop.permute.xlu1 %2419 }
 0x2a3   : > { %4450 = vrsqrt.f32 %v2268_v46  ;;  %vm2310_vm4 = vcmp.eq.f32.partialorder %v2268_v46, inf  ;;  %vm2312_vm5 = vcmp.eq.f32.partialorder %v2268_v46, 0.0  ;;  %v2313_v50 = vand.u32 2147483648, %v2268_v46 }
 0x2a4   : > { %4452 = vrsqrt.f32 %v2263_v45  ;;  %v3993_v57 = vpop.f32.mrb[34].mxu1  ;;  %vm2303_vm6 = vcmp.eq.f32.partialorder %v2263_v45, inf  ;;  %vm2305_vm7 = vcmp.eq.f32.partialorder %v2263_v45, 0.0 }
 0x2a5   : > { %v5662_v17 = vadd.f32 %v3993_v57, %v2150_v32  ;;  %v2272_v26 = vpop.f32.mrb[35].mxu1 }
 0x2a6   : > { %v5664_v39 = vadd.f32 %v2272_v26, %v2145_v40  ;;  %v2306_v40 = vand.u32 2147483648, %v2263_v45 }
 0x2a7   : > { %4454 = vrsqrt.f32 %v5662_v17  ;;  %vm2324_vm8 = vcmp.eq.f32.partialorder %v5662_v17, inf  ;;  %vm2326_vm9 = vcmp.eq.f32.partialorder %v5662_v17, 0.0  ;;  %v2327_v57 = vand.u32 2147483648, %v5662_v17 }
 0x2a8   : > { %4456 = vrsqrt.f32 %v5664_v39  ;;  %v3996_v61 = vpop.f32.mrb[36].mxu1  ;;  %vm2317_vm10 = vcmp.eq.f32.partialorder %v5664_v39, inf  ;;  %vm2319_vm11 = vcmp.eq.f32.partialorder %v5664_v39, 0.0 }
 0x2a9   : > { %v5670_v60 = vadd.f32 %v3996_v61, %v2160_v56  ;;  %v2282_v27 = vpop.f32.mrb[37].mxu1 }
 0x2aa   : > { %v5672_v59 = vadd.f32 %v2282_v27, %v2155_v10 }
 0x2ab   : > { %4458 = vrsqrt.f32 %v5670_v60  ;;  %vm2338_vm12 = vcmp.eq.f32.partialorder %v5670_v60, inf  ;;  %vm2340_vm13 = vcmp.eq.f32.partialorder %v5670_v60, 0.0 }
 0x2ac   : > { %4460 = vrsqrt.f32 %v5672_v59  ;;  %v3999_v38 = vpop.f32.mrb[38].mxu1  ;;  %vm2331_vm14 = vcmp.eq.f32.partialorder %v5672_v59, inf  ;;  %vm2333_vm15 = vcmp.eq.f32.partialorder %v5672_v59, 0.0 }
 0x2ad   : > { %v4451_v37 = vpop.eup %4450  ;;  %v5678_v21 = vadd.f32 %v3999_v38, %v2170_v18  ;;  %v2292_v31 = vpop.f32.mrb[39].mxu1 }
 0x2ae   : > { %v4453_v4 = vpop.eup %4452  ;;  %v2309_v9 = vmul.f32 %v4451_v37, %v2268_v46  ;;  %v5681_v3 = vadd.f32 %v2292_v31, %v2165_v24  ;;  %v5694_v24 = vpop.permute.xlu0 %2434 }
 0x2af   : > { %v2302_v32 = vmul.f32 %v4453_v4, %v2263_v45  ;;  %4462 = vrsqrt.f32 %v5678_v21  ;;  %vm2352_vm0 = vcmp.eq.f32.partialorder %v5678_v21, inf  ;;  %vm2354_vm1 = vcmp.eq.f32.partialorder %v5678_v21, 0.0 }
 0x2b0   : > { %v2311_v56 = vsel %vm2310_vm4, %v2268_v46, %v2309_v9  ;;  %4464 = vrsqrt.f32 %v5681_v3  ;;  %v4018_v10 = vpop.f32.mrb[40].mxu1  ;;  %vm2345_vm2 = vcmp.eq.f32.partialorder %v5681_v3, inf  ;;  %vm2347_vm3 = vcmp.eq.f32.partialorder %v5681_v3, 0.0 }
 0x2b1   : > { %v4455_v18 = vpop.eup %4454  ;;  %v2314_v49 = vsel %vm2312_vm5, %v2313_v50, %v2311_v56  ;;  %v2304_v23 = vsel %vm2303_vm6, %v2263_v45, %v2302_v32  ;;  %v2527_v26 = vpop.f32.mrb[41].mxu1  ;;  %v5703_v31 = vadd.f32 %v4018_v10, %v2405_v48  ;;  %v2320_v45 = vand.u32 2147483648, %v5664_v39 }
 0x2b2   : > { %v4457_v61 = vpop.eup %4456  ;;  %v2358_v27 = vmul.f32 %v2314_v49, %v5357_v47  ;;  %v2307_v38 = vsel %vm2305_vm7, %v2306_v40, %v2304_v23  ;;  %v2323_v37 = vmul.f32 %v4455_v18, %v5662_v17  ;;  %v5708_v9 = vadd.f32 %v2527_v26, %v2400_v29  ;;  %v5732_v23 = vpop.permute.xlu0 %2669 }
 0x2b3   : > { %v2357_v46 = vmul.f32 %v2307_v38, %v5359_v19  ;;  %v2316_v4 = vmul.f32 %v4457_v61, %v5664_v39  ;;  %4466 = vrsqrt.f32 %v5703_v31  ;;  %v5717_v19 = vpop.permute.xlu1 %2429  ;;  %v2341_v49 = vand.u32 2147483648, %v5670_v60 }
 0x2b4   : > { %2366 = vst [vmem:[%s5692_s11 + $0x8] sm:$0xff] %v2358_v27  ;;  %v2325_v47 = vsel %vm2324_vm8, %v5662_v17, %v2323_v37  ;;  %v4021_v48 = vpop.f32.mrb[42].mxu1  ;;  %4468 = vrsqrt.f32 %v5708_v9  ;;  %vm2575_vm4 = vcmp.eq.f32.partialorder %v5703_v31, inf  ;;  %vm2577_vm5 = vcmp.eq.f32.partialorder %v5703_v31, 0.0 }
 0x2b5   : > { %v4459_v50 = vpop.eup %4458  ;;  %2365 = vst [vmem:[%s5692_s11] sm:$0xff] %v2357_v46  ;;  %v2328_v29 = vsel %vm2326_vm9, %v2327_v57, %v2325_v47  ;;  %v2318_v32 = vsel %vm2317_vm10, %v5664_v39, %v2316_v4  ;;  %v2537_v40 = vpop.f32.mrb[43].mxu1  ;;  %v2334_v39 = vand.u32 2147483648, %v5672_v59  ;;  %v5744_v61 = vadd.f32 %v4021_v48, %v5660_v13 }
 0x2b6   : > { %v4461_v56 = vpop.eup %4460  ;;  %v2360_v10 = vmul.f32 %v2328_v29, %v5365_v53  ;;  %v2321_v18 = vsel %vm2319_vm11, %v2320_v45, %v2318_v32  ;;  %v2337_v17 = vmul.f32 %v4459_v50, %v5670_v60  ;;  %v5747_v27 = vadd.f32 %v2537_v40, %v5668_v28  ;;  %v5773_v40 = vpop.permute.xlu0 %2679 }
 0x2b7   : > { %v2359_v57 = vmul.f32 %v2321_v18, %v5369_v55  ;;  %v2330_v26 = vmul.f32 %v4461_v56, %v5672_v59  ;;  %4470 = vrsqrt.f32 %v5744_v61  ;;  %vm2568_vm6 = vcmp.eq.f32.partialorder %v5708_v9, inf }
 0x2b8   : > { %2368 = vst [vmem:[%s5692_s11 + $0x18] sm:$0xff] %v2360_v10  ;;  %v2339_v53 = vsel %vm2338_vm12, %v5670_v60, %v2337_v17  ;;  %v4024_v55 = vpop.f32.mrb[44].mxu1  ;;  %v5762_v60 = vpop.permute.xlu1 %2664  ;;  %4472 = vrsqrt.f32 %v5747_v27  ;;  %vm2570_vm7 = vcmp.eq.f32.partialorder %v5708_v9, 0.0  ;;  %vm2589_vm8 = vcmp.eq.f32.partialorder %v5744_v61, inf }
 0x2b9   : > { %v4463_v38 = vpop.eup %4462  ;;  %2367 = vst [vmem:[%s5692_s11 + $0x10] sm:$0xff] %v2359_v57  ;;  %v2342_v37 = vsel %vm2340_vm13, %v2341_v49, %v2339_v53  ;;  %v2332_v46 = vsel %vm2331_vm14, %v5672_v59, %v2330_v26  ;;  %v5755_v4 = vadd.f32 %v4024_v55, %v5674_v1  ;;  %v2547_v47 = vpop.f32.mrb[45].mxu1  ;;  %v2355_v1 = vand.u32 2147483648, %v5678_v21 }
 0x2ba   : > { %v4465_v13 = vpop.eup %4464  ;;  %v2362_v45 = vmul.f32 %v2342_v37, %v5377_v15  ;;  %v2335_v28 = vsel %vm2333_vm15, %v2334_v39, %v2332_v46  ;;  %v2351_v48 = vmul.f32 %v4463_v38, %v5678_v21  ;;  %v2348_v59 = vand.u32 2147483648, %v5681_v3 }
 0x2bb   : > { %v2361_v50 = vmul.f32 %v2335_v28, %v5379_v16  ;;  %v2344_v29 = vmul.f32 %v4465_v13, %v5681_v3  ;;  %4474 = vrsqrt.f32 %v5755_v4  ;;  %v2578_v53 = vand.u32 2147483648, %v5703_v31 }
 0x2bc   : > { %2370 = vst [vmem:[%s5692_s11 + $0x28] sm:$0xff] %v2362_v45  ;;  %v2353_v15 = vsel %vm2352_vm0, %v5678_v21, %v2351_v48  ;;  %v4027_v32 = vpop.f32.mrb[46].mxu1  ;;  %v2675_v38 = vpop.permute.xlu1 %2674  ;;  %v2571_v37 = vand.u32 2147483648, %v5708_v9  ;;  %vm2591_vm9 = vcmp.eq.f32.partialorder %v5744_v61, 0.0  ;;  %vm2582_vm10 = vcmp.eq.f32.partialorder %v5747_v27, inf }
 0x2bd   : > { %2369 = vst [vmem:[%s5692_s11 + $0x20] sm:$0xff] %v2361_v50  ;;  %v2356_v16 = vsel %vm2354_vm1, %v2355_v1, %v2353_v15  ;;  %v2346_v56 = vsel %vm2345_vm2, %v5681_v3, %v2344_v29  ;;  %v2557_v10 = vpop.f32.mrb[47].mxu1  ;;  %v4467_v18 = vpop.eup %4466  ;;  %v5792_v39 = vadd.f32 %v4027_v32, %v5694_v24  ;;  %vm2584_vm11 = vcmp.eq.f32.partialorder %v5747_v27, 0.0 }
 0x2be   : > { %v2364_v21 = vmul.f32 %v2356_v16, %v5393_v5  ;;  %v2349_v17 = vsel %vm2347_vm3, %v2348_v59, %v2346_v56  ;;  %v4469_v49 = vpop.eup %4468  ;;  %v2574_v26 = vmul.f32 %v4467_v18, %v5703_v31  ;;  %v5789_v5 = vadd.f32 %v2547_v47, %v5683_v14  ;;  %v2690_v47 = vpop.permute.xlu0 %2689 }
 0x2bf   : > { %v2363_v57 = vmul.f32 %v2349_v17, %v5395_v6  ;;  %v2567_v3 = vmul.f32 %v4469_v49, %v5708_v9  ;;  %v5799_v46 = vadd.f32 %v2557_v10, %v5717_v19  ;;  %vm2603_vm12 = vcmp.eq.f32.partialorder %v5755_v4, inf }
 0x2c0   : > { %2372 = vst [vmem:[%s5692_s11 + $0x38] sm:$0xff] %v2364_v21  ;;  %v4046_v55 = vpop.f32.mrb[48].mxu1  ;;  %v2576_v6 = vsel %vm2575_vm4, %v5703_v31, %v2574_v26  ;;  %4476 = vrsqrt.f32 %v5789_v5  ;;  %v2685_v29 = vpop.permute.xlu1 %2684  ;;  %vm2605_vm13 = vcmp.eq.f32.partialorder %v5755_v4, 0.0  ;;  %v2606_v32 = vand.u32 2147483648, %v5755_v4 }
 0x2c1   : > { %2371 = vst [vmem:[%s5692_s11 + $0x30] sm:$0xff] %v2363_v57  ;;  %v2792_v13 = vpop.f32.mrb[49].mxu1  ;;  %v2579_v45 = vsel %vm2577_vm5, %v2578_v53, %v2576_v6  ;;  %v2569_v14 = vsel %vm2568_vm6, %v5708_v9, %v2567_v3  ;;  %v5804_v24 = vadd.f32 %v4046_v55, %v5732_v23  ;;  %v4471_v48 = vpop.eup %4470  ;;  %4478 = vrsqrt.f32 %v5792_v39 }
 0x2c2   : > { %v2623_v31 = vmul.f32 %v2579_v45, %v5407_v33  ;;  %v2572_v28 = vsel %vm2570_vm7, %v2571_v37, %v2569_v14  ;;  %v2588_v19 = vmul.f32 %v4471_v48, %v5744_v61  ;;  %v2592_v23 = vand.u32 2147483648, %v5744_v61  ;;  %v4473_v1 = vpop.eup %4472  ;;  %v2700_v17 = vpop.permute.xlu0 %2699 }
 0x2c3   : > { %v2622_v50 = vmul.f32 %v2572_v28, %v5409_v34  ;;  %4480 = vrsqrt.f32 %v5799_v46  ;;  %v2585_v34 = vand.u32 2147483648, %v5747_v27  ;;  %v2581_v59 = vmul.f32 %v4473_v1, %v5747_v27 }
 0x2c4   : > { %v4049_v9 = vpop.f32.mrb[50].mxu1  ;;  %2631 = vst [vmem:[%s5692_s11 + $0x48] sm:$0xff] %v2623_v31  ;;  %4482 = vrsqrt.f32 %v5804_v24  ;;  %v2590_v15 = vsel %vm2589_vm8, %v5744_v61, %v2588_v19  ;;  %vm2596_vm14 = vcmp.eq.f32.partialorder %v5789_v5, inf  ;;  %v5831_v10 = vadd.f32 %v2792_v13, %v5762_v60  ;;  %v2695_v37 = vpop.permute.xlu1 %2694 }
 0x2c5   : > { %v2802_v33 = vpop.f32.mrb[51].mxu1  ;;  %2630 = vst [vmem:[%s5692_s11 + $0x40] sm:$0xff] %v2622_v50  ;;  %v4475_v16 = vpop.eup %4474  ;;  %v2593_v56 = vsel %vm2591_vm9, %v2592_v23, %v2590_v15  ;;  %v5834_v18 = vadd.f32 %v4049_v9, %v5773_v40  ;;  %v2583_v57 = vsel %vm2582_vm10, %v5747_v27, %v2581_v59  ;;  %vm2598_vm15 = vcmp.eq.f32.partialorder %v5789_v5, 0.0 }
 0x2c6   : > { %v2625_v49 = vmul.f32 %v2593_v56, %v5426_v51  ;;  %v2602_v61 = vmul.f32 %v4475_v16, %v5755_v4  ;;  %v5841_v26 = vadd.f32 %v2802_v33, %v2675_v38  ;;  %v2586_v60 = vsel %vm2584_vm11, %v2585_v34, %v2583_v57  ;;  %v2935_v28 = vpop.permute.xlu0 %2934 }
 0x2c7   : > { %4484 = vrsqrt.f32 %v5831_v10  ;;  %v2624_v51 = vmul.f32 %v2586_v60, %v5434_v52  ;;  %v2599_v55 = vand.u32 2147483648, %v5789_v5  ;;  %vm2617_vm0 = vcmp.eq.f32.partialorder %v5792_v39, inf }
 0x2c8   : > { %v4052_v21 = vpop.f32.mrb[52].mxu1  ;;  %2633 = vst [vmem:[%s5692_s11 + $0x58] sm:$0xff] %v2625_v49  ;;  %v2604_v3 = vsel %vm2603_vm12, %v5755_v4, %v2602_v61  ;;  %4486 = vrsqrt.f32 %v5834_v18  ;;  %vm2619_vm1 = vcmp.eq.f32.partialorder %v5792_v39, 0.0  ;;  %v2620_v6 = vand.u32 2147483648, %v5792_v39  ;;  %v2930_v56 = vpop.permute.xlu1 %2929 }
 0x2c9   : > { %v2812_v53 = vpop.f32.mrb[53].mxu1  ;;  %v5847_v40 = vadd.f32 %v4052_v21, %v2690_v47  ;;  %v2607_v38 = vsel %vm2605_vm13, %v2606_v32, %v2604_v3  ;;  %2632 = vst [vmem:[%s5692_s11 + $0x50] sm:$0xff] %v2624_v51  ;;  %vm2610_vm2 = vcmp.eq.f32.partialorder %v5799_v46, inf  ;;  %4488 = vrsqrt.f32 %v5841_v26 }
 0x2ca   : > { %v4477_v27 = vpop.eup %4476  ;;  %v2627_v13 = vmul.f32 %v2607_v38, %v5454_v62  ;;  %vm2612_vm3 = vcmp.eq.f32.partialorder %v5799_v46, 0.0  ;;  %v2613_v47 = vand.u32 2147483648, %v5799_v46  ;;  %vm2840_vm4 = vcmp.eq.f32.partialorder %v5804_v24, inf  ;;  %v2945_v60 = vpop.permute.xlu0 %2944 }
 0x2cb   : > { %v2595_v45 = vmul.f32 %v4477_v27, %v5789_v5  ;;  %v4479_v14 = vpop.eup %4478  ;;  %4490 = vrsqrt.f32 %v5847_v40  ;;  %vm2842_vm5 = vcmp.eq.f32.partialorder %v5804_v24, 0.0  ;;  %v2843_v50 = vand.u32 2147483648, %v5804_v24 }
 0x2cc   : > { %v4055_v52 = vpop.f32.mrb[54].mxu1  ;;  %2635 = vst [vmem:[%s5692_s11 + $0x68] sm:$0xff] %v2627_v13  ;;  %v2616_v48 = vmul.f32 %v4479_v14, %v5792_v39  ;;  %v5880_v33 = vadd.f32 %v2812_v53, %v2685_v29  ;;  %vm2833_vm6 = vcmp.eq.f32.partialorder %v5831_v10, inf  ;;  %vm2835_vm7 = vcmp.eq.f32.partialorder %v5831_v10, 0.0 }
 0x2cd   : > { %v2822_v4 = vpop.f32.mrb[55].mxu1  ;;  %v4481_v31 = vpop.eup %4480  ;;  %v2597_v62 = vsel %vm2596_vm14, %v5789_v5, %v2595_v45  ;;  %v5882_v1 = vadd.f32 %v4055_v52, %v2700_v17  ;;  %v2836_v53 = vand.u32 2147483648, %v5831_v10  ;;  %vm2854_vm8 = vcmp.eq.f32.partialorder %v5834_v18, inf }
 0x2ce   : > { %v4483_v9 = vpop.eup %4482  ;;  %v2600_v19 = vsel %vm2598_vm15, %v2599_v55, %v2597_v62  ;;  %v2609_v23 = vmul.f32 %v4481_v31, %v5799_v46  ;;  %v2618_v59 = vsel %vm2617_vm0, %v5792_v39, %v2616_v48  ;;  %4492 = vrsqrt.f32 %v5880_v33 }
 0x2cf   : > { %v2626_v15 = vmul.f32 %v2600_v19, %v5464_v63  ;;  %v2839_v32 = vmul.f32 %v4483_v9, %v5804_v24  ;;  %v2621_v16 = vsel %vm2619_vm1, %v2620_v6, %v2618_v59  ;;  %v5896_v63 = vadd.f32 %v2822_v4, %v2695_v37 }
 0x2d0   : > { %v4074_v34 = vpop.f32.mrb[56].mxu1  ;;  %v2611_v29 = vsel %vm2610_vm2, %v5799_v46, %v2609_v23  ;;  %v2629_v21 = vmul.f32 %v2621_v16, %v5484_v22  ;;  %4494 = vrsqrt.f32 %v5882_v1  ;;  %vm2856_vm9 = vcmp.eq.f32.partialorder %v5834_v18, 0.0 }
 0x2d1   : > { %v3057_v5 = vpop.f32.mrb[57].mxu1  ;;  %2634 = vst [vmem:[%s5692_s11 + $0x60] sm:$0xff] %v2626_v15  ;;  %v2614_v17 = vsel %vm2612_vm3, %v2613_v47, %v2611_v29  ;;  %v2841_v39 = vsel %vm2840_vm4, %v5804_v24, %v2839_v32  ;;  %v4485_v49 = vpop.eup %4484  ;;  %v2857_v55 = vand.u32 2147483648, %v5834_v18  ;;  %vm2847_vm10 = vcmp.eq.f32.partialorder %v5841_v26, inf }
 0x2d2   : > { %v2628_v57 = vmul.f32 %v2614_v17, %v5494_v30  ;;  %v2844_v61 = vsel %vm2842_vm5, %v2843_v50, %v2841_v39  ;;  %v4487_v46 = vpop.eup %4486  ;;  %2637 = vst [vmem:[%s5692_s11 + $0x78] sm:$0xff] %v2629_v21  ;;  %v2832_v3 = vmul.f32 %v4485_v49, %v5831_v10  ;;  %4496 = vrsqrt.f32 %v5896_v63  ;;  %v2940_v47 = vpop.permute.xlu1 %2939 }
 0x2d3   : > { %v2888_v51 = vmul.f32 %v2844_v61, %v5514_v11  ;;  %v2853_v24 = vmul.f32 %v4487_v46, %v5834_v18  ;;  %v4489_v27 = vpop.eup %4488  ;;  %vm2849_vm11 = vcmp.eq.f32.partialorder %v5841_v26, 0.0  ;;  %v2850_v38 = vand.u32 2147483648, %v5841_v26 }
 0x2d4   : > { %v4077_v22 = vpop.f32.mrb[58].mxu1  ;;  %2636 = vst [vmem:[%s5692_s11 + $0x70] sm:$0xff] %v2628_v57  ;;  %v2834_v11 = vsel %vm2833_vm6, %v5831_v10, %v2832_v3  ;;  %v5927_v6 = vadd.f32 %v4074_v34, %v2935_v28  ;;  %v2846_v45 = vmul.f32 %v4489_v27, %v5841_v26  ;;  %v5935_v4 = vadd.f32 %v3057_v5, %v2930_v56 }
 0x2d5   : > { %v3067_v30 = vpop.f32.mrb[59].mxu1  ;;  %2896 = vst [vmem:[%s5692_s11 + $0x88] sm:$0xff] %v2888_v51  ;;  %v4491_v52 = vpop.eup %4490  ;;  %v2837_v37 = vsel %vm2835_vm7, %v2836_v53, %v2834_v11  ;;  %v2855_v13 = vsel %vm2854_vm8, %v5834_v18, %v2853_v24  ;;  %vm2868_vm12 = vcmp.eq.f32.partialorder %v5847_v40, inf  ;;  %v2871_v9 = vand.u32 2147483648, %v5847_v40 }
 0x2d6   : > { %v2887_v31 = vmul.f32 %v2837_v37, %v5524_v36  ;;  %v2858_v28 = vsel %vm2856_vm9, %v2857_v55, %v2855_v13  ;;  %v2867_v10 = vmul.f32 %v4491_v52, %v5847_v40  ;;  %4498 = vrsqrt.f32 %v5927_v6  ;;  %v2955_v36 = vpop.permute.xlu0 %2954  ;;  %v2950_v56 = vpop.permute.xlu1 %2949 }
 0x2d7   : > { %v2890_v48 = vmul.f32 %v2858_v28, %v5539_v0  ;;  %v2848_v50 = vsel %vm2847_vm10, %v5841_v26, %v2846_v45  ;;  %vm2870_vm13 = vcmp.eq.f32.partialorder %v5847_v40, 0.0  ;;  %4500 = vrsqrt.f32 %v5935_v4 }
 0x2d8   : > { %v4080_v14 = vpop.f32.mrb[60].mxu1  ;;  %2895 = vst [vmem:[%s5692_s11 + $0x80] sm:$0xff] %v2887_v31  ;;  %v2851_v18 = vsel %vm2849_vm11, %v2850_v38, %v2848_v50  ;;  %v2869_v19 = vsel %vm2868_vm12, %v5847_v40, %v2867_v10  ;;  %v4493_v0 = vpop.eup %4492  ;;  %vm2861_vm14 = vcmp.eq.f32.partialorder %v5880_v33, inf  ;;  %vm2863_vm15 = vcmp.eq.f32.partialorder %v5880_v33, 0.0 }
 0x2d9   : > { %v3077_v62 = vpop.f32.mrb[61].mxu1  ;;  %2898 = vst [vmem:[%s5692_s11 + $0x98] sm:$0xff] %v2890_v48  ;;  %v2889_v23 = vmul.f32 %v2851_v18, %v5544_v8  ;;  %v2872_v34 = vsel %vm2870_vm13, %v2871_v9, %v2869_v19  ;;  %v2860_v26 = vmul.f32 %v4493_v0, %v5880_v33  ;;  %v5960_v32 = vadd.f32 %v4077_v22, %v2945_v60 }
 0x2da   : > { %v2892_v59 = vmul.f32 %v2872_v34, %v5558_v35  ;;  %v4495_v5 = vpop.eup %4494  ;;  %v2864_v16 = vand.u32 2147483648, %v5880_v33  ;;  %vm2882_vm0 = vcmp.eq.f32.partialorder %v5882_v1, inf  ;;  %v5965_v8 = vadd.f32 %v3067_v30, %v2940_v47  ;;  %v2965_v61 = vpop.permute.xlu0 %2964 }
 0x2db   : > { %2897 = vst [vmem:[%s5692_s11 + $0x90] sm:$0xff] %v2889_v23  ;;  %v5967_v29 = vadd.f32 %v4080_v14, %v2955_v36  ;;  %v2862_v35 = vsel %vm2861_vm14, %v5880_v33, %v2860_v26  ;;  %v2881_v21 = vmul.f32 %v4495_v5, %v5882_v1  ;;  %vm2884_vm1 = vcmp.eq.f32.partialorder %v5882_v1, 0.0  ;;  %v2960_v38 = vpop.permute.xlu1 %2959 }
 0x2dc   : > { %v4083_v15 = vpop.f32.mrb[62].mxu1  ;;  %2900 = vst [vmem:[%s5692_s11 + $0xa8] sm:$0xff] %v2892_v59  ;;  %4502 = vrsqrt.f32 %v5960_v32  ;;  %v4497_v17 = vpop.eup %4496  ;;  %v2865_v39 = vsel %vm2863_vm15, %v2864_v16, %v2862_v35  ;;  %v2885_v49 = vand.u32 2147483648, %v5882_v1  ;;  %v5978_v57 = vadd.f32 %v3077_v62, %v2950_v56 }
 0x2dd   : > { %v3087_v40 = vpop.f32.mrb[63].mxu1  ;;  %4504 = vrsqrt.f32 %v5965_v8  ;;  %v2891_v53 = vmul.f32 %v2865_v39, %v5562_v42  ;;  %v2883_v22 = vsel %vm2882_vm0, %v5882_v1, %v2881_v21  ;;  %v2874_v46 = vmul.f32 %v4497_v17, %v5896_v63 }
 0x2de   : > { %vm2875_vm2 = vcmp.eq.f32.partialorder %v5896_v63, inf  ;;  %v2886_v33 = vsel %vm2884_vm1, %v2885_v49, %v2883_v22  ;;  %v2878_v60 = vand.u32 2147483648, %v5896_v63  ;;  %4506 = vrsqrt.f32 %v5967_v29 }
 0x2df   : > { %v5988_v51 = vadd.f32 %v4083_v15, %v2965_v61  ;;  %2899 = vst [vmem:[%s5692_s11 + $0xa0] sm:$0xff] %v2891_v53  ;;  %v2894_v42 = vmul.f32 %v2886_v33, %v5572_v12  ;;  %v2876_v30 = vsel %vm2875_vm2, %v5896_v63, %v2874_v46  ;;  %vm2877_vm3 = vcmp.eq.f32.partialorder %v5896_v63, 0.0 }
 0x2e0   : > { %v4499_v3 = vpop.eup %4498  ;;  %v2879_v1 = vsel %vm2877_vm3, %v2878_v60, %v2876_v30  ;;  %4508 = vrsqrt.f32 %v5978_v57  ;;  %vm3105_vm4 = vcmp.eq.f32.partialorder %v5927_v6, inf  ;;  %v3108_v11 = vand.u32 2147483648, %v5927_v6 }
 0x2e1   : > { %v3104_v24 = vmul.f32 %v4499_v3, %v5927_v6  ;;  %v4501_v55 = vpop.eup %4500  ;;  %2902 = vst [vmem:[%s5692_s11 + $0xb8] sm:$0xff] %v2894_v42  ;;  %v2893_v27 = vmul.f32 %v2879_v1, %v5576_v43  ;;  %vm3107_vm5 = vcmp.eq.f32.partialorder %v5927_v6, 0.0  ;;  %4510 = vrsqrt.f32 %v5988_v51 }
 0x2e2   : > { %v3097_v63 = vmul.f32 %v4501_v55, %v5935_v4  ;;  %vm3098_vm6 = vcmp.eq.f32.partialorder %v5935_v4, inf  ;;  %v3101_v43 = vand.u32 2147483648, %v5935_v4  ;;  %v3088_v37 = vadd.f32 %v3087_v40, %v2960_v38 }
 0x2e3   : > { %v3106_v12 = vsel %vm3105_vm4, %v5927_v6, %v3104_v24  ;;  %2901 = vst [vmem:[%s5692_s11 + $0xb0] sm:$0xff] %v2893_v27  ;;  %vm3100_vm7 = vcmp.eq.f32.partialorder %v5935_v4, 0.0  ;;  %vm3119_vm8 = vcmp.eq.f32.partialorder %v5960_v32, inf  ;;  %v3122_v10 = vand.u32 2147483648, %v5960_v32 }
 0x2e4   : > { %v3109_v52 = vsel %vm3107_vm5, %v3108_v11, %v3106_v12  ;;  %v3099_v45 = vsel %vm3098_vm6, %v5935_v4, %v3097_v63  ;;  %4512 = vrsqrt.f32 %v3088_v37  ;;  %vm3121_vm9 = vcmp.eq.f32.partialorder %v5960_v32, 0.0 }
 0x2e5   : > { %v3153_v13 = vmul.f32 %v3109_v52, %v5586_v2  ;;  %v3102_v6 = vsel %vm3100_vm7, %v3101_v43, %v3099_v45  ;;  %vm3112_vm10 = vcmp.eq.f32.partialorder %v5965_v8, inf  ;;  %v3115_v4 = vand.u32 2147483648, %v5965_v8 }
 0x2e6   : > { %v4503_v14 = vpop.eup %4502  ;;  %v3152_v31 = vmul.f32 %v3102_v6, %v5590_v25  ;;  %vm3114_vm11 = vcmp.eq.f32.partialorder %v5965_v8, 0.0  ;;  %vm3133_vm12 = vcmp.eq.f32.partialorder %v5967_v29, inf  ;;  %v3136_v0 = vand.u32 2147483648, %v5967_v29 }
 0x2e7   : > { %v4505_v47 = vpop.eup %4504  ;;  %3161 = vst [vmem:[%s5692_s11 + $0xc8] sm:$0xff] %v3153_v13  ;;  %v3118_v28 = vmul.f32 %v4503_v14, %v5960_v32  ;;  %vm3135_vm13 = vcmp.eq.f32.partialorder %v5967_v29, 0.0  ;;  %vm3126_vm14 = vcmp.eq.f32.partialorder %v5978_v57, inf  ;;  %vm3128_vm15 = vcmp.eq.f32.partialorder %v5978_v57, 0.0 }
 0x2e8   : > { %v3111_v62 = vmul.f32 %v4505_v47, %v5965_v8  ;;  %v4507_v2 = vpop.eup %4506  ;;  %3160 = vst [vmem:[%s5692_s11 + $0xc0] sm:$0xff] %v3152_v31  ;;  %vm3147_vm0 = vcmp.eq.f32.partialorder %v5988_v51, inf  ;;  %v3150_v16 = vand.u32 2147483648, %v5988_v51  ;;  %vm3149_vm1 = vcmp.eq.f32.partialorder %v5988_v51, 0.0 }
 0x2e9   : > { %v3120_v48 = vsel %vm3119_vm8, %v5960_v32, %v3118_v28  ;;  %v3132_v9 = vmul.f32 %v4507_v2, %v5967_v29  ;;  %vm3140_vm2 = vcmp.eq.f32.partialorder %v3088_v37, inf  ;;  %v3143_v17 = vand.u32 2147483648, %v3088_v37 }
 0x2ea   : > { %v3123_v25 = vsel %vm3121_vm9, %v3122_v10, %v3120_v48  ;;  %v3113_v50 = vsel %vm3112_vm10, %v5965_v8, %v3111_v62  ;;  %v4509_v36 = vpop.eup %4508  ;;  %vm3142_vm3 = vcmp.eq.f32.partialorder %v3088_v37, 0.0 }
 0x2eb   : > { %v3155_v18 = vmul.f32 %v3123_v25, %v5600_v41  ;;  %v3116_v19 = vsel %vm3114_vm11, %v3115_v4, %v3113_v50  ;;  %v3134_v34 = vsel %vm3133_vm12, %v5967_v29, %v3132_v9  ;;  %v3125_v15 = vmul.f32 %v4509_v36, %v5978_v57  ;;  %v4511_v59 = vpop.eup %4510 }
 0x2ec   : > { %v3154_v23 = vmul.f32 %v3116_v19, %v5604_v54  ;;  %v3137_v26 = vsel %vm3135_vm13, %v3136_v0, %v3134_v34  ;;  %v3129_v41 = vand.u32 2147483648, %v5978_v57  ;;  %v3146_v40 = vmul.f32 %v4511_v59, %v5988_v51 }
 0x2ed   : > { %3163 = vst [vmem:[%s5692_s11 + $0xd8] sm:$0xff] %v3155_v18  ;;  %v3157_v32 = vmul.f32 %v3137_v26, %v5614_v20  ;;  %v3127_v54 = vsel %vm3126_vm14, %v5978_v57, %v3125_v15 }
 0x2ee   : > { %3162 = vst [vmem:[%s5692_s11 + $0xd0] sm:$0xff] %v3154_v23  ;;  %v3130_v5 = vsel %vm3128_vm15, %v3129_v41, %v3127_v54  ;;  %v4513_v8 = vpop.eup %4512  ;;  %v3148_v56 = vsel %vm3147_vm0, %v5988_v51, %v3146_v40 }
 0x2ef   : > { %3165 = vst [vmem:[%s5692_s11 + $0xe8] sm:$0xff] %v3157_v32  ;;  %v3156_v29 = vmul.f32 %v3130_v5, %v5618_v58  ;;  %v3151_v20 = vsel %vm3149_vm1, %v3150_v16, %v3148_v56  ;;  %v3139_v35 = vmul.f32 %v4513_v8, %v3088_v37 }
 0x2f0   : > { %v3159_v21 = vmul.f32 %v3151_v20, %v5628_v44 }
 0x2f1   : > { %3164 = vst [vmem:[%s5692_s11 + $0xe0] sm:$0xff] %v3156_v29  ;;  %v3141_v39 = vsel %vm3140_vm2, %v3088_v37, %v3139_v35 }
 0x2f2   : > { %3167 = vst [vmem:[%s5692_s11 + $0xf8] sm:$0xff] %v3159_v21  ;;  %v3144_v49 = vsel %vm3142_vm3, %v3143_v17, %v3141_v39 }
 0x2f3   : > { %v3158_v57 = vmul.f32 %v3144_v49, %v5632_v7 }
 0x2f5   : > { %3166 = vst [vmem:[%s5692_s11 + $0xf0] sm:$0xff] %v3158_v57 }
 0x2f6 PF: > { %s15_s18 = sadd.s32 1, %s4520_s18  }
 0x2f7   : > { %p12_p4 = scmp.ge.s32.totalorder %s15_s18, 4  }
 0x2f9   :  { %14 = sbr.rel (!%p12_p4) target bundleno = 1 (0x1), region = 73 }

// kernel: tile.18
= control target key start
LH: loop header
LB: loop body
LE: loop exit
PB: predicated region body
PF: predicated region fallthrough
CT: control target
= control target key end

     0   :  { %s22_s0 = inlined_call_operand.vmem [shape: f32[2], index: 0, kind: input, shape index: {}]   ;;  %s23_s1 = inlined_call_operand.vmem [shape: f32[4,2], index: 1, kind: output, shape index: {}]  }
   0x1   :  { %v4_v0 = vld [vmem:[%s22_s0] ss:$0 sm:$0xff] }
   0x2   :  { %5 = vst [vmem:[%s23_s1] sm:$0xf] %v4_v0 }

// kernel: tile.1
= control target key start
LH: loop header
LB: loop body
LE: loop exit
PB: predicated region body
PF: predicated region fallthrough
CT: control target
= control target key end

     0   :  { %vm7_vm0 = vcmask 7168   ;;  %s37_s0 = inlined_call_operand.vmem [shape: f32[4,2], index: 0, kind: input, shape index: {}]   ;;  %s38_s1 = inlined_call_operand.vmem [shape: f32[8,1], index: 1, kind: output, shape index: {}]  }
   0x1   :  { %v4_v0 = vld [vmem:[%s37_s0] sm:$0xf]  ;;  %s17_s0 = smov 127  }
   0x2   :  { %5 = vst [vmem:[#allocation0] sm:$0xf] %v4_v0 }
   0x9   :  { %v9_v1 = vld [vmem:[#allocation0] sm:$0xf]  }
   0xa   :  { %v6_v2 = vld [vmem:[#allocation0] sm:$0xf]   ;;  %10 = vrot.lane.b32.xlu0 %v9_v1, %s17_s0 }
   0xb   :  { %8 = vst.msk [vmem:[%s38_s1] ss:$2 sm:$0xf] %vm7_vm0, %v6_v2  }
  0x7c   :  { %v11_v3 = vpop.permute.xlu0 %10  }
  0x7d   :  { %15 = vst.msk [vmem:[%s38_s1 + $0x1] ss:$2 sm:$0xf] %vm7_vm0, %v11_v3  }

// kernel: mv_refinement_forward.7
= control target key start
LH: loop header
LB: loop body
LE: loop exit
PB: predicated region body
PF: predicated region fallthrough
CT: control target
= control target key end

     0   :  { %s1060_s12 = smov 0   ;;  %s1174_s0 = inlined_call_operand.vmem [shape: f32[2,64,256], index: 0, kind: input, shape index: {}]   ;;  %s1175_s1 = inlined_call_operand.vmem [shape: f32[4,8,64], index: 1, kind: input, shape index: {}]   ;;  %s1176_s2 = inlined_call_operand.vmem [shape: f32[8,1], index: 2, kind: input, shape index: {}]   ;;  %s1177_s3 = inlined_call_operand.vmem [shape: f32[2,8,128], index: 3, kind: output, shape index: {}]  }
   0x1 LB: > { %s711_s13 = sadd.s32 4294967295, %s1031_s12   ;;  %p715_p0 = scmp.ge.s32.totalorder %s1031_s12, 1  ;;  %s1031_s12 = sphi %s1060_s12, %s13_s12  }
   0x2   : > { %p137_p1 = scmp.lt.s32.totalorder %s1031_s12, 3 }
   0x4   : > { %p138_p2 = pnand %p715_p0, %p137_p1 }
   0x5   : > { %p160_p3 = scmp.lt.s32.totalorder (!%p138_p2), %s711_s13, 1  ;;  %v1033_v0 = vmov (!%p138_p2), 0.0|0.0   ;;  %s1034_s18 = smov (!%p138_p2), 127   ;;  %vm1035_vm0 = vmmov (!%p138_p2), 0   ;;  %v1036_v28 = vmov (!%p138_p2), 0.0   ;;  %vm253_vm1 = vcmask (!%p138_p2), 523264  }
   0x6   : > { %141 = sbr.rel (%p138_p2) target bundleno = 404 (0x194), region = 32  ;;  %841 = vmatprep.subr.bf16.mxu0 (!%p138_p2), %v1033_v0  ;;  %853 = vmatprep.subr.bf16.mxu1 (!%p138_p2), %v1033_v0  ;;  %s1037_s19 = smov (!%p138_p2), 119   ;;  %v185_v30 = vld [vmem:[%s1175_s1] sm:$0xff] (!%p138_p2)  ;;  %v1039_v31 = vmov (!%p138_p2), 0   ;;  %vm236_vm2 = vcmask (!%p138_p2), 1039360   ;;  %vm434_vm3 = vcmask (!%p138_p2), 973824  }
   0x7   : > { %781 = vmatprep.mubr.msk.f32.mxu0 (!%p138_p2), %vm1035_vm0, %v1036_v28  ;;  %800 = vmatprep.mubr.msk.f32.mxu1 (!%p138_p2), %vm1035_vm0, %v1036_v28  ;;  %s1038_s22 = smov (!%p138_p2), 118   ;;  %v650_v32 = vld [vmem:[%s1176_s2] sm:$0xff] (!%p138_p2)  ;;  %vm559_vm4 = vcmask (!%p138_p2), 965632  }
   0x8   : > { %1024 = vset.pattern.permute.xlu0 (!%p138_p2), %v1039_v31 }
   0xd   : > { %s1179_s13 = smov (!%p160_p3, %s711_s13), 1 }
   0xe   : > { %s728_s14 = sshll.u32 %s1179_s13, 7  ;;  %s718_s4 = sshll.u32 %s1179_s13, 3 }
   0xf   : > { %s1074_s17 = scalar_lea.vmem %s1174_s0, %s728_s14  ;;  %s168_s7 = scalar_lea.vmem %s1177_s3, %s718_s4 }
  0x10   : > { %v173_v1 = vld [vmem:[%s1074_s17 + $0x20] sm:$0xff]  ;;  %v174_v2 = vld [vmem:[%s1074_s17 + $0x28] sm:$0xff]  ;;  %v175_v6 = vld [vmem:[%s1074_s17 + $0x30] sm:$0xff] }
  0x11   : > { %v169_v3 = vld [vmem:[%s1074_s17] sm:$0xff]  ;;  %v914_v4 = vpack.i.bf16 %v174_v2, %v173_v1  ;;  %v170_v5 = vld [vmem:[%s1074_s17 + $0x8] sm:$0xff]  ;;  %v176_v7 = vld [vmem:[%s1074_s17 + $0x38] sm:$0xff]  ;;  %v857_v24 = vpack.c.bf16 %v175_v6, %v173_v1 }
  0x12   : > { %v904_v8 = vpack.i.bf16 %v170_v5, %v169_v3  ;;  %v171_v9 = vld [vmem:[%s1074_s17 + $0x10] sm:$0xff]  ;;  %v172_v10 = vld [vmem:[%s1074_s17 + $0x18] sm:$0xff]  ;;  %v919_v11 = vpack.i.bf16 %v176_v7, %v175_v6  ;;  %v177_v15 = vld [vmem:[%s1074_s17 + $0x40] sm:$0xff] }
  0x13   : > { %915 = vrot.lane.b32.xlu1 %v914_v4, %s1034_s18  ;;  %v909_v12 = vpack.i.bf16 %v172_v10, %v171_v9  ;;  %v179_v13 = vld [vmem:[%s1074_s17 + $0x50] sm:$0xff]  ;;  %v180_v14 = vld [vmem:[%s1074_s17 + $0x58] sm:$0xff]  ;;  %v178_v16 = vld [vmem:[%s1074_s17 + $0x48] sm:$0xff]  ;;  %v854_v18 = vpack.c.bf16 %v171_v9, %v169_v3 }
  0x14   : > { %905 = vrot.lane.b32.xlu0 %v904_v8, %s1034_s18  ;;  %v929_v17 = vpack.i.bf16 %v180_v14, %v179_v13  ;;  %v924_v19 = vpack.i.bf16 %v178_v16, %v177_v15  ;;  %v183_v20 = vld [vmem:[%s1074_s17 + $0x70] sm:$0xff]  ;;  %v184_v21 = vld [vmem:[%s1074_s17 + $0x78] sm:$0xff]  ;;  %v181_v22 = vld [vmem:[%s1074_s17 + $0x60] sm:$0xff]  ;;  %v860_v27 = vpack.c.bf16 %v179_v13, %v177_v15 }
  0x15   : > { %v182_v23 = vld [vmem:[%s1074_s17 + $0x68] sm:$0xff]  ;;  %855 = vmatpush3.bf16.msra.mxu1 %v854_v18  ;;  %v939_v25 = vpack.i.bf16 %v184_v21, %v183_v20  ;;  %v863_v29 = vpack.c.bf16 %v183_v20, %v181_v22 }
  0x16   : > { %856 = vmatprep.subr.bf16.mxu1 %v1033_v0  ;;  %v934_v26 = vpack.i.bf16 %v182_v23, %v181_v22  ;;  %v719_v21 = vld [vmem:[%s1175_s1 + $0x8] sm:$0xff] }
  0x17   : > { %920 = vrot.lane.b32.xlu1 %v919_v11, %s1034_s18 }
  0x18   : > { %910 = vrot.lane.b32.xlu0 %v909_v12, %s1034_s18 }
  0x19   : > { %858 = vmatpush3.bf16.msra.mxu1 %v857_v24 }
  0x1a   : > { %859 = vmatprep.subr.bf16.mxu1 %v1033_v0 }
  0x1b   : > { %930 = vrot.lane.b32.xlu1 %v929_v17, %s1034_s18 }
  0x1c   : > { %925 = vrot.lane.b32.xlu0 %v924_v19, %s1034_s18 }
  0x1d   : > { %861 = vmatpush3.bf16.msra.mxu1 %v860_v27 }
  0x1e   : > { %862 = vmatprep.subr.bf16.mxu1 %v1033_v0 }
  0x1f   : > { %940 = vrot.lane.b32.xlu1 %v939_v25, %s1034_s18 }
  0x20   : > { %935 = vrot.lane.b32.xlu0 %v934_v26, %s1034_s18 }
  0x21   : > { %864 = vmatpush3.bf16.msra.mxu1 %v863_v29 }
  0x22   : > { %877 = vmatprep.subr.bf16.mxu1 %v1033_v0 }
  0x23   : > { %950 = vrot.lane.b32.xlu1 %v909_v12, %s1037_s19 }
  0x24   : > { %945 = vrot.lane.b32.xlu0 %v904_v8, %s1037_s19  ;;  %801 = vmatmul.mubr.msk.f32.vlgmr.msra.gmra.mrb[0].mxu1 %vm253_vm1, %v185_v30 }
  0x25   : > { %838 = vmatprep.mubr.msk.f32.mxu1 %vm1035_vm0, %v1036_v28 }
  0x27   : > { %960 = vrot.lane.b32.xlu1 %v909_v12, %s1038_s22 }
  0x28   : > { %955 = vrot.lane.b32.xlu0 %v904_v8, %s1038_s22 }
  0x2b   : > { %970 = vrot.lane.b32.xlu1 %v919_v11, %s1037_s19 }
  0x2c   : > { %965 = vrot.lane.b32.xlu0 %v914_v4, %s1037_s19 }
  0x2f   : > { %980 = vrot.lane.b32.xlu1 %v919_v11, %s1038_s22 }
  0x30   : > { %975 = vrot.lane.b32.xlu0 %v914_v4, %s1038_s22 }
  0x33   : > { %990 = vrot.lane.b32.xlu1 %v929_v17, %s1037_s19 }
  0x34   : > { %985 = vrot.lane.b32.xlu0 %v924_v19, %s1037_s19 }
  0x37   : > { %1000 = vrot.lane.b32.xlu1 %v929_v17, %s1038_s22 }
  0x38   : > { %995 = vrot.lane.b32.xlu0 %v924_v19, %s1038_s22 }
  0x3b   : > { %1010 = vrot.lane.b32.xlu1 %v939_v25, %s1037_s19 }
  0x3c   : > { %1005 = vrot.lane.b32.xlu0 %v934_v26, %s1037_s19 }
  0x3f   : > { %1020 = vrot.lane.b32.xlu1 %v939_v25, %s1038_s22 }
  0x40   : > { %1015 = vrot.lane.b32.xlu0 %v934_v26, %s1038_s22 }
  0x44   : > { %653 = vperm.xlu0 %1024, %v650_v32  }
  0x85   : > { %v916_v33 = vpop.permute.xlu1 %915 }
  0x86   : > { %v906_v34 = vpop.permute.xlu0 %905  ;;  %v918_v43 = vunpack.i.h.bf16 %v916_v33  ;;  %v917_v44 = vunpack.i.l.bf16 %v916_v33 }
  0x87   : > { %v908_v35 = vunpack.i.h.bf16 %v906_v34  ;;  %v907_v36 = vunpack.i.l.bf16 %v906_v34 }
  0x88   : > { %v239_v56 = vsel %vm236_vm2, %v917_v44, %v918_v43 }
  0x89   : > { %v921_v37 = vpop.permute.xlu1 %920  ;;  %v237_v46 = vsel %vm236_vm2, %v907_v36, %v908_v35 }
  0x8a   : > { %v923_v38 = vunpack.i.h.bf16 %v921_v37  ;;  %v922_v39 = vunpack.i.l.bf16 %v921_v37  ;;  %v911_v40 = vpop.permute.xlu0 %910 }
  0x8b   : > { %v913_v41 = vunpack.i.h.bf16 %v911_v40  ;;  %v912_v42 = vunpack.i.l.bf16 %v911_v40 }
  0x8c   : > { %v240_v50 = vsel %vm236_vm2, %v922_v39, %v923_v38 }
  0x8d   : > { %v931_v45 = vpop.permute.xlu1 %930  ;;  %v238_v47 = vsel %vm236_vm2, %v912_v42, %v913_v41  ;;  %v845_v60 = vpack.c.bf16 %v240_v50, %v239_v56 }
  0x8e   : > { %v926_v48 = vpop.permute.xlu0 %925  ;;  %v842_v49 = vpack.c.bf16 %v238_v47, %v237_v46  ;;  %v933_v51 = vunpack.i.h.bf16 %v931_v45  ;;  %v932_v52 = vunpack.i.l.bf16 %v931_v45 }
  0x8f   : > { %v928_v53 = vunpack.i.h.bf16 %v926_v48  ;;  %v927_v54 = vunpack.i.l.bf16 %v926_v48 }
  0x90   : > { %843 = vmatpush3.bf16.msra.mxu0 %v842_v49  ;;  %v242_v1 = vsel %vm236_vm2, %v932_v52, %v933_v51 }
  0x91   : > { %v941_v55 = vpop.permute.xlu1 %940  ;;  %844 = vmatprep.subr.bf16.mxu0 %v1033_v0  ;;  %v241_v63 = vsel %vm236_vm2, %v927_v54, %v928_v53 }
  0x92   : > { %v943_v57 = vunpack.i.h.bf16 %v941_v55  ;;  %v942_v58 = vunpack.i.l.bf16 %v941_v55  ;;  %v936_v59 = vpop.permute.xlu0 %935  ;;  %v848_v4 = vpack.c.bf16 %v242_v1, %v241_v63 }
  0x93   : > { %v938_v61 = vunpack.i.h.bf16 %v936_v59  ;;  %v937_v62 = vunpack.i.l.bf16 %v936_v59 }
  0x94   : > { %846 = vmatpush3.bf16.msra.mxu0 %v845_v60  ;;  %v244_v6 = vsel %vm236_vm2, %v942_v58, %v943_v57 }
  0x95   : > { %v951_v2 = vpop.permute.xlu1 %950  ;;  %847 = vmatprep.subr.bf16.mxu0 %v1033_v0  ;;  %v243_v5 = vsel %vm236_vm2, %v937_v62, %v938_v61 }
  0x96   : > { %v946_v3 = vpop.permute.xlu0 %945  ;;  %v953_v7 = vunpack.i.h.bf16 %v951_v2  ;;  %v952_v8 = vunpack.i.l.bf16 %v951_v2  ;;  %v851_v15 = vpack.c.bf16 %v244_v6, %v243_v5 }
  0x97   : > { %v948_v9 = vunpack.i.h.bf16 %v946_v3  ;;  %v947_v10 = vunpack.i.l.bf16 %v946_v3 }
  0x98   : > { %849 = vmatpush3.bf16.msra.mxu0 %v848_v4  ;;  %v436_v16 = vsel %vm434_vm3, %v952_v8, %v953_v7 }
  0x99   : > { %v961_v11 = vpop.permute.xlu1 %960  ;;  %850 = vmatprep.subr.bf16.mxu0 %v1033_v0  ;;  %v435_v17 = vsel %vm434_vm3, %v947_v10, %v948_v9 }
  0x9a   : > { %v963_v12 = vunpack.i.h.bf16 %v961_v11  ;;  %v962_v13 = vunpack.i.l.bf16 %v961_v11  ;;  %v956_v14 = vpop.permute.xlu0 %955  ;;  %v866_v24 = vpack.c.bf16 %v436_v16, %v435_v17 }
  0x9b   : > { %v958_v18 = vunpack.i.h.bf16 %v956_v14  ;;  %v957_v19 = vunpack.i.l.bf16 %v956_v14  ;;  %v722_v14 = vld [vmem:[%s1175_s1 + $0x10] sm:$0xff] }
  0x9c   : > { %v561_v20 = vsel %vm559_vm4, %v962_v13, %v963_v12  ;;  %852 = vmatpush3.bf16.msra.mxu0 %v851_v15 }
  0x9d   : > { %v560_v22 = vsel %vm559_vm4, %v957_v19, %v958_v18  ;;  %v971_v23 = vpop.permute.xlu1 %970  ;;  %865 = vmatprep.subr.bf16.mxu0 %v1033_v0 }
  0x9e   : > { %v878_v25 = vpack.c.bf16 %v561_v20, %v560_v22  ;;  %v973_v26 = vunpack.i.h.bf16 %v971_v23  ;;  %v972_v27 = vunpack.i.l.bf16 %v971_v23  ;;  %v966_v29 = vpop.permute.xlu0 %965 }
  0x9f   : > { %v968_v30 = vunpack.i.h.bf16 %v966_v29  ;;  %v967_v31 = vunpack.i.l.bf16 %v966_v29  ;;  %782 = vmatmul.mubr.msk.f32.vlgmr.msra.gmra.mrb[0].mxu0 %vm253_vm1, %v719_v21 }
  0xa0   : > { %v438_v32 = vsel %vm434_vm3, %v972_v27, %v973_v26  ;;  %867 = vmatpush3.bf16.msra.mxu0 %v866_v24  ;;  %879 = vmatpush3.bf16.msra.mxu1 %v878_v25 }
  0xa1   : > { %v437_v33 = vsel %vm434_vm3, %v967_v31, %v968_v30  ;;  %v981_v34 = vpop.permute.xlu1 %980  ;;  %868 = vmatprep.subr.bf16.mxu0 %v1033_v0  ;;  %880 = vmatprep.subr.bf16.mxu1 %v1033_v0 }
  0xa2   : > { %v869_v35 = vpack.c.bf16 %v438_v32, %v437_v33  ;;  %v983_v36 = vunpack.i.h.bf16 %v981_v34  ;;  %v982_v37 = vunpack.i.l.bf16 %v981_v34  ;;  %v976_v38 = vpop.permute.xlu0 %975  ;;  %819 = vmatprep.mubr.msk.f32.mxu0 %vm1035_vm0, %v1036_v28 }
  0xa3   : > { %v978_v39 = vunpack.i.h.bf16 %v976_v38  ;;  %v977_v40 = vunpack.i.l.bf16 %v976_v38 }
  0xa4   : > { %v563_v41 = vsel %vm559_vm4, %v982_v37, %v983_v36  ;;  %870 = vmatpush3.bf16.msra.mxu0 %v869_v35 }
  0xa5   : > { %v562_v42 = vsel %vm559_vm4, %v977_v40, %v978_v39  ;;  %v991_v43 = vpop.permute.xlu1 %990  ;;  %871 = vmatprep.subr.bf16.mxu0 %v1033_v0 }
  0xa6   : > { %v881_v44 = vpack.c.bf16 %v563_v41, %v562_v42  ;;  %v993_v45 = vunpack.i.h.bf16 %v991_v43  ;;  %v992_v46 = vunpack.i.l.bf16 %v991_v43  ;;  %v986_v47 = vpop.permute.xlu0 %985 }
  0xa7   : > { %v988_v48 = vunpack.i.h.bf16 %v986_v47  ;;  %v987_v49 = vunpack.i.l.bf16 %v986_v47 }
  0xa8   : > { %v440_v50 = vsel %vm434_vm3, %v992_v46, %v993_v45  ;;  %882 = vmatpush3.bf16.msra.mxu1 %v881_v44 }
  0xa9   : > { %v439_v28 = vsel %vm434_vm3, %v987_v49, %v988_v48  ;;  %v1001_v51 = vpop.permute.xlu1 %1000  ;;  %883 = vmatprep.subr.bf16.mxu1 %v1033_v0 }
  0xaa   : > { %v872_v52 = vpack.c.bf16 %v440_v50, %v439_v28  ;;  %v1003_v53 = vunpack.i.h.bf16 %v1001_v51  ;;  %v1002_v54 = vunpack.i.l.bf16 %v1001_v51  ;;  %v996_v55 = vpop.permute.xlu0 %995 }
  0xab   : > { %v998_v56 = vunpack.i.h.bf16 %v996_v55  ;;  %v997_v57 = vunpack.i.l.bf16 %v996_v55 }
  0xac   : > { %v565_v58 = vsel %vm559_vm4, %v1002_v54, %v1003_v53  ;;  %873 = vmatpush3.bf16.msra.mxu0 %v872_v52 }
  0xad   : > { %v564_v59 = vsel %vm559_vm4, %v997_v57, %v998_v56  ;;  %v1011_v60 = vpop.permute.xlu1 %1010  ;;  %874 = vmatprep.subr.bf16.mxu0 %v1033_v0 }
  0xae   : > { %v884_v61 = vpack.c.bf16 %v565_v58, %v564_v59  ;;  %v1013_v62 = vunpack.i.h.bf16 %v1011_v60  ;;  %v1012_v63 = vunpack.i.l.bf16 %v1011_v60  ;;  %v1006_v1 = vpop.permute.xlu0 %1005 }
  0xaf   : > { %v1008_v2 = vunpack.i.h.bf16 %v1006_v1  ;;  %v1007_v3 = vunpack.i.l.bf16 %v1006_v1 }
  0xb0   : > { %v442_v4 = vsel %vm434_vm3, %v1012_v63, %v1013_v62  ;;  %885 = vmatpush3.bf16.msra.mxu1 %v884_v61 }
  0xb1   : > { %v441_v5 = vsel %vm434_vm3, %v1007_v3, %v1008_v2  ;;  %v1021_v6 = vpop.permute.xlu1 %1020  ;;  %886 = vmatprep.subr.bf16.mxu1 %v1033_v0  ;;  %v724_v0 = vld [vmem:[%s1175_s1 + $0x18] sm:$0xff] }
  0xb2   : > { %v875_v7 = vpack.c.bf16 %v442_v4, %v441_v5  ;;  %v1023_v8 = vunpack.i.h.bf16 %v1021_v6  ;;  %v1022_v9 = vunpack.i.l.bf16 %v1021_v6  ;;  %v1016_v10 = vpop.permute.xlu0 %1015 }
  0xb3   : > { %v1018_v11 = vunpack.i.h.bf16 %v1016_v10  ;;  %v1017_v12 = vunpack.i.l.bf16 %v1016_v10 }
  0xb4   : > { %v567_v13 = vsel %vm559_vm4, %v1022_v9, %v1023_v8  ;;  %876 = vmatpush3.bf16.msra.mxu0 %v875_v7 }
  0xb5   : > { %v566_v15 = vsel %vm559_vm4, %v1017_v12, %v1018_v11 }
  0xb6   : > { %v887_v16 = vpack.c.bf16 %v567_v13, %v566_v15 }
  0xb7   : > { %820 = vmatmul.mubr.msk.f32.vlgmr.msra.gmra.mrb[2].mxu0 %vm253_vm1, %v722_v14 }
  0xb8   : > { %888 = vmatpush3.bf16.msra.mxu1 %v887_v16 }
  0xbb   : > { %839 = vmatmul.mubr.msk.f32.vlgmr.msra.gmra.mrb[2].mxu1 %vm253_vm1, %v724_v0 }
  0xc3   : > { %v654_v26 = vpop.permute.xlu0 %653 }
  0xf7   : > { %v396_v17 = vpop.f32.mrb[0].mxu1 }
  0xf8   : > { %v802_v18 = vpop.f32.mrb[1].mxu1 }
 0x172   : > { %v323_v19 = vpop.f32.mrb[0].mxu0 }
 0x173   : > { %v783_v20 = vpop.f32.mrb[1].mxu0  ;;  %v397_v21 = vadd.f32 %v396_v17, %v323_v19 }
 0x18a   : > { %v520_v22 = vpop.f32.mrb[2].mxu0 }
 0x18b   : > { %v524_v23 = vadd.f32 %v520_v22, %v397_v21  ;;  %v821_v24 = vpop.f32.mrb[3].mxu0 }
 0x18e   : > { %v645_v25 = vpop.f32.mrb[2].mxu1 }
 0x18f   : > { %v649_v27 = vadd.f32 %v645_v25, %v524_v23  ;;  %v840_v29 = vpop.f32.mrb[3].mxu1 }
 0x191   : > { %v656_v30 = vadd.f32 %v654_v26, %v649_v27 }
 0x193   : > { %657 = vst [vmem:[%s168_s7] sm:$0xff] %v656_v30 }
 0x194 PF: > { %s13_s12 = sadd.s32 1, %s1031_s12  }
 0x195   : > { %p10_p4 = scmp.ge.s32.totalorder %s13_s12, 4  }
 0x197   :  { %12 = sbr.rel (!%p10_p4) target bundleno = 1 (0x1), region = 65 }

</bundles_post_ra>
